<compile_context>
chip_gen: v6e
topology: v6e:2x2x1
jax: 0.10.0
libtpu: 0.0.40
codegen_flags: <defaults>
</compile_context>

<pallas_src>
import functools
import math

import jax
import jax.numpy as jnp
from jax.experimental import pallas as pl
from jax.experimental.pallas import tpu as pltpu


# Row indices inside the packed f32 "vecs" array ([8, 4*Hp]).
_ROW_B_LSTM = 0   # full 4*Hp width (per-gate 128-lane blocks)
_ROW_INIT_H = 1   # lanes [0:Hp]
_ROW_INIT_C = 2
_ROW_B_Q = 3
_ROW_B_REF = 4
_ROW_B_D1 = 5
_ROW_B_D2 = 6     # scalar at lane 0
# Row indices inside the packed mm-dtype "rows" array ([2, Hp]).
_ROW_V = 0
_ROW_W_D2 = 1


def _round_up(n, m):
    return ((n + m - 1) // m) * m


def _vmem_capacity_bytes():
    try:
        return int(pltpu.get_tpu_info().vmem_capacity_bytes)
    except Exception:
        return 64 * 2**20          # conservative fallback (v7x per-TensorCore VMEM)


def _pick_b_tile(B_pad, per_row_bytes, budget_bytes):
    """Largest batch tile whose buffers fit the budget, keeping lane-dense out
    blocks (b_tile % 128 == 0 or b_tile == B_pad), capped at 256 rows so the
    register-carried recurrence does not spill, preferring >= 4 grid steps."""
    if B_pad <= 256:
        return B_pad               # single tile; full-dim out block is layout-legal
    cands = [c for c in (256, 128) if B_pad % c == 0]
    for need_steps in (4, 1):
        for c in cands:
            if c * per_row_bytes <= budget_bytes and B_pad // c >= need_steps:
                return c
    return cands[-1]


def _critic_kernel(
    x_ref,        # [L, Bt, E]    mm dtype, seq-major embedded inputs (batch tile)
    w_ih_ref,     # [E, 4*Hp]     mm dtype, per-gate 128-lane blocks (i,f,g,o)
    w_hh_ref,     # [Hp, 4*Hp]    mm dtype
    w_q_ref,      # [Hp, Hp]      mm dtype (project_query weight^T, padded)
    w_ref_ref,    # [Hp, Hp]      mm dtype (conv1d k=1 weight^T, padded)
    w_d1_ref,     # [Hp, Hp]      mm dtype (decoder linear 1 weight^T, padded)
    rows_ref,     # [2, Hp]       mm dtype: row 0 = v, row 1 = decoder linear 2 weight
    vecs_ref,     # [8, 4*Hp]     f32: biases / init h,c (see _ROW_*)
    out_ref,      # [1, Bt]       f32 lane-dense critic values
    # scratch
    gates_ref,    # [L, Bt, 4*Hp] mm dtype: hoisted x @ W_ih + b
    enc_ref,      # [L, Bt, Hp]   mm dtype: encoder states, overwritten by their projection
    *,
    hidden_pad: int,
    n_process_block_iters: int,
    use_tanh: bool,
    C: float,
    unroll_seq: bool,
):
    L, Bt, E = x_ref.shape
    Hp = hidden_pad
    G = 4 * Hp
    f32 = jnp.float32

    b_lstm = vecs_ref[_ROW_B_LSTM:_ROW_B_LSTM + 1, :]              # [1, 4Hp]
    init_h = vecs_ref[_ROW_INIT_H:_ROW_INIT_H + 1, 0:Hp]           # [1, Hp]
    init_c = vecs_ref[_ROW_INIT_C:_ROW_INIT_C + 1, 0:Hp]
    b_q = vecs_ref[_ROW_B_Q:_ROW_B_Q + 1, 0:Hp]
    b_refp = vecs_ref[_ROW_B_REF:_ROW_B_REF + 1, 0:Hp]
    b_d1 = vecs_ref[_ROW_B_D1:_ROW_B_D1 + 1, 0:Hp]
    b_d2 = vecs_ref[_ROW_B_D2:_ROW_B_D2 + 1, 0:1]                  # [1, 1]

    # ---- 1) hoisted input projection: one big [L*Bt, E] x [E, 4Hp] MXU matmul ----
    gi = jnp.dot(x_ref[...].reshape(L * Bt, E), w_ih_ref[...],
                 preferred_element_type=f32) + b_lstm
    gates_ref[...] = gi.reshape(L, Bt, G).astype(gates_ref.dtype)

    # ---- 2) LSTM recurrence: per step only h @ W_hh + nonlinearities; h/c stay ----
    # ----    in f32 loop carries.  Gate slices are 128-lane aligned (Hp).      ----
    w_hh = w_hh_ref[...]
    h = jnp.broadcast_to(init_h, (Bt, Hp))
    c = jnp.broadcast_to(init_c, (Bt, Hp))

    def step(t, carry):
        h, c = carry
        gates = gates_ref[t] + jnp.dot(h.astype(w_hh.dtype), w_hh,
                                       preferred_element_type=f32)   # [Bt, 4Hp] f32
        i_g = jax.nn.sigmoid(gates[:, 0 * Hp:1 * Hp])
        f_g = jax.nn.sigmoid(gates[:, 1 * Hp:2 * Hp])
        g_g = jnp.tanh(gates[:, 2 * Hp:3 * Hp])
        o_g = jax.nn.sigmoid(gates[:, 3 * Hp:4 * Hp])
        c_new = f_g * c + i_g * g_g          # padded lanes stay exactly 0
        h_new = o_g * jnp.tanh(c_new)
        enc_ref[t] = h_new.astype(enc_ref.dtype)
        return h_new, c_new

    if unroll_seq:
        for t in range(L):                   # static unroll: full LLO visibility
            h, c = step(t, (h, c))
    else:
        h, c = jax.lax.fori_loop(0, L, step, (h, c), unroll=2)

    # ---- 3) conv1d(k=1) projection of all encoder states in one matmul, in place ----
    proj = jnp.dot(enc_ref[...].reshape(L * Bt, Hp), w_ref_ref[...],
                   preferred_element_type=f32) + b_refp
    enc_ref[...] = proj.reshape(L, Bt, Hp).astype(enc_ref.dtype)

    # ---- 4) process block (SimpleAttention glimpses) ----
    w_q = w_q_ref[...]
    v_row = rows_ref[_ROW_V:_ROW_V + 1, :]                          # [1, Hp]
    state = h                                                       # enc_h_t[-1], f32
    for _ in range(n_process_block_iters):
        q = jnp.dot(state.astype(w_q.dtype), w_q,
                    preferred_element_type=f32) + b_q               # [Bt, Hp] f32
        e3 = enc_ref[...]                                           # [L, Bt, Hp]
        tq = jnp.tanh(q[None, :, :] + e3)                           # f32 elementwise
        # v-weighted contraction on the (otherwise idle) MXU; keep [L, Bt, 1]
        # layout so the softmax never needs a lane-dense relayout.
        u = jax.lax.dot_general(
            tq.reshape(L * Bt, Hp).astype(v_row.dtype), v_row,
            dimension_numbers=(((1,), (1,)), ((), ())),
            preferred_element_type=f32).reshape(L, Bt, 1)
        logits = C * jnp.tanh(u) if use_tanh else u
        m = jnp.max(logits, axis=0, keepdims=True)
        p = jnp.exp(logits - m)
        p = p * pl.reciprocal(jnp.sum(p, axis=0, keepdims=True), approx=False)
        # state[b, h] = sum_l e[l, b, h] * softmax_l(logits)[l, b]
        state = jnp.sum(e3 * p, axis=0)                             # [Bt, Hp] f32

    # ---- 5) decoder MLP: Linear(H,H) -> ReLU -> Linear(H,1), lane-dense output ----
    w_d1 = w_d1_ref[...]
    hdec = jnp.maximum(
        jnp.dot(state.astype(w_d1.dtype), w_d1, preferred_element_type=f32) + b_d1,
        0.0)
    w_d2_row = rows_ref[_ROW_W_D2:_ROW_W_D2 + 1, :]
    out = jax.lax.dot_general(                                       # [1, Bt]
        w_d2_row, hdec.astype(w_d2_row.dtype),
        dimension_numbers=(((1,), (1,)), ((), ())),
        preferred_element_type=f32) + b_d2
    out_ref[...] = out.astype(out_ref.dtype)


def _pack_params(p, Hp, mm_dtype):
    """Transpose + pad torch-layout params into MXU-friendly, lane-aligned operands."""
    H = p["w_hh"].shape[1]
    E = p["w_ih"].shape[1]
    G = 4 * Hp

    def gate_pack_T(w, rows_pad):
        # w: [4H, in_dim] (gate order i,f,g,o) -> [rows_pad, 4*Hp]; each gate in its
        # own 128-lane block.  Zero padding keeps padded lanes of h/c exactly 0.
        out = jnp.zeros((rows_pad, G), jnp.float32)
        in_dim = w.shape[1]
        for g in range(4):
            out = out.at[:in_dim, g * Hp:g * Hp + H].set(w[g * H:(g + 1) * H, :].T)
        return out

    def mat_pad_T(w):          # [H, H] -> [Hp, Hp] transposed, zero padded
        return jnp.zeros((Hp, Hp), jnp.float32).at[:H, :H].set(w.T)

    def row_pad(v):            # [H] -> [1, Hp]
        return jnp.zeros((1, Hp), jnp.float32).at[0, :H].set(v)

    rows = jnp.concatenate([row_pad(p["v"]), row_pad(p["w_d2"][0])], axis=0)   # [2, Hp]

    b_lstm = p["b_ih"] + p["b_hh"]
    vecs = jnp.zeros((8, G), jnp.float32)
    for g in range(4):
        vecs = vecs.at[_ROW_B_LSTM, g * Hp:g * Hp + H].set(b_lstm[g * H:(g + 1) * H])
    vecs = vecs.at[_ROW_INIT_H, :H].set(p["init_h"])
    vecs = vecs.at[_ROW_INIT_C, :H].set(p["init_c"])
    vecs = vecs.at[_ROW_B_Q, :H].set(p["b_q"])
    vecs = vecs.at[_ROW_B_REF, :H].set(p["b_ref"])
    vecs = vecs.at[_ROW_B_D1, :H].set(p["b_d1"])
    vecs = vecs.at[_ROW_B_D2, 0].set(p["b_d2"][0])

    mm = lambda a: a.astype(mm_dtype)
    return {
        "w_ih": mm(gate_pack_T(p["w_ih"], E)),       # [E, 4Hp]
        "w_hh": mm(gate_pack_T(p["w_hh"], Hp)),      # [Hp, 4Hp]
        "w_q": mm(mat_pad_T(p["w_q"])),              # [Hp, Hp]
        "w_ref": mm(mat_pad_T(p["w_ref"][:, :, 0])), # [Hp, Hp]
        "w_d1": mm(mat_pad_T(p["w_d1"])),            # [Hp, Hp]
        "rows": mm(rows),                            # [2, Hp]
        "vecs": vecs,                                # [8, 4Hp] f32
    }


def critic_network_lstm(inputs, params, *, n_process_block_iters, tanh_exploration,
                        use_tanh, mm_dtype=jnp.float32, b_tile=None):
    """inputs: [B, L, E] float32.  Returns [B, 1] float32.

    mm_dtype: dtype of MXU operands / large scratches (f32 exact, bf16 fast);
    accumulation and all elementwise math stay f32 (v5e-safe)."""
    B, L, E = inputs.shape
    H = params["init_h"].shape[0]
    Hp = max(128, _round_up(H, 128))
    G = 4 * Hp

    packed = _pack_params(params, Hp, mm_dtype)

    # Batch padding: rows are independent; padded rows are computed and dropped.
    if B <= 256:
        B_pad = max(8, _round_up(B, 8))     # single tile: full-dim out block is legal
    else:
        B_pad = _round_up(B, 128)           # lane-dense (multiple-of-128) out blocks
    x = inputs
    if B_pad != B:
        x = jnp.pad(x, ((0, B_pad - B), (0, 0), (0, 0)))
    # Seq-major layout (torch's .transpose(0,1)); per-step scratch access then hits
    # the leading "page" dim, the cheapest dynamic-index pattern on TPU.
    x_lbe = jnp.transpose(x, (1, 0, 2)).astype(mm_dtype)            # [L, B_pad, E]

    weights = (packed["w_ih"], packed["w_hh"], packed["w_q"], packed["w_ref"],
               packed["w_d1"], packed["rows"], packed["vecs"])
    w_bytes = sum(int(w.size) * w.dtype.itemsize for w in weights)
    item = jnp.dtype(mm_dtype).itemsize
    # Per batch row: double-buffered x block + gates + enc scratch + out block.
    per_row = 2 * L * E * item + L * (G + Hp) * item + 2 * 4

    vmem_cap = _vmem_capacity_bytes()       # 64 MiB on v7x, 128 MiB on v5e/v6e
    buf_budget = int(0.45 * vmem_cap) - 2 * w_bytes

    if b_tile is None:
        b_tile = _pick_b_tile(B_pad, per_row, buf_budget)
    b_tile = min(b_tile, B_pad)
    assert B_pad % b_tile == 0, (B_pad, b_tile)
    grid = (B_pad // b_tile,)
    # TODO(synk): for very long sequences, chunk the [L, Bt, 4Hp] gates scratch into
    # a 2-deep L-block ring instead of holding the whole hoisted projection at once.

    kernel = functools.partial(
        _critic_kernel,
        hidden_pad=Hp,
        n_process_block_iters=n_process_block_iters,
        use_tanh=use_tanh,
        C=float(tanh_exploration),
        unroll_seq=(L <= 32),
    )

    x_spec = pl.BlockSpec((L, b_tile, E), lambda b: (0, b, 0))
    w_specs = [pl.BlockSpec(w.shape, lambda b: (0, 0)) for w in weights]
    out_spec = pl.BlockSpec((1, b_tile), lambda b: (0, b))

    vmem_limit = int(min(0.9 * vmem_cap,
                         max(32 * 2**20, 2 * (2 * w_bytes + b_tile * per_row))))

    out = pl.pallas_call(
        kernel,
        out_shape=jax.ShapeDtypeStruct((1, B_pad), jnp.float32),
        grid_spec=pltpu.PrefetchScalarGridSpec(
            num_scalar_prefetch=0,
            grid=grid,
            in_specs=[x_spec] + w_specs,
            out_specs=out_spec,
            scratch_shapes=[
                pltpu.VMEM((L, b_tile, G), mm_dtype),    # hoisted input gates
                pltpu.VMEM((L, b_tile, Hp), mm_dtype),   # enc states / projected refs
            ],
        ),
        compiler_params=pltpu.CompilerParams(
            dimension_semantics=("parallel",),
            vmem_limit_bytes=vmem_limit,
        ),
    )(x_lbe, *weights)
    return out[0, :B].reshape(B, 1)


def init_params(key, embed_dim, hidden_dim):
    """Deterministic synthetic parameters, PyTorch-style uniform init, torch layouts."""
    E, H = embed_dim, hidden_dim
    std = 1.0 / math.sqrt(H)
    ks = jax.random.split(key, 16)
    u = lambda k, shape: jax.random.uniform(k, shape, jnp.float32, -std, std)
    return {
        "w_ih": u(ks[0], (4 * H, E)),       # gate order i, f, g, o
        "w_hh": u(ks[1], (4 * H, H)),
        "b_ih": u(ks[2], (4 * H,)),
        "b_hh": u(ks[3], (4 * H,)),
        "init_h": u(ks[4], (H,)),
        "init_c": u(ks[5], (H,)),
        "w_q": u(ks[6], (H, H)),            # project_query (Linear)
        "b_q": u(ks[7], (H,)),
        "w_ref": u(ks[8], (H, H, 1)),       # project_ref (Conv1d, kernel_size=1)
        "b_ref": u(ks[9], (H,)),
        "v": u(ks[10], (H,)),
        "w_d1": u(ks[11], (H, H)),          # decoder Linear(H, H)
        "b_d1": u(ks[12], (H,)),
        "w_d2": u(ks[13], (1, H)),          # decoder Linear(H, 1)
        "b_d2": u(ks[14], (1,)),
    }


def reference_forward(inputs, p, *, n_process_block_iters, tanh_exploration, use_tanh):
    """Pure-JAX reference mirroring the PyTorch forward (correctness check)."""
    B, L, E = inputs.shape
    H = p["init_h"].shape[0]
    hi = jax.lax.Precision.HIGHEST
    x = jnp.transpose(inputs, (1, 0, 2))                      # [L, B, E]
    w_ih_t, w_hh_t = p["w_ih"].T, p["w_hh"].T
    b = (p["b_ih"] + p["b_hh"])[None, :]
    h = jnp.broadcast_to(p["init_h"][None, :], (B, H))
    c = jnp.broadcast_to(p["init_c"][None, :], (B, H))
    enc = []
    for t in range(L):
        gates = (jnp.dot(x[t], w_ih_t, precision=hi)
                 + jnp.dot(h, w_hh_t, precision=hi) + b)
        i = jax.nn.sigmoid(gates[:, :H])
        f = jax.nn.sigmoid(gates[:, H:2 * H])
        g = jnp.tanh(gates[:, 2 * H:3 * H])
        o = jax.nn.sigmoid(gates[:, 3 * H:])
        c = f * c + i * g
        h = o * jnp.tanh(c)
        enc.append(h)
    enc = jnp.stack(enc)                                      # [L, B, H]
    e3 = jnp.dot(enc, p["w_ref"][:, :, 0].T, precision=hi) + p["b_ref"][None, None, :]
    state = h
    for _ in range(n_process_block_iters):
        q = jnp.dot(state, p["w_q"].T, precision=hi) + p["b_q"][None, :]
        u = jnp.sum(jnp.tanh(q[None] + e3) * p["v"][None, None, :], axis=-1)   # [L, B]
        logits = tanh_exploration * jnp.tanh(u) if use_tanh else u
        pr = jax.nn.softmax(logits, axis=0)
        state = jnp.sum(e3 * pr[:, :, None], axis=0)
    hdec = jax.nn.relu(jnp.dot(state, p["w_d1"].T, precision=hi) + p["b_d1"][None, :])
    return jnp.dot(hdec, p["w_d2"].T, precision=hi) + p["b_d2"][None, :]


if __name__ == "__main__":
    embed_dim = 32
    hidden_dim = 32
    sourceL = 8
    batch = 2
    n_process_block_iters = 3
    tanh_exploration = 10.0
    use_tanh = True

    key = jax.random.PRNGKey(0)
    k_in, k_par = jax.random.split(key)
    inputs = jax.random.normal(k_in, (batch, sourceL, embed_dim), jnp.float32)
    params = init_params(k_par, embed_dim, hidden_dim)

    ref = reference_forward(
        inputs, params,
        n_process_block_iters=n_process_block_iters,
        tanh_exploration=tanh_exploration,
        use_tanh=use_tanh,
    )

    # Exact-semantics path (f32 MXU operands).  Loose-ish bound only to stay
    # robust to MXU f32 pass-count differences; logic bugs give O(0.1+) errors.
    out_f32 = critic_network_lstm(
        inputs, params,
        n_process_block_iters=n_process_block_iters,
        tanh_exploration=tanh_exploration,
        use_tanh=use_tanh,
        mm_dtype=jnp.float32,
    )
    out_f32 = jax.block_until_ready(out_f32)
    assert out_f32.shape == (batch, 1)
    assert jnp.allclose(out_f32, ref, rtol=1e-2, atol=1e-2), (out_f32, ref)

    # Production path: bf16 MXU operands / scratches, f32 accumulation.
    out_bf16 = critic_network_lstm(
        inputs, params,
        n_process_block_iters=n_process_block_iters,
        tanh_exploration=tanh_exploration,
        use_tanh=use_tanh,
        mm_dtype=jnp.bfloat16,
    )
    out_bf16 = jax.block_until_ready(out_bf16)
    assert out_bf16.shape == (batch, 1)
    assert jnp.all(jnp.isfinite(out_bf16))
    assert jnp.allclose(out_bf16, ref, rtol=1e-1, atol=1e-1), (out_bf16, ref)

    print("KERNEL_OK")
</pallas_src>

<mosaic_0001>
module attributes {stable_mosaic.version = 11 : i64} {
  func.func @_critic_kernel(%arg0: i32, %arg1: memref<8x8x32xf32, #tpu.memory_space<vmem>>, %arg2: memref<32x512xf32, #tpu.memory_space<vmem>>, %arg3: memref<128x512xf32, #tpu.memory_space<vmem>>, %arg4: memref<128x128xf32, #tpu.memory_space<vmem>>, %arg5: memref<128x128xf32, #tpu.memory_space<vmem>>, %arg6: memref<128x128xf32, #tpu.memory_space<vmem>>, %arg7: memref<2x128xf32, #tpu.memory_space<vmem>>, %arg8: memref<8x512xf32, #tpu.memory_space<vmem>>, %arg9: memref<1x8xf32, #tpu.memory_space<vmem>>, %arg10: memref<8x8x512xf32, #tpu.memory_space<vmem>>, %arg11: memref<8x8x128xf32, #tpu.memory_space<vmem>>) attributes {dimension_semantics = [#tpu.dimension_semantics<parallel>], iteration_bounds = array<i64: 1>, scalar_prefetch = 0 : i64, scratch_operands = 2 : i64, tpu.core_type = #tpu.core_type<tc>, window_params = [{transform_indices = @transform_0, window_bounds = array<i64: 8, 8, 32>}, {pipeline_mode = #tpu.pipeline_mode<synchronous>, transform_indices = @transform_1, window_bounds = array<i64: 32, 512>}, {pipeline_mode = #tpu.pipeline_mode<synchronous>, transform_indices = @transform_2, window_bounds = array<i64: 128, 512>}, {pipeline_mode = #tpu.pipeline_mode<synchronous>, transform_indices = @transform_3, window_bounds = array<i64: 128, 128>}, {pipeline_mode = #tpu.pipeline_mode<synchronous>, transform_indices = @transform_4, window_bounds = array<i64: 128, 128>}, {pipeline_mode = #tpu.pipeline_mode<synchronous>, transform_indices = @transform_5, window_bounds = array<i64: 128, 128>}, {pipeline_mode = #tpu.pipeline_mode<synchronous>, transform_indices = @transform_6, window_bounds = array<i64: 2, 128>}, {pipeline_mode = #tpu.pipeline_mode<synchronous>, transform_indices = @transform_7, window_bounds = array<i64: 8, 512>}, {transform_indices = @transform_8, window_bounds = array<i64: 1, 8>}]} {
    %c0 = arith.constant 0 : index
    %c0_0 = arith.constant 0 : index
    %0 = vector.load %arg8[%c0, %c0_0] : memref<8x512xf32, #tpu.memory_space<vmem>>, vector<1x512xf32>
    %c1 = arith.constant 1 : index
    %c0_1 = arith.constant 0 : index
    %1 = vector.load %arg8[%c1, %c0_1] : memref<8x512xf32, #tpu.memory_space<vmem>>, vector<1x128xf32>
    %c2 = arith.constant 2 : index
    %c0_2 = arith.constant 0 : index
    %2 = vector.load %arg8[%c2, %c0_2] : memref<8x512xf32, #tpu.memory_space<vmem>>, vector<1x128xf32>
    %c3 = arith.constant 3 : index
    %c0_3 = arith.constant 0 : index
    %3 = vector.load %arg8[%c3, %c0_3] : memref<8x512xf32, #tpu.memory_space<vmem>>, vector<1x128xf32>
    %c4 = arith.constant 4 : index
    %c0_4 = arith.constant 0 : index
    %4 = vector.load %arg8[%c4, %c0_4] : memref<8x512xf32, #tpu.memory_space<vmem>>, vector<1x128xf32>
    %c5 = arith.constant 5 : index
    %c0_5 = arith.constant 0 : index
    %5 = vector.load %arg8[%c5, %c0_5] : memref<8x512xf32, #tpu.memory_space<vmem>>, vector<1x128xf32>
    %c6 = arith.constant 6 : index
    %c0_6 = arith.constant 0 : index
    %6 = vector.load %arg8[%c6, %c0_6] : memref<8x512xf32, #tpu.memory_space<vmem>>, vector<1x1xf32>
    %c0_7 = arith.constant 0 : index
    %c0_8 = arith.constant 0 : index
    %c0_9 = arith.constant 0 : index
    %7 = vector.load %arg1[%c0_7, %c0_8, %c0_9] : memref<8x8x32xf32, #tpu.memory_space<vmem>>, vector<8x8x32xf32>
    %8 = vector.shape_cast %7 : vector<8x8x32xf32> to vector<64x32xf32>
    %c0_10 = arith.constant 0 : index
    %c0_11 = arith.constant 0 : index
    %9 = vector.load %arg2[%c0_10, %c0_11] : memref<32x512xf32, #tpu.memory_space<vmem>>, vector<32x512xf32>
    %cst = arith.constant dense<0.000000e+00> : vector<64x512xf32>
    %10 = tpu.matmul %8, %9, %cst {dimension_numbers = #tpu.dot_dimension_numbers<[1], [0], [0], [1], [0, 0, 1, 1], [], []>} : vector<64x32xf32>, vector<32x512xf32>, vector<64x512xf32> -> vector<64x512xf32>
    %11 = vector.broadcast %0 : vector<1x512xf32> to vector<64x512xf32>
    %12 = arith.addf %10, %11 : vector<64x512xf32>
    %13 = vector.shape_cast %12 : vector<64x512xf32> to vector<8x8x512xf32>
    %c0_12 = arith.constant 0 : index
    %c0_13 = arith.constant 0 : index
    %c0_14 = arith.constant 0 : index
    %14 = vector.load %arg10[%c0_12, %c0_13, %c0_14] : memref<8x8x512xf32, #tpu.memory_space<vmem>>, vector<8x8x512xf32>
    tpu.vector_store %arg10[%c0_12, %c0_13, %c0_14], %13 {strides = array<i32>} : memref<8x8x512xf32, #tpu.memory_space<vmem>>, vector<8x8x512xf32>,
    %c0_15 = arith.constant 0 : index
    %c0_16 = arith.constant 0 : index
    %15 = vector.load %arg3[%c0_15, %c0_16] : memref<128x512xf32, #tpu.memory_space<vmem>>, vector<128x512xf32>
    %16 = vector.shape_cast %1 : vector<1x128xf32> to vector<1x128xf32>
    %17 = vector.broadcast %16 : vector<1x128xf32> to vector<8x128xf32>
    %18 = vector.shape_cast %2 : vector<1x128xf32> to vector<1x128xf32>
    %19 = vector.broadcast %18 : vector<1x128xf32> to vector<8x128xf32>
    %c0_17 = arith.constant 0 : index
    %c0_18 = arith.constant 0 : index
    %c0_19 = arith.constant 0 : index
    %20 = vector.load %arg10[%c0_17, %c0_18, %c0_19] : memref<8x8x512xf32, #tpu.memory_space<vmem>>, vector<1x8x512xf32>
    %21 = vector.shape_cast %20 : vector<1x8x512xf32> to vector<8x512xf32>
    %cst_20 = arith.constant dense<0.000000e+00> : vector<8x512xf32>
    %22 = tpu.matmul %17, %15, %cst_20 {dimension_numbers = #tpu.dot_dimension_numbers<[1], [0], [0], [1], [0, 0, 1, 1], [], []>} : vector<8x128xf32>, vector<128x512xf32>, vector<8x512xf32> -> vector<8x512xf32>
    %23 = arith.addf %21, %22 : vector<8x512xf32>
    %24 = vector.extract_strided_slice %23 {offsets = [0, 0], sizes = [8, 128], strides = [1, 1]} : vector<8x512xf32> to vector<8x128xf32>
    %25 = arith.negf %24 : vector<8x128xf32>
    %26 = math.exp %25 : vector<8x128xf32>
    %cst_21 = arith.constant 1.000000e+00 : f32
    %27 = vector.broadcast %cst_21 : f32 to vector<8x128xf32>
    %28 = arith.addf %27, %26 : vector<8x128xf32>
    %29 = arith.divf %27, %28 : vector<8x128xf32>
    %30 = vector.extract_strided_slice %23 {offsets = [0, 128], sizes = [8, 128], strides = [1, 1]} : vector<8x512xf32> to vector<8x128xf32>
    %31 = arith.negf %30 : vector<8x128xf32>
    %32 = math.exp %31 : vector<8x128xf32>
    %cst_22 = arith.constant 1.000000e+00 : f32
    %33 = vector.broadcast %cst_22 : f32 to vector<8x128xf32>
    %34 = arith.addf %33, %32 : vector<8x128xf32>
    %35 = arith.divf %33, %34 : vector<8x128xf32>
    %36 = vector.extract_strided_slice %23 {offsets = [0, 256], sizes = [8, 128], strides = [1, 1]} : vector<8x512xf32> to vector<8x128xf32>
    %37 = math.tanh %36 : vector<8x128xf32>
    %38 = vector.extract_strided_slice %23 {offsets = [0, 384], sizes = [8, 128], strides = [1, 1]} : vector<8x512xf32> to vector<8x128xf32>
    %39 = arith.negf %38 : vector<8x128xf32>
    %40 = math.exp %39 : vector<8x128xf32>
    %cst_23 = arith.constant 1.000000e+00 : f32
    %41 = vector.broadcast %cst_23 : f32 to vector<8x128xf32>
    %42 = arith.addf %41, %40 : vector<8x128xf32>
    %43 = arith.divf %41, %42 : vector<8x128xf32>
    %44 = arith.mulf %35, %19 : vector<8x128xf32>
    %45 = arith.mulf %29, %37 : vector<8x128xf32>
    %46 = arith.addf %44, %45 : vector<8x128xf32>
    %47 = math.tanh %46 : vector<8x128xf32>
    %48 = arith.mulf %43, %47 : vector<8x128xf32>
    %c0_24 = arith.constant 0 : index
    %c0_25 = arith.constant 0 : index
    %c0_26 = arith.constant 0 : index
    %49 = vector.load %arg11[%c0_24, %c0_25, %c0_26] : memref<8x8x128xf32, #tpu.memory_space<vmem>>, vector<1x8x128xf32>
    %50 = vector.shape_cast %49 : vector<1x8x128xf32> to vector<8x128xf32>
    %51 = vector.shape_cast %48 : vector<8x128xf32> to vector<1x8x128xf32>
    tpu.vector_store %arg11[%c0_24, %c0_25, %c0_26], %51 {strides = array<i32>} : memref<8x8x128xf32, #tpu.memory_space<vmem>>, vector<1x8x128xf32>,
    %c1_27 = arith.constant 1 : index
    %c0_28 = arith.constant 0 : index
    %c0_29 = arith.constant 0 : index
    %52 = vector.load %arg10[%c1_27, %c0_28, %c0_29] : memref<8x8x512xf32, #tpu.memory_space<vmem>>, vector<1x8x512xf32>
    %53 = vector.shape_cast %52 : vector<1x8x512xf32> to vector<8x512xf32>
    %cst_30 = arith.constant dense<0.000000e+00> : vector<8x512xf32>
    %54 = tpu.matmul %48, %15, %cst_30 {dimension_numbers = #tpu.dot_dimension_numbers<[1], [0], [0], [1], [0, 0, 1, 1], [], []>} : vector<8x128xf32>, vector<128x512xf32>, vector<8x512xf32> -> vector<8x512xf32>
    %55 = arith.addf %53, %54 : vector<8x512xf32>
    %56 = vector.extract_strided_slice %55 {offsets = [0, 0], sizes = [8, 128], strides = [1, 1]} : vector<8x512xf32> to vector<8x128xf32>
    %57 = arith.negf %56 : vector<8x128xf32>
    %58 = math.exp %57 : vector<8x128xf32>
    %cst_31 = arith.constant 1.000000e+00 : f32
    %59 = vector.broadcast %cst_31 : f32 to vector<8x128xf32>
    %60 = arith.addf %59, %58 : vector<8x128xf32>
    %61 = arith.divf %59, %60 : vector<8x128xf32>
    %62 = vector.extract_strided_slice %55 {offsets = [0, 128], sizes = [8, 128], strides = [1, 1]} : vector<8x512xf32> to vector<8x128xf32>
    %63 = arith.negf %62 : vector<8x128xf32>
    %64 = math.exp %63 : vector<8x128xf32>
    %cst_32 = arith.constant 1.000000e+00 : f32
    %65 = vector.broadcast %cst_32 : f32 to vector<8x128xf32>
    %66 = arith.addf %65, %64 : vector<8x128xf32>
    %67 = arith.divf %65, %66 : vector<8x128xf32>
    %68 = vector.extract_strided_slice %55 {offsets = [0, 256], sizes = [8, 128], strides = [1, 1]} : vector<8x512xf32> to vector<8x128xf32>
    %69 = math.tanh %68 : vector<8x128xf32>
    %70 = vector.extract_strided_slice %55 {offsets = [0, 384], sizes = [8, 128], strides = [1, 1]} : vector<8x512xf32> to vector<8x128xf32>
    %71 = arith.negf %70 : vector<8x128xf32>
    %72 = math.exp %71 : vector<8x128xf32>
    %cst_33 = arith.constant 1.000000e+00 : f32
    %73 = vector.broadcast %cst_33 : f32 to vector<8x128xf32>
    %74 = arith.addf %73, %72 : vector<8x128xf32>
    %75 = arith.divf %73, %74 : vector<8x128xf32>
    %76 = arith.mulf %67, %46 : vector<8x128xf32>
    %77 = arith.mulf %61, %69 : vector<8x128xf32>
    %78 = arith.addf %76, %77 : vector<8x128xf32>
    %79 = math.tanh %78 : vector<8x128xf32>
    %80 = arith.mulf %75, %79 : vector<8x128xf32>
    %c1_34 = arith.constant 1 : index
    %c0_35 = arith.constant 0 : index
    %c0_36 = arith.constant 0 : index
    %81 = vector.load %arg11[%c1_34, %c0_35, %c0_36] : memref<8x8x128xf32, #tpu.memory_space<vmem>>, vector<1x8x128xf32>
    %82 = vector.shape_cast %81 : vector<1x8x128xf32> to vector<8x128xf32>
    %83 = vector.shape_cast %80 : vector<8x128xf32> to vector<1x8x128xf32>
    tpu.vector_store %arg11[%c1_34, %c0_35, %c0_36], %83 {strides = array<i32>} : memref<8x8x128xf32, #tpu.memory_space<vmem>>, vector<1x8x128xf32>,
    %c2_37 = arith.constant 2 : index
    %c0_38 = arith.constant 0 : index
    %c0_39 = arith.constant 0 : index
    %84 = vector.load %arg10[%c2_37, %c0_38, %c0_39] : memref<8x8x512xf32, #tpu.memory_space<vmem>>, vector<1x8x512xf32>
    %85 = vector.shape_cast %84 : vector<1x8x512xf32> to vector<8x512xf32>
    %cst_40 = arith.constant dense<0.000000e+00> : vector<8x512xf32>
    %86 = tpu.matmul %80, %15, %cst_40 {dimension_numbers = #tpu.dot_dimension_numbers<[1], [0], [0], [1], [0, 0, 1, 1], [], []>} : vector<8x128xf32>, vector<128x512xf32>, vector<8x512xf32> -> vector<8x512xf32>
    %87 = arith.addf %85, %86 : vector<8x512xf32>
    %88 = vector.extract_strided_slice %87 {offsets = [0, 0], sizes = [8, 128], strides = [1, 1]} : vector<8x512xf32> to vector<8x128xf32>
    %89 = arith.negf %88 : vector<8x128xf32>
    %90 = math.exp %89 : vector<8x128xf32>
    %cst_41 = arith.constant 1.000000e+00 : f32
    %91 = vector.broadcast %cst_41 : f32 to vector<8x128xf32>
    %92 = arith.addf %91, %90 : vector<8x128xf32>
    %93 = arith.divf %91, %92 : vector<8x128xf32>
    %94 = vector.extract_strided_slice %87 {offsets = [0, 128], sizes = [8, 128], strides = [1, 1]} : vector<8x512xf32> to vector<8x128xf32>
    %95 = arith.negf %94 : vector<8x128xf32>
    %96 = math.exp %95 : vector<8x128xf32>
    %cst_42 = arith.constant 1.000000e+00 : f32
    %97 = vector.broadcast %cst_42 : f32 to vector<8x128xf32>
    %98 = arith.addf %97, %96 : vector<8x128xf32>
    %99 = arith.divf %97, %98 : vector<8x128xf32>
    %100 = vector.extract_strided_slice %87 {offsets = [0, 256], sizes = [8, 128], strides = [1, 1]} : vector<8x512xf32> to vector<8x128xf32>
    %101 = math.tanh %100 : vector<8x128xf32>
    %102 = vector.extract_strided_slice %87 {offsets = [0, 384], sizes = [8, 128], strides = [1, 1]} : vector<8x512xf32> to vector<8x128xf32>
    %103 = arith.negf %102 : vector<8x128xf32>
    %104 = math.exp %103 : vector<8x128xf32>
    %cst_43 = arith.constant 1.000000e+00 : f32
    %105 = vector.broadcast %cst_43 : f32 to vector<8x128xf32>
    %106 = arith.addf %105, %104 : vector<8x128xf32>
    %107 = arith.divf %105, %106 : vector<8x128xf32>
    %108 = arith.mulf %99, %78 : vector<8x128xf32>
    %109 = arith.mulf %93, %101 : vector<8x128xf32>
    %110 = arith.addf %108, %109 : vector<8x128xf32>
    %111 = math.tanh %110 : vector<8x128xf32>
    %112 = arith.mulf %107, %111 : vector<8x128xf32>
    %c2_44 = arith.constant 2 : index
    %c0_45 = arith.constant 0 : index
    %c0_46 = arith.constant 0 : index
    %113 = vector.load %arg11[%c2_44, %c0_45, %c0_46] : memref<8x8x128xf32, #tpu.memory_space<vmem>>, vector<1x8x128xf32>
    %114 = vector.shape_cast %113 : vector<1x8x128xf32> to vector<8x128xf32>
    %115 = vector.shape_cast %112 : vector<8x128xf32> to vector<1x8x128xf32>
    tpu.vector_store %arg11[%c2_44, %c0_45, %c0_46], %115 {strides = array<i32>} : memref<8x8x128xf32, #tpu.memory_space<vmem>>, vector<1x8x128xf32>,
    %c3_47 = arith.constant 3 : index
    %c0_48 = arith.constant 0 : index
    %c0_49 = arith.constant 0 : index
    %116 = vector.load %arg10[%c3_47, %c0_48, %c0_49] : memref<8x8x512xf32, #tpu.memory_space<vmem>>, vector<1x8x512xf32>
    %117 = vector.shape_cast %116 : vector<1x8x512xf32> to vector<8x512xf32>
    %cst_50 = arith.constant dense<0.000000e+00> : vector<8x512xf32>
    %118 = tpu.matmul %112, %15, %cst_50 {dimension_numbers = #tpu.dot_dimension_numbers<[1], [0], [0], [1], [0, 0, 1, 1], [], []>} : vector<8x128xf32>, vector<128x512xf32>, vector<8x512xf32> -> vector<8x512xf32>
    %119 = arith.addf %117, %118 : vector<8x512xf32>
    %120 = vector.extract_strided_slice %119 {offsets = [0, 0], sizes = [8, 128], strides = [1, 1]} : vector<8x512xf32> to vector<8x128xf32>
    %121 = arith.negf %120 : vector<8x128xf32>
    %122 = math.exp %121 : vector<8x128xf32>
    %cst_51 = arith.constant 1.000000e+00 : f32
    %123 = vector.broadcast %cst_51 : f32 to vector<8x128xf32>
    %124 = arith.addf %123, %122 : vector<8x128xf32>
    %125 = arith.divf %123, %124 : vector<8x128xf32>
    %126 = vector.extract_strided_slice %119 {offsets = [0, 128], sizes = [8, 128], strides = [1, 1]} : vector<8x512xf32> to vector<8x128xf32>
    %127 = arith.negf %126 : vector<8x128xf32>
    %128 = math.exp %127 : vector<8x128xf32>
    %cst_52 = arith.constant 1.000000e+00 : f32
    %129 = vector.broadcast %cst_52 : f32 to vector<8x128xf32>
    %130 = arith.addf %129, %128 : vector<8x128xf32>
    %131 = arith.divf %129, %130 : vector<8x128xf32>
    %132 = vector.extract_strided_slice %119 {offsets = [0, 256], sizes = [8, 128], strides = [1, 1]} : vector<8x512xf32> to vector<8x128xf32>
    %133 = math.tanh %132 : vector<8x128xf32>
    %134 = vector.extract_strided_slice %119 {offsets = [0, 384], sizes = [8, 128], strides = [1, 1]} : vector<8x512xf32> to vector<8x128xf32>
    %135 = arith.negf %134 : vector<8x128xf32>
    %136 = math.exp %135 : vector<8x128xf32>
    %cst_53 = arith.constant 1.000000e+00 : f32
    %137 = vector.broadcast %cst_53 : f32 to vector<8x128xf32>
    %138 = arith.addf %137, %136 : vector<8x128xf32>
    %139 = arith.divf %137, %138 : vector<8x128xf32>
    %140 = arith.mulf %131, %110 : vector<8x128xf32>
    %141 = arith.mulf %125, %133 : vector<8x128xf32>
    %142 = arith.addf %140, %141 : vector<8x128xf32>
    %143 = math.tanh %142 : vector<8x128xf32>
    %144 = arith.mulf %139, %143 : vector<8x128xf32>
    %c3_54 = arith.constant 3 : index
    %c0_55 = arith.constant 0 : index
    %c0_56 = arith.constant 0 : index
    %145 = vector.load %arg11[%c3_54, %c0_55, %c0_56] : memref<8x8x128xf32, #tpu.memory_space<vmem>>, vector<1x8x128xf32>
    %146 = vector.shape_cast %145 : vector<1x8x128xf32> to vector<8x128xf32>
    %147 = vector.shape_cast %144 : vector<8x128xf32> to vector<1x8x128xf32>
    tpu.vector_store %arg11[%c3_54, %c0_55, %c0_56], %147 {strides = array<i32>} : memref<8x8x128xf32, #tpu.memory_space<vmem>>, vector<1x8x128xf32>,
    %c4_57 = arith.constant 4 : index
    %c0_58 = arith.constant 0 : index
    %c0_59 = arith.constant 0 : index
    %148 = vector.load %arg10[%c4_57, %c0_58, %c0_59] : memref<8x8x512xf32, #tpu.memory_space<vmem>>, vector<1x8x512xf32>
    %149 = vector.shape_cast %148 : vector<1x8x512xf32> to vector<8x512xf32>
    %cst_60 = arith.constant dense<0.000000e+00> : vector<8x512xf32>
    %150 = tpu.matmul %144, %15, %cst_60 {dimension_numbers = #tpu.dot_dimension_numbers<[1], [0], [0], [1], [0, 0, 1, 1], [], []>} : vector<8x128xf32>, vector<128x512xf32>, vector<8x512xf32> -> vector<8x512xf32>
    %151 = arith.addf %149, %150 : vector<8x512xf32>
    %152 = vector.extract_strided_slice %151 {offsets = [0, 0], sizes = [8, 128], strides = [1, 1]} : vector<8x512xf32> to vector<8x128xf32>
    %153 = arith.negf %152 : vector<8x128xf32>
    %154 = math.exp %153 : vector<8x128xf32>
    %cst_61 = arith.constant 1.000000e+00 : f32
    %155 = vector.broadcast %cst_61 : f32 to vector<8x128xf32>
    %156 = arith.addf %155, %154 : vector<8x128xf32>
    %157 = arith.divf %155, %156 : vector<8x128xf32>
    %158 = vector.extract_strided_slice %151 {offsets = [0, 128], sizes = [8, 128], strides = [1, 1]} : vector<8x512xf32> to vector<8x128xf32>
    %159 = arith.negf %158 : vector<8x128xf32>
    %160 = math.exp %159 : vector<8x128xf32>
    %cst_62 = arith.constant 1.000000e+00 : f32
    %161 = vector.broadcast %cst_62 : f32 to vector<8x128xf32>
    %162 = arith.addf %161, %160 : vector<8x128xf32>
    %163 = arith.divf %161, %162 : vector<8x128xf32>
    %164 = vector.extract_strided_slice %151 {offsets = [0, 256], sizes = [8, 128], strides = [1, 1]} : vector<8x512xf32> to vector<8x128xf32>
    %165 = math.tanh %164 : vector<8x128xf32>
    %166 = vector.extract_strided_slice %151 {offsets = [0, 384], sizes = [8, 128], strides = [1, 1]} : vector<8x512xf32> to vector<8x128xf32>
    %167 = arith.negf %166 : vector<8x128xf32>
    %168 = math.exp %167 : vector<8x128xf32>
    %cst_63 = arith.constant 1.000000e+00 : f32
    %169 = vector.broadcast %cst_63 : f32 to vector<8x128xf32>
    %170 = arith.addf %169, %168 : vector<8x128xf32>
    %171 = arith.divf %169, %170 : vector<8x128xf32>
    %172 = arith.mulf %163, %142 : vector<8x128xf32>
    %173 = arith.mulf %157, %165 : vector<8x128xf32>
    %174 = arith.addf %172, %173 : vector<8x128xf32>
    %175 = math.tanh %174 : vector<8x128xf32>
    %176 = arith.mulf %171, %175 : vector<8x128xf32>
    %c4_64 = arith.constant 4 : index
    %c0_65 = arith.constant 0 : index
    %c0_66 = arith.constant 0 : index
    %177 = vector.load %arg11[%c4_64, %c0_65, %c0_66] : memref<8x8x128xf32, #tpu.memory_space<vmem>>, vector<1x8x128xf32>
    %178 = vector.shape_cast %177 : vector<1x8x128xf32> to vector<8x128xf32>
    %179 = vector.shape_cast %176 : vector<8x128xf32> to vector<1x8x128xf32>
    tpu.vector_store %arg11[%c4_64, %c0_65, %c0_66], %179 {strides = array<i32>} : memref<8x8x128xf32, #tpu.memory_space<vmem>>, vector<1x8x128xf32>,
    %c5_67 = arith.constant 5 : index
    %c0_68 = arith.constant 0 : index
    %c0_69 = arith.constant 0 : index
    %180 = vector.load %arg10[%c5_67, %c0_68, %c0_69] : memref<8x8x512xf32, #tpu.memory_space<vmem>>, vector<1x8x512xf32>
    %181 = vector.shape_cast %180 : vector<1x8x512xf32> to vector<8x512xf32>
    %cst_70 = arith.constant dense<0.000000e+00> : vector<8x512xf32>
    %182 = tpu.matmul %176, %15, %cst_70 {dimension_numbers = #tpu.dot_dimension_numbers<[1], [0], [0], [1], [0, 0, 1, 1], [], []>} : vector<8x128xf32>, vector<128x512xf32>, vector<8x512xf32> -> vector<8x512xf32>
    %183 = arith.addf %181, %182 : vector<8x512xf32>
    %184 = vector.extract_strided_slice %183 {offsets = [0, 0], sizes = [8, 128], strides = [1, 1]} : vector<8x512xf32> to vector<8x128xf32>
    %185 = arith.negf %184 : vector<8x128xf32>
    %186 = math.exp %185 : vector<8x128xf32>
    %cst_71 = arith.constant 1.000000e+00 : f32
    %187 = vector.broadcast %cst_71 : f32 to vector<8x128xf32>
    %188 = arith.addf %187, %186 : vector<8x128xf32>
    %189 = arith.divf %187, %188 : vector<8x128xf32>
    %190 = vector.extract_strided_slice %183 {offsets = [0, 128], sizes = [8, 128], strides = [1, 1]} : vector<8x512xf32> to vector<8x128xf32>
    %191 = arith.negf %190 : vector<8x128xf32>
    %192 = math.exp %191 : vector<8x128xf32>
    %cst_72 = arith.constant 1.000000e+00 : f32
    %193 = vector.broadcast %cst_72 : f32 to vector<8x128xf32>
    %194 = arith.addf %193, %192 : vector<8x128xf32>
    %195 = arith.divf %193, %194 : vector<8x128xf32>
    %196 = vector.extract_strided_slice %183 {offsets = [0, 256], sizes = [8, 128], strides = [1, 1]} : vector<8x512xf32> to vector<8x128xf32>
    %197 = math.tanh %196 : vector<8x128xf32>
    %198 = vector.extract_strided_slice %183 {offsets = [0, 384], sizes = [8, 128], strides = [1, 1]} : vector<8x512xf32> to vector<8x128xf32>
    %199 = arith.negf %198 : vector<8x128xf32>
    %200 = math.exp %199 : vector<8x128xf32>
    %cst_73 = arith.constant 1.000000e+00 : f32
    %201 = vector.broadcast %cst_73 : f32 to vector<8x128xf32>
    %202 = arith.addf %201, %200 : vector<8x128xf32>
    %203 = arith.divf %201, %202 : vector<8x128xf32>
    %204 = arith.mulf %195, %174 : vector<8x128xf32>
    %205 = arith.mulf %189, %197 : vector<8x128xf32>
    %206 = arith.addf %204, %205 : vector<8x128xf32>
    %207 = math.tanh %206 : vector<8x128xf32>
    %208 = arith.mulf %203, %207 : vector<8x128xf32>
    %c5_74 = arith.constant 5 : index
    %c0_75 = arith.constant 0 : index
    %c0_76 = arith.constant 0 : index
    %209 = vector.load %arg11[%c5_74, %c0_75, %c0_76] : memref<8x8x128xf32, #tpu.memory_space<vmem>>, vector<1x8x128xf32>
    %210 = vector.shape_cast %209 : vector<1x8x128xf32> to vector<8x128xf32>
    %211 = vector.shape_cast %208 : vector<8x128xf32> to vector<1x8x128xf32>
    tpu.vector_store %arg11[%c5_74, %c0_75, %c0_76], %211 {strides = array<i32>} : memref<8x8x128xf32, #tpu.memory_space<vmem>>, vector<1x8x128xf32>,
    %c6_77 = arith.constant 6 : index
    %c0_78 = arith.constant 0 : index
    %c0_79 = arith.constant 0 : index
    %212 = vector.load %arg10[%c6_77, %c0_78, %c0_79] : memref<8x8x512xf32, #tpu.memory_space<vmem>>, vector<1x8x512xf32>
    %213 = vector.shape_cast %212 : vector<1x8x512xf32> to vector<8x512xf32>
    %cst_80 = arith.constant dense<0.000000e+00> : vector<8x512xf32>
    %214 = tpu.matmul %208, %15, %cst_80 {dimension_numbers = #tpu.dot_dimension_numbers<[1], [0], [0], [1], [0, 0, 1, 1], [], []>} : vector<8x128xf32>, vector<128x512xf32>, vector<8x512xf32> -> vector<8x512xf32>
    %215 = arith.addf %213, %214 : vector<8x512xf32>
    %216 = vector.extract_strided_slice %215 {offsets = [0, 0], sizes = [8, 128], strides = [1, 1]} : vector<8x512xf32> to vector<8x128xf32>
    %217 = arith.negf %216 : vector<8x128xf32>
    %218 = math.exp %217 : vector<8x128xf32>
    %cst_81 = arith.constant 1.000000e+00 : f32
    %219 = vector.broadcast %cst_81 : f32 to vector<8x128xf32>
    %220 = arith.addf %219, %218 : vector<8x128xf32>
    %221 = arith.divf %219, %220 : vector<8x128xf32>
    %222 = vector.extract_strided_slice %215 {offsets = [0, 128], sizes = [8, 128], strides = [1, 1]} : vector<8x512xf32> to vector<8x128xf32>
    %223 = arith.negf %222 : vector<8x128xf32>
    %224 = math.exp %223 : vector<8x128xf32>
    %cst_82 = arith.constant 1.000000e+00 : f32
    %225 = vector.broadcast %cst_82 : f32 to vector<8x128xf32>
    %226 = arith.addf %225, %224 : vector<8x128xf32>
    %227 = arith.divf %225, %226 : vector<8x128xf32>
    %228 = vector.extract_strided_slice %215 {offsets = [0, 256], sizes = [8, 128], strides = [1, 1]} : vector<8x512xf32> to vector<8x128xf32>
    %229 = math.tanh %228 : vector<8x128xf32>
    %230 = vector.extract_strided_slice %215 {offsets = [0, 384], sizes = [8, 128], strides = [1, 1]} : vector<8x512xf32> to vector<8x128xf32>
    %231 = arith.negf %230 : vector<8x128xf32>
    %232 = math.exp %231 : vector<8x128xf32>
    %cst_83 = arith.constant 1.000000e+00 : f32
    %233 = vector.broadcast %cst_83 : f32 to vector<8x128xf32>
    %234 = arith.addf %233, %232 : vector<8x128xf32>
    %235 = arith.divf %233, %234 : vector<8x128xf32>
    %236 = arith.mulf %227, %206 : vector<8x128xf32>
    %237 = arith.mulf %221, %229 : vector<8x128xf32>
    %238 = arith.addf %236, %237 : vector<8x128xf32>
    %239 = math.tanh %238 : vector<8x128xf32>
    %240 = arith.mulf %235, %239 : vector<8x128xf32>
    %c6_84 = arith.constant 6 : index
    %c0_85 = arith.constant 0 : index
    %c0_86 = arith.constant 0 : index
    %241 = vector.load %arg11[%c6_84, %c0_85, %c0_86] : memref<8x8x128xf32, #tpu.memory_space<vmem>>, vector<1x8x128xf32>
    %242 = vector.shape_cast %241 : vector<1x8x128xf32> to vector<8x128xf32>
    %243 = vector.shape_cast %240 : vector<8x128xf32> to vector<1x8x128xf32>
    tpu.vector_store %arg11[%c6_84, %c0_85, %c0_86], %243 {strides = array<i32>} : memref<8x8x128xf32, #tpu.memory_space<vmem>>, vector<1x8x128xf32>,
    %c7 = arith.constant 7 : index
    %c0_87 = arith.constant 0 : index
    %c0_88 = arith.constant 0 : index
    %244 = vector.load %arg10[%c7, %c0_87, %c0_88] : memref<8x8x512xf32, #tpu.memory_space<vmem>>, vector<1x8x512xf32>
    %245 = vector.shape_cast %244 : vector<1x8x512xf32> to vector<8x512xf32>
    %cst_89 = arith.constant dense<0.000000e+00> : vector<8x512xf32>
    %246 = tpu.matmul %240, %15, %cst_89 {dimension_numbers = #tpu.dot_dimension_numbers<[1], [0], [0], [1], [0, 0, 1, 1], [], []>} : vector<8x128xf32>, vector<128x512xf32>, vector<8x512xf32> -> vector<8x512xf32>
    %247 = arith.addf %245, %246 : vector<8x512xf32>
    %248 = vector.extract_strided_slice %247 {offsets = [0, 0], sizes = [8, 128], strides = [1, 1]} : vector<8x512xf32> to vector<8x128xf32>
    %249 = arith.negf %248 : vector<8x128xf32>
    %250 = math.exp %249 : vector<8x128xf32>
    %cst_90 = arith.constant 1.000000e+00 : f32
    %251 = vector.broadcast %cst_90 : f32 to vector<8x128xf32>
    %252 = arith.addf %251, %250 : vector<8x128xf32>
    %253 = arith.divf %251, %252 : vector<8x128xf32>
    %254 = vector.extract_strided_slice %247 {offsets = [0, 128], sizes = [8, 128], strides = [1, 1]} : vector<8x512xf32> to vector<8x128xf32>
    %255 = arith.negf %254 : vector<8x128xf32>
    %256 = math.exp %255 : vector<8x128xf32>
    %cst_91 = arith.constant 1.000000e+00 : f32
    %257 = vector.broadcast %cst_91 : f32 to vector<8x128xf32>
    %258 = arith.addf %257, %256 : vector<8x128xf32>
    %259 = arith.divf %257, %258 : vector<8x128xf32>
    %260 = vector.extract_strided_slice %247 {offsets = [0, 256], sizes = [8, 128], strides = [1, 1]} : vector<8x512xf32> to vector<8x128xf32>
    %261 = math.tanh %260 : vector<8x128xf32>
    %262 = vector.extract_strided_slice %247 {offsets = [0, 384], sizes = [8, 128], strides = [1, 1]} : vector<8x512xf32> to vector<8x128xf32>
    %263 = arith.negf %262 : vector<8x128xf32>
    %264 = math.exp %263 : vector<8x128xf32>
    %cst_92 = arith.constant 1.000000e+00 : f32
    %265 = vector.broadcast %cst_92 : f32 to vector<8x128xf32>
    %266 = arith.addf %265, %264 : vector<8x128xf32>
    %267 = arith.divf %265, %266 : vector<8x128xf32>
    %268 = arith.mulf %259, %238 : vector<8x128xf32>
    %269 = arith.mulf %253, %261 : vector<8x128xf32>
    %270 = arith.addf %268, %269 : vector<8x128xf32>
    %271 = math.tanh %270 : vector<8x128xf32>
    %272 = arith.mulf %267, %271 : vector<8x128xf32>
    %c7_93 = arith.constant 7 : index
    %c0_94 = arith.constant 0 : index
    %c0_95 = arith.constant 0 : index
    %273 = vector.load %arg11[%c7_93, %c0_94, %c0_95] : memref<8x8x128xf32, #tpu.memory_space<vmem>>, vector<1x8x128xf32>
    %274 = vector.shape_cast %273 : vector<1x8x128xf32> to vector<8x128xf32>
    %275 = vector.shape_cast %272 : vector<8x128xf32> to vector<1x8x128xf32>
    tpu.vector_store %arg11[%c7_93, %c0_94, %c0_95], %275 {strides = array<i32>} : memref<8x8x128xf32, #tpu.memory_space<vmem>>, vector<1x8x128xf32>,
    %c0_96 = arith.constant 0 : index
    %c0_97 = arith.constant 0 : index
    %c0_98 = arith.constant 0 : index
    %276 = vector.load %arg11[%c0_96, %c0_97, %c0_98] : memref<8x8x128xf32, #tpu.memory_space<vmem>>, vector<8x8x128xf32>
    %277 = vector.shape_cast %276 : vector<8x8x128xf32> to vector<64x128xf32>
    %c0_99 = arith.constant 0 : index
    %c0_100 = arith.constant 0 : index
    %278 = vector.load %arg5[%c0_99, %c0_100] : memref<128x128xf32, #tpu.memory_space<vmem>>, vector<128x128xf32>
    %cst_101 = arith.constant dense<0.000000e+00> : vector<64x128xf32>
    %279 = tpu.matmul %277, %278, %cst_101 {dimension_numbers = #tpu.dot_dimension_numbers<[1], [0], [0], [1], [0, 0, 1, 1], [], []>} : vector<64x128xf32>, vector<128x128xf32>, vector<64x128xf32> -> vector<64x128xf32>
    %280 = vector.broadcast %4 : vector<1x128xf32> to vector<64x128xf32>
    %281 = arith.addf %279, %280 : vector<64x128xf32>
    %282 = vector.shape_cast %281 : vector<64x128xf32> to vector<8x8x128xf32>
    %c0_102 = arith.constant 0 : index
    %c0_103 = arith.constant 0 : index
    %c0_104 = arith.constant 0 : index
    %283 = vector.load %arg11[%c0_102, %c0_103, %c0_104] : memref<8x8x128xf32, #tpu.memory_space<vmem>>, vector<8x8x128xf32>
    tpu.vector_store %arg11[%c0_102, %c0_103, %c0_104], %282 {strides = array<i32>} : memref<8x8x128xf32, #tpu.memory_space<vmem>>, vector<8x8x128xf32>,
    %c0_105 = arith.constant 0 : index
    %c0_106 = arith.constant 0 : index
    %284 = vector.load %arg4[%c0_105, %c0_106] : memref<128x128xf32, #tpu.memory_space<vmem>>, vector<128x128xf32>
    %c0_107 = arith.constant 0 : index
    %c0_108 = arith.constant 0 : index
    %285 = vector.load %arg7[%c0_107, %c0_108] : memref<2x128xf32, #tpu.memory_space<vmem>>, vector<1x128xf32>
    %cst_109 = arith.constant dense<0.000000e+00> : vector<8x128xf32>
    %286 = tpu.matmul %272, %284, %cst_109 {dimension_numbers = #tpu.dot_dimension_numbers<[1], [0], [0], [1], [0, 0, 1, 1], [], []>} : vector<8x128xf32>, vector<128x128xf32>, vector<8x128xf32> -> vector<8x128xf32>
    %287 = vector.broadcast %3 : vector<1x128xf32> to vector<8x128xf32>
    %288 = arith.addf %286, %287 : vector<8x128xf32>
    %c0_110 = arith.constant 0 : index
    %c0_111 = arith.constant 0 : index
    %c0_112 = arith.constant 0 : index
    %289 = vector.load %arg11[%c0_110, %c0_111, %c0_112] : memref<8x8x128xf32, #tpu.memory_space<vmem>>, vector<8x8x128xf32>
    %290 = vector.shape_cast %288 : vector<8x128xf32> to vector<1x8x128xf32>
    %291 = vector.broadcast %290 : vector<1x8x128xf32> to vector<8x8x128xf32>
    %292 = arith.addf %291, %289 : vector<8x8x128xf32>
    %293 = math.tanh %292 : vector<8x8x128xf32>
    %294 = vector.shape_cast %293 : vector<8x8x128xf32> to vector<64x128xf32>
    %cst_113 = arith.constant dense<0.000000e+00> : vector<64x1xf32>
    %295 = tpu.matmul %294, %285, %cst_113 {dimension_numbers = #tpu.dot_dimension_numbers<[1], [1], [0], [0], [0, 0, 1, 0], [], []>} : vector<64x128xf32>, vector<1x128xf32>, vector<64x1xf32> -> vector<64x1xf32>
    %296 = vector.shape_cast %295 : vector<64x1xf32> to vector<8x8x1xf32>
    %297 = math.tanh %296 : vector<8x8x1xf32>
    %cst_114 = arith.constant 1.000000e+01 : f32
    %298 = vector.broadcast %cst_114 : f32 to vector<8x8x1xf32>
    %299 = arith.mulf %298, %297 : vector<8x8x1xf32>
    %cst_115 = arith.constant dense<0xFF800000> : vector<8x1xf32>
    %300 = vector.multi_reduction <maximumf>, %299, %cst_115 [0] : vector<8x8x1xf32> to vector<8x1xf32>
    %301 = vector.shape_cast %300 : vector<8x1xf32> to vector<1x8x1xf32>
    %302 = vector.broadcast %301 : vector<1x8x1xf32> to vector<8x8x1xf32>
    %303 = arith.subf %299, %302 : vector<8x8x1xf32>
    %304 = math.exp %303 : vector<8x8x1xf32>
    %cst_116 = arith.constant dense<0.000000e+00> : vector<8x1xf32>
    %305 = vector.multi_reduction <add>, %304, %cst_116 [0] : vector<8x8x1xf32> to vector<8x1xf32>
    %306 = vector.shape_cast %305 : vector<8x1xf32> to vector<1x8x1xf32>
    %307 = tpu.reciprocal %306 : vector<1x8x1xf32> -> vector<1x8x1xf32>
    %308 = vector.broadcast %307 : vector<1x8x1xf32> to vector<8x8x1xf32>
    %309 = arith.mulf %304, %308 : vector<8x8x1xf32>
    %310 = vector.broadcast %309 : vector<8x8x1xf32> to vector<8x8x128xf32>
    %311 = arith.mulf %289, %310 : vector<8x8x128xf32>
    %cst_117 = arith.constant dense<0.000000e+00> : vector<8x128xf32>
    %312 = vector.multi_reduction <add>, %311, %cst_117 [0] : vector<8x8x128xf32> to vector<8x128xf32>
    %cst_118 = arith.constant dense<0.000000e+00> : vector<8x128xf32>
    %313 = tpu.matmul %312, %284, %cst_118 {dimension_numbers = #tpu.dot_dimension_numbers<[1], [0], [0], [1], [0, 0, 1, 1], [], []>} : vector<8x128xf32>, vector<128x128xf32>, vector<8x128xf32> -> vector<8x128xf32>
    %314 = vector.broadcast %3 : vector<1x128xf32> to vector<8x128xf32>
    %315 = arith.addf %313, %314 : vector<8x128xf32>
    %c0_119 = arith.constant 0 : index
    %c0_120 = arith.constant 0 : index
    %c0_121 = arith.constant 0 : index
    %316 = vector.load %arg11[%c0_119, %c0_120, %c0_121] : memref<8x8x128xf32, #tpu.memory_space<vmem>>, vector<8x8x128xf32>
    %317 = vector.shape_cast %315 : vector<8x128xf32> to vector<1x8x128xf32>
    %318 = vector.broadcast %317 : vector<1x8x128xf32> to vector<8x8x128xf32>
    %319 = arith.addf %318, %316 : vector<8x8x128xf32>
    %320 = math.tanh %319 : vector<8x8x128xf32>
    %321 = vector.shape_cast %320 : vector<8x8x128xf32> to vector<64x128xf32>
    %cst_122 = arith.constant dense<0.000000e+00> : vector<64x1xf32>
    %322 = tpu.matmul %321, %285, %cst_122 {dimension_numbers = #tpu.dot_dimension_numbers<[1], [1], [0], [0], [0, 0, 1, 0], [], []>} : vector<64x128xf32>, vector<1x128xf32>, vector<64x1xf32> -> vector<64x1xf32>
    %323 = vector.shape_cast %322 : vector<64x1xf32> to vector<8x8x1xf32>
    %324 = math.tanh %323 : vector<8x8x1xf32>
    %cst_123 = arith.constant 1.000000e+01 : f32
    %325 = vector.broadcast %cst_123 : f32 to vector<8x8x1xf32>
    %326 = arith.mulf %325, %324 : vector<8x8x1xf32>
    %cst_124 = arith.constant dense<0xFF800000> : vector<8x1xf32>
    %327 = vector.multi_reduction <maximumf>, %326, %cst_124 [0] : vector<8x8x1xf32> to vector<8x1xf32>
    %328 = vector.shape_cast %327 : vector<8x1xf32> to vector<1x8x1xf32>
    %329 = vector.broadcast %328 : vector<1x8x1xf32> to vector<8x8x1xf32>
    %330 = arith.subf %326, %329 : vector<8x8x1xf32>
    %331 = math.exp %330 : vector<8x8x1xf32>
    %cst_125 = arith.constant dense<0.000000e+00> : vector<8x1xf32>
    %332 = vector.multi_reduction <add>, %331, %cst_125 [0] : vector<8x8x1xf32> to vector<8x1xf32>
    %333 = vector.shape_cast %332 : vector<8x1xf32> to vector<1x8x1xf32>
    %334 = tpu.reciprocal %333 : vector<1x8x1xf32> -> vector<1x8x1xf32>
    %335 = vector.broadcast %334 : vector<1x8x1xf32> to vector<8x8x1xf32>
    %336 = arith.mulf %331, %335 : vector<8x8x1xf32>
    %337 = vector.broadcast %336 : vector<8x8x1xf32> to vector<8x8x128xf32>
    %338 = arith.mulf %316, %337 : vector<8x8x128xf32>
    %cst_126 = arith.constant dense<0.000000e+00> : vector<8x128xf32>
    %339 = vector.multi_reduction <add>, %338, %cst_126 [0] : vector<8x8x128xf32> to vector<8x128xf32>
    %cst_127 = arith.constant dense<0.000000e+00> : vector<8x128xf32>
    %340 = tpu.matmul %339, %284, %cst_127 {dimension_numbers = #tpu.dot_dimension_numbers<[1], [0], [0], [1], [0, 0, 1, 1], [], []>} : vector<8x128xf32>, vector<128x128xf32>, vector<8x128xf32> -> vector<8x128xf32>
    %341 = vector.broadcast %3 : vector<1x128xf32> to vector<8x128xf32>
    %342 = arith.addf %340, %341 : vector<8x128xf32>
    %c0_128 = arith.constant 0 : index
    %c0_129 = arith.constant 0 : index
    %c0_130 = arith.constant 0 : index
    %343 = vector.load %arg11[%c0_128, %c0_129, %c0_130] : memref<8x8x128xf32, #tpu.memory_space<vmem>>, vector<8x8x128xf32>
    %344 = vector.shape_cast %342 : vector<8x128xf32> to vector<1x8x128xf32>
    %345 = vector.broadcast %344 : vector<1x8x128xf32> to vector<8x8x128xf32>
    %346 = arith.addf %345, %343 : vector<8x8x128xf32>
    %347 = math.tanh %346 : vector<8x8x128xf32>
    %348 = vector.shape_cast %347 : vector<8x8x128xf32> to vector<64x128xf32>
    %cst_131 = arith.constant dense<0.000000e+00> : vector<64x1xf32>
    %349 = tpu.matmul %348, %285, %cst_131 {dimension_numbers = #tpu.dot_dimension_numbers<[1], [1], [0], [0], [0, 0, 1, 0], [], []>} : vector<64x128xf32>, vector<1x128xf32>, vector<64x1xf32> -> vector<64x1xf32>
    %350 = vector.shape_cast %349 : vector<64x1xf32> to vector<8x8x1xf32>
    %351 = math.tanh %350 : vector<8x8x1xf32>
    %cst_132 = arith.constant 1.000000e+01 : f32
    %352 = vector.broadcast %cst_132 : f32 to vector<8x8x1xf32>
    %353 = arith.mulf %352, %351 : vector<8x8x1xf32>
    %cst_133 = arith.constant dense<0xFF800000> : vector<8x1xf32>
    %354 = vector.multi_reduction <maximumf>, %353, %cst_133 [0] : vector<8x8x1xf32> to vector<8x1xf32>
    %355 = vector.shape_cast %354 : vector<8x1xf32> to vector<1x8x1xf32>
    %356 = vector.broadcast %355 : vector<1x8x1xf32> to vector<8x8x1xf32>
    %357 = arith.subf %353, %356 : vector<8x8x1xf32>
    %358 = math.exp %357 : vector<8x8x1xf32>
    %cst_134 = arith.constant dense<0.000000e+00> : vector<8x1xf32>
    %359 = vector.multi_reduction <add>, %358, %cst_134 [0] : vector<8x8x1xf32> to vector<8x1xf32>
    %360 = vector.shape_cast %359 : vector<8x1xf32> to vector<1x8x1xf32>
    %361 = tpu.reciprocal %360 : vector<1x8x1xf32> -> vector<1x8x1xf32>
    %362 = vector.broadcast %361 : vector<1x8x1xf32> to vector<8x8x1xf32>
    %363 = arith.mulf %358, %362 : vector<8x8x1xf32>
    %364 = vector.broadcast %363 : vector<8x8x1xf32> to vector<8x8x128xf32>
    %365 = arith.mulf %343, %364 : vector<8x8x128xf32>
    %cst_135 = arith.constant dense<0.000000e+00> : vector<8x128xf32>
    %366 = vector.multi_reduction <add>, %365, %cst_135 [0] : vector<8x8x128xf32> to vector<8x128xf32>
    %c0_136 = arith.constant 0 : index
    %c0_137 = arith.constant 0 : index
    %367 = vector.load %arg6[%c0_136, %c0_137] : memref<128x128xf32, #tpu.memory_space<vmem>>, vector<128x128xf32>
    %cst_138 = arith.constant dense<0.000000e+00> : vector<8x128xf32>
    %368 = tpu.matmul %366, %367, %cst_138 {dimension_numbers = #tpu.dot_dimension_numbers<[1], [0], [0], [1], [0, 0, 1, 1], [], []>} : vector<8x128xf32>, vector<128x128xf32>, vector<8x128xf32> -> vector<8x128xf32>
    %369 = vector.broadcast %5 : vector<1x128xf32> to vector<8x128xf32>
    %370 = arith.addf %368, %369 : vector<8x128xf32>
    %cst_139 = arith.constant 0.000000e+00 : f32
    %371 = vector.broadcast %cst_139 : f32 to vector<8x128xf32>
    %372 = arith.maximumf %370, %371 : vector<8x128xf32>
    %c1_140 = arith.constant 1 : index
    %c0_141 = arith.constant 0 : index
    %373 = vector.load %arg7[%c1_140, %c0_141] : memref<2x128xf32, #tpu.memory_space<vmem>>, vector<1x128xf32>
    %cst_142 = arith.constant dense<0.000000e+00> : vector<1x8xf32>
    %374 = tpu.matmul %373, %372, %cst_142 {dimension_numbers = #tpu.dot_dimension_numbers<[1], [1], [0], [0], [0, 0, 1, 0], [], []>} : vector<1x128xf32>, vector<8x128xf32>, vector<1x8xf32> -> vector<1x8xf32>
    %375 = vector.broadcast %6 : vector<1x1xf32> to vector<1x8xf32>
    %376 = arith.addf %374, %375 : vector<1x8xf32>
    %c0_143 = arith.constant 0 : index
    %c0_144 = arith.constant 0 : index
    %377 = vector.load %arg9[%c0_143, %c0_144] : memref<1x8xf32, #tpu.memory_space<vmem>>, vector<1x8xf32>
    tpu.vector_store %arg9[%c0_143, %c0_144], %376 {strides = array<i32>} : memref<1x8xf32, #tpu.memory_space<vmem>>, vector<1x8xf32>,
    return
  }
  func.func @transform_0(%arg0: i32) -> (i32, i32, i32) {
    %c0_i32 = arith.constant 0 : i32
    %c0_i32_0 = arith.constant 0 : i32
    %c0_i32_1 = arith.constant 0 : i32
    return %c0_i32, %arg0, %c0_i32_0 : i32, i32, i32
  }
  func.func @transform_1(%arg0: i32) -> (i32, i32) {
    %c0_i32 = arith.constant 0 : i32
    %c0_i32_0 = arith.constant 0 : i32
    %c0_i32_1 = arith.constant 0 : i32
    return %c0_i32, %c0_i32_0 : i32, i32
  }
  func.func @transform_2(%arg0: i32) -> (i32, i32) {
    %c0_i32 = arith.constant 0 : i32
    %c0_i32_0 = arith.constant 0 : i32
    %c0_i32_1 = arith.constant 0 : i32
    return %c0_i32, %c0_i32_0 : i32, i32
  }
  func.func @transform_3(%arg0: i32) -> (i32, i32) {
    %c0_i32 = arith.constant 0 : i32
    %c0_i32_0 = arith.constant 0 : i32
    %c0_i32_1 = arith.constant 0 : i32
    return %c0_i32, %c0_i32_0 : i32, i32
  }
  func.func @transform_4(%arg0: i32) -> (i32, i32) {
    %c0_i32 = arith.constant 0 : i32
    %c0_i32_0 = arith.constant 0 : i32
    %c0_i32_1 = arith.constant 0 : i32
    return %c0_i32, %c0_i32_0 : i32, i32
  }
  func.func @transform_5(%arg0: i32) -> (i32, i32) {
    %c0_i32 = arith.constant 0 : i32
    %c0_i32_0 = arith.constant 0 : i32
    %c0_i32_1 = arith.constant 0 : i32
    return %c0_i32, %c0_i32_0 : i32, i32
  }
  func.func @transform_6(%arg0: i32) -> (i32, i32) {
    %c0_i32 = arith.constant 0 : i32
    %c0_i32_0 = arith.constant 0 : i32
    %c0_i32_1 = arith.constant 0 : i32
    return %c0_i32, %c0_i32_0 : i32, i32
  }
  func.func @transform_7(%arg0: i32) -> (i32, i32) {
    %c0_i32 = arith.constant 0 : i32
    %c0_i32_0 = arith.constant 0 : i32
    %c0_i32_1 = arith.constant 0 : i32
    return %c0_i32, %c0_i32_0 : i32, i32
  }
  func.func @transform_8(%arg0: i32) -> (i32, i32) {
    %c0_i32 = arith.constant 0 : i32
    %c0_i32_0 = arith.constant 0 : i32
    return %c0_i32, %arg0 : i32, i32
  }
}

</mosaic_0001>

<bundles_post_ra>
// kernel: tpu_custom_call.1
= control target key start
LH: loop header
LB: loop body
LE: loop exit
PB: predicated region body
PF: predicated region fallthrough
CT: control target
= control target key end

     0   :  { %13 = vsyncpa [#allocation5], 0  ;;  %s5049_s0 = inlined_call_operand.hbm [shape: f32[8,8,32], index: 0, kind: input, shape index: {}]   ;;  %s5050_s1 = inlined_call_operand.hbm [shape: f32[32,512], index: 1, kind: input, shape index: {}]   ;;  %s5051_s2 = inlined_call_operand.hbm [shape: f32[128,512], index: 2, kind: input, shape index: {}]   ;;  %s5052_s3 = inlined_call_operand.hbm [shape: f32[128,128], index: 3, kind: input, shape index: {}]   ;;  %s5053_s4 = inlined_call_operand.hbm [shape: f32[128,128], index: 4, kind: input, shape index: {}]   ;;  %s5054_s5 = inlined_call_operand.hbm [shape: f32[128,128], index: 5, kind: input, shape index: {}]   ;;  %s5055_s6 = inlined_call_operand.vmem [shape: f32[2,128], index: 6, kind: input, shape index: {}]   ;;  %s5056_s7 = inlined_call_operand.hbm [shape: f32[8,512], index: 7, kind: input, shape index: {}]   ;;  %s5057_s8 = inlined_call_operand.hbm [shape: f32[1,8], index: 8, kind: output, shape index: {}]  }
   0x1   :  { %14 = vsyncpa [#allocation8], 0 }
   0x2   :  { %15 = vsyncpa [#allocation11], 0 }
   0x3   :  { %16 = vsyncpa [#allocation14], 0 }
   0x4   :  { %17 = vsyncpa [#allocation6], 0  ;;  %s3701_s27 = smov [#allocation7]  }
   0x5   :  { %s35_s28 = sshll.u32 %s3701_s27, 4  ;;  %s36_s28 = int_to_ptr.vmem [resolvable:$true] %s35_s28 }
   0x6   :  { %s3539_s29 = scalar_lea.vmem %s36_s28, 2048  ;;  %p3544_p1 = scmp.lt.s32.totalorder %s36_s28, %s36_s28 }
   0x7   :  { %p3540_p0 = scmp.ne.s32.totalorder %s36_s28, %s3539_s29  ;;  %p3545_p2 = scmp.lt.s32.totalorder %s3539_s29, %s3539_s29 }
   0x9   :  { %p3546_p3 = por %p3545_p2, %p3544_p1 }
   0xb   :  { %p3547_p4 = pnand %p3546_p3, %p3540_p0 }
   0xd   :  { %3550 = shalt.err (!%p3547_p4)
}
   0xe   :  { %s3702_s30 = smov 512   ;;  %s3703_s9 = smov 32  }
   0xf   :  { %41 = dma.hbm_to_vmem [thread:$0]  %s5050_s1, 2048, %s36_s28, [#allocation8], %s3702_s30, %s3702_s30, %s3703_s9  }
  0x10   :  { %s3704_s12 = smov [#allocation10]   ;;  %s3705_s14 = smov [#allocation13]  }
  0x11   :  { %s59_s13 = sshll.u32 %s3704_s12, 4  ;;  %s83_s15 = sshll.u32 %s3705_s14, 4  ;;  %s60_s13 = int_to_ptr.vmem [resolvable:$true] %s59_s13  ;;  %s84_s15 = int_to_ptr.vmem [resolvable:$true] %s83_s15 }
  0x12   :  { %s3559_s16 = scalar_lea.vmem %s60_s13, 2048  ;;  %p3564_p6 = scmp.lt.s32.totalorder %s60_s13, %s60_s13 }
  0x13   :  { %p3560_p5 = scmp.ne.s32.totalorder %s60_s13, %s3559_s16  ;;  %p3565_p7 = scmp.lt.s32.totalorder %s3559_s16, %s3559_s16 }
  0x15   :  { %p3566_p8 = por %p3565_p7, %p3564_p6 }
  0x17   :  { %p3567_p9 = pnand %p3566_p8, %p3560_p5 }
  0x19   :  { %3570 = shalt.err (!%p3567_p9)
}
  0x1a   :  { %s3706_s17 = smov 128   ;;  %s3707_s18 = smov 8  }
  0x1b   :  { %65 = dma.hbm_to_vmem [thread:$0]  %s5052_s3, 2048, %s60_s13, [#allocation11], %s3706_s17, %s3706_s17, %s3707_s18  }
  0x1c   :  { %s3579_s1 = scalar_lea.vmem %s84_s15, 2048  ;;  %p3584_p11 = scmp.lt.s32.totalorder %s84_s15, %s84_s15 }
  0x1d   :  { %p3580_p10 = scmp.ne.s32.totalorder %s84_s15, %s3579_s1  ;;  %p3585_p12 = scmp.lt.s32.totalorder %s3579_s1, %s3579_s1 }
  0x1f   :  { %p3586_p13 = por %p3585_p12, %p3584_p11 }
  0x21   :  { %p3587_p0 = pnand %p3586_p13, %p3580_p10 }
  0x23   :  { %3590 = shalt.err (!%p3587_p0)
}
  0x24   :  { %89 = dma.hbm_to_vmem [thread:$0]  %s5054_s5, 2048, %s84_s15, [#allocation14], %s3706_s17, %s3706_s17, %s3707_s18  }
  0x25   :  { %s3708_s23 = smov [#allocation4]   ;;  %s3709_s25 = smov [#allocation9]  }
  0x26   :  { %s23_s24 = sshll.u32 %s3708_s23, 4  ;;  %s47_s3 = sshll.u32 %s3709_s25, 4  ;;  %s24_s24 = int_to_ptr.vmem [resolvable:$true] %s23_s24  ;;  %s48_s3 = int_to_ptr.vmem [resolvable:$true] %s47_s3 }
  0x27   :  { %s3599_s26 = scalar_lea.vmem %s24_s24, 1024  ;;  %p3604_p2 = scmp.lt.s32.totalorder %s24_s24, %s24_s24 }
  0x28   :  { %p3600_p1 = scmp.ne.s32.totalorder %s24_s24, %s3599_s26  ;;  %p3605_p3 = scmp.lt.s32.totalorder %s3599_s26, %s3599_s26 }
  0x2a   :  { %p3606_p4 = por %p3605_p3, %p3604_p2 }
  0x2c   :  { %p3607_p5 = pnand %p3606_p4, %p3600_p1 }
  0x2e   :  { %3610 = shalt.err (!%p3607_p5)
}
  0x2f   :  { %29 = dma.hbm_to_vmem [thread:$0]  %s5049_s0, 1024, %s24_s24, [#allocation5], %s3706_s17, %s3706_s17, %s3707_s18  }
  0x30   :  { %s3619_s5 = scalar_lea.vmem %s48_s3, 8192  ;;  %p3624_p7 = scmp.lt.s32.totalorder %s48_s3, %s48_s3 }
  0x31   :  { %p3620_p6 = scmp.ne.s32.totalorder %s48_s3, %s3619_s5  ;;  %p3625_p8 = scmp.lt.s32.totalorder %s3619_s5, %s3619_s5 }
  0x33   :  { %p3626_p9 = por %p3625_p8, %p3624_p7 }
  0x35   :  { %p3627_p10 = pnand %p3626_p9, %p3620_p6 }
  0x37   :  { %3630 = shalt.err (!%p3627_p10)
}
  0x38   :  { %53 = dma.hbm_to_vmem [thread:$0]  %s5051_s2, 8192, %s48_s3, [#allocation8], %s3702_s30, %s3702_s30, %s3703_s9  }
  0x39   :  { %s3710_s11 = smov [#allocation12]   ;;  %s3711_s13 = smov [#allocation15]  }
  0x3a   :  { %s71_s12 = sshll.u32 %s3710_s11, 4  ;;  %s98_s0 = sshll.u32 %s3711_s13, 4  ;;  %s72_s12 = int_to_ptr.vmem [resolvable:$true] %s71_s12  ;;  %s99_s0 = int_to_ptr.vmem [resolvable:$true] %s98_s0 }
  0x3b   :  { %s3639_s14 = scalar_lea.vmem %s72_s12, 2048  ;;  %p3644_p12 = scmp.lt.s32.totalorder %s72_s12, %s72_s12 }
  0x3c   :  { %p3640_p11 = scmp.ne.s32.totalorder %s72_s12, %s3639_s14  ;;  %p3645_p13 = scmp.lt.s32.totalorder %s3639_s14, %s3639_s14 }
  0x3e   :  { %p3646_p0 = por %p3645_p13, %p3644_p12 }
  0x40   :  { %p3647_p1 = pnand %p3646_p0, %p3640_p11 }
  0x42   :  { %3650 = shalt.err (!%p3647_p1)
}
  0x43   :  { %77 = dma.hbm_to_vmem [thread:$0]  %s5053_s4, 2048, %s72_s12, [#allocation11], %s3706_s17, %s3706_s17, %s3707_s18  }
  0x44   :  { %s3659_s2 = scalar_lea.vmem %s99_s0, 512  ;;  %p3664_p3 = scmp.lt.s32.totalorder %s99_s0, %s99_s0 }
  0x45   :  { %p3660_p2 = scmp.ne.s32.totalorder %s99_s0, %s3659_s2  ;;  %p3665_p4 = scmp.lt.s32.totalorder %s3659_s2, %s3659_s2 }
  0x47   :  { %p3666_p5 = por %p3665_p4, %p3664_p3 }
  0x49   :  { %p3667_p6 = pnand %p3666_p5, %p3660_p2 }
  0x4b   :  { %3670 = shalt.err (!%p3667_p6)
}
  0x4c   :  { %101 = dma.hbm_to_vmem [thread:$0]  %s5056_s7, 512, %s99_s0, [#allocation14]  }
  0x4d   :  { %3691 = dma.done.wait [#allocation5], 1024  }
  0x4e   :  { %3692 = vsyncadd [#allocation5], 4294966272 }
  0x4f   :  { %3693 = dma.done.wait [#allocation8], 10240  }
  0x50   :  { %3694 = vsyncadd [#allocation8], 4294957056 }
  0x51   :  { %3695 = dma.done.wait [#allocation11], 4096  }
  0x52   :  { %3696 = vsyncadd [#allocation11], 4294963200 }
  0x53   :  { %3697 = dma.done.wait [#allocation14], 2560  }
  0x54   :  { %3698 = vsyncadd [#allocation14], 4294964736  ;;  %v5058_v0 = vmov 0.0   ;;  %v151_v1 = vld [vmem:[#allocation7 + $0x68] sm:$0xff]  ;;  %v153_v2 = vld [vmem:[#allocation7 + $0x78] sm:$0xff]  ;;  %vm175_vm0 = vcmask 261120  }
  0x55   :  { %264 = vmatprep.mubr.f32.mxu0 %v5058_v0  ;;  %377 = vmatprep.mubr.f32.mxu1 %v5058_v0  ;;  %v150_v3 = vld [vmem:[#allocation7 + $0x60] sm:$0xff]  ;;  %v152_v4 = vld [vmem:[#allocation7 + $0x70] sm:$0xff]  ;;  %v147_v5 = vld [vmem:[#allocation7 + $0x48] sm:$0xff]  ;;  %vm3713_vm1 = vmmov 0   ;;  %s3715_s19 = smov [#allocation16]   ;;  %vm2829_vm2 = vcmask 57344  }
  0x56   :  { %224 = vmatprep.subr.mxu0 %v151_v1  ;;  %337 = vmatprep.subr.mxu1 %v153_v2  ;;  %v149_v6 = vld [vmem:[#allocation7 + $0x58] sm:$0xff]  ;;  %v146_v7 = vld [vmem:[#allocation7 + $0x40] sm:$0xff]  ;;  %v148_v8 = vld [vmem:[#allocation7 + $0x50] sm:$0xff]  ;;  %s2837_s20 = sshll.u32 %s3715_s19, 4  ;;  %s2838_s20 = int_to_ptr.vmem [resolvable:$true] %s2837_s20 }
  0x57   :  { %225 = vmatpush1.msra.mxu0 %v150_v3  ;;  %338 = vmatpush1.msra.mxu1 %v152_v4  ;;  %v143_v9 = vld [vmem:[#allocation7 + $0x28] sm:$0xff]  ;;  %v145_v10 = vld [vmem:[#allocation7 + $0x38] sm:$0xff]  ;;  %v142_v11 = vld [vmem:[#allocation7 + $0x20] sm:$0xff]  ;;  %s3671_s1 = scalar_lea.vmem %s2838_s20, 16  ;;  %s3675_s21 = scalar_lea.vmem %s2838_s20, 32 }
  0x58   :  { %226 = vmatprep.subr.mxu0 %v147_v5  ;;  %339 = vmatprep.subr.mxu1 %v149_v6  ;;  %v144_v12 = vld [vmem:[#allocation7 + $0x30] sm:$0xff]  ;;  %v139_v13 = vld [vmem:[#allocation7 + $0x8] sm:$0xff]  ;;  %v141_v14 = vld [vmem:[#allocation7 + $0x18] sm:$0xff]  ;;  %p3672_p7 = scmp.ne.s32.totalorder %s2838_s20, %s3671_s1  ;;  %p3676_p8 = scmp.lt.s32.totalorder %s2838_s20, %s2838_s20 }
  0x59   :  { %227 = vmatpush1.msra.mxu0 %v146_v7  ;;  %340 = vmatpush1.msra.mxu1 %v148_v8  ;;  %v138_v15 = vld [vmem:[#allocation7] sm:$0xff]  ;;  %v140_v16 = vld [vmem:[#allocation7 + $0x10] sm:$0xff]  ;;  %v3802_v18 = vld [vmem:[#allocation9 + $0x1e8] sm:$0xff]  ;;  %p3677_p9 = scmp.lt.s32.totalorder %s3675_s21, %s3671_s1 }
  0x5a   :  { %228 = vmatprep.subr.mxu0 %v143_v9  ;;  %341 = vmatprep.subr.mxu1 %v145_v10  ;;  %v130_v17 = vld [vmem:[#allocation4] sm:$0xff]  ;;  %5151 = vst [vmem:[#allocation22_spill] sm:$0xff] %v3802_v18  ;;  %v3804_v19 = vld [vmem:[#allocation9 + $0x1f8] sm:$0xff]  ;;  %v3808_v21 = vld [vmem:[#allocation9 + $0x1f0] sm:$0xff] }
  0x5b   :  { %229 = vmatpush1.msra.mxu0 %v142_v11  ;;  %342 = vmatpush1.msra.mxu1 %v144_v12  ;;  %5152 = vst [vmem:[#allocation23_spill] sm:$0xff] %v3804_v19  ;;  %v3806_v20 = vld [vmem:[#allocation9 + $0x1e0] sm:$0xff]  ;;  %v3812_v22 = vld [vmem:[#allocation9 + $0x1c8] sm:$0xff]  ;;  %v3814_v23 = vld [vmem:[#allocation9 + $0x1d8] sm:$0xff]  ;;  %p3678_p10 = por %p3677_p9, %p3676_p8 }
  0x5c   :  { %230 = vmatprep.subr.mxu0 %v139_v13  ;;  %343 = vmatprep.subr.mxu1 %v141_v14  ;;  %v3820_v24 = vld [vmem:[#allocation9 + $0x1c0] sm:$0xff]  ;;  %v3822_v25 = vld [vmem:[#allocation9 + $0x1d0] sm:$0xff]  ;;  %v131_v26 = vld [vmem:[#allocation4 + $0x8] sm:$0xff] }
  0x5d   :  { %231 = vmatpush1.msra.mxu0 %v138_v15  ;;  %344 = vmatpush1.msra.mxu1 %v140_v16  ;;  %v3828_v27 = vld [vmem:[#allocation9 + $0x1a8] sm:$0xff]  ;;  %v3830_v28 = vld [vmem:[#allocation9 + $0x1b8] sm:$0xff]  ;;  %v3834_v29 = vld [vmem:[#allocation9 + $0x1a0] sm:$0xff]  ;;  %p3679_p11 = pnand %p3678_p10, %p3672_p7 }
  0x5e   :  { %2849 = vmatmul.mubr.msk.f32.vlgmr.msra.gmra.mxu0 %vm175_vm0, %v130_v17  ;;  %2857 = vmatmul.mubr.msk.f32.vlgmr.msra.gmra.mxu1 %vm175_vm0, %v130_v17  ;;  %v3836_v30 = vld [vmem:[#allocation9 + $0x1b0] sm:$0xff]  ;;  %v3840_v31 = vld [vmem:[#allocation9 + $0x188] sm:$0xff]  ;;  %v3842_v32 = vld [vmem:[#allocation9 + $0x198] sm:$0xff] }
  0x5f   :  { %526 = vmatprep.subr.mxu0 %v3802_v18  ;;  %597 = vmatprep.subr.mxu1 %v3804_v19  ;;  %v3848_v33 = vld [vmem:[#allocation9 + $0x180] sm:$0xff]  ;;  %v3850_v34 = vld [vmem:[#allocation9 + $0x190] sm:$0xff]  ;;  %v3856_v36 = vld [vmem:[#allocation9 + $0x168] sm:$0xff] }
  0x60   :  { %527 = vmatpush1.msra.mxu0 %v3806_v20  ;;  %598 = vmatpush1.msra.mxu1 %v3808_v21  ;;  %v132_v35 = vld [vmem:[#allocation4 + $0x10] sm:$0xff]  ;;  %v3858_v37 = vld [vmem:[#allocation9 + $0x178] sm:$0xff]  ;;  %v3862_v38 = vld [vmem:[#allocation9 + $0x160] sm:$0xff] }
  0x61   :  { %528 = vmatprep.subr.mxu0 %v3812_v22  ;;  %599 = vmatprep.subr.mxu1 %v3814_v23  ;;  %v3864_v39 = vld [vmem:[#allocation9 + $0x170] sm:$0xff]  ;;  %v3868_v40 = vld [vmem:[#allocation9 + $0x148] sm:$0xff]  ;;  %v3870_v41 = vld [vmem:[#allocation9 + $0x158] sm:$0xff] }
  0x62   :  { %270 = vmatprep.mubr.f32.mxu0 %v5058_v0  ;;  %383 = vmatprep.mubr.f32.mxu1 %v5058_v0  ;;  %v3876_v42 = vld [vmem:[#allocation9 + $0x140] sm:$0xff]  ;;  %v3878_v43 = vld [vmem:[#allocation9 + $0x150] sm:$0xff]  ;;  %v133_v44 = vld [vmem:[#allocation4 + $0x18] sm:$0xff] }
  0x63   :  { %529 = vmatpush1.msra.mxu0 %v3820_v24  ;;  %600 = vmatpush1.msra.mxu1 %v3822_v25  ;;  %v3884_v45 = vld [vmem:[#allocation9 + $0x128] sm:$0xff]  ;;  %v3886_v46 = vld [vmem:[#allocation9 + $0x138] sm:$0xff]  ;;  %v3890_v47 = vld [vmem:[#allocation9 + $0x120] sm:$0xff] }
  0x64   :  { %2850 = vmatmul.mubr.msk.f32.gmra.mxu0 %vm175_vm0, %v131_v26  ;;  %2858 = vmatmul.mubr.msk.f32.gmra.mxu1 %vm175_vm0, %v131_v26  ;;  %v3892_v48 = vld [vmem:[#allocation9 + $0x130] sm:$0xff]  ;;  %v3896_v49 = vld [vmem:[#allocation9 + $0x108] sm:$0xff]  ;;  %v3898_v50 = vld [vmem:[#allocation9 + $0x118] sm:$0xff] }
  0x65   :  { %530 = vmatprep.subr.mxu0 %v3828_v27  ;;  %601 = vmatprep.subr.mxu1 %v3830_v28  ;;  %v3904_v51 = vld [vmem:[#allocation9 + $0x100] sm:$0xff]  ;;  %v3906_v52 = vld [vmem:[#allocation9 + $0x110] sm:$0xff]  ;;  %v3912_v54 = vld [vmem:[#allocation9 + $0xe8] sm:$0xff] }
  0x66   :  { %531 = vmatpush1.msra.mxu0 %v3834_v29  ;;  %602 = vmatpush1.msra.mxu1 %v3836_v30  ;;  %v134_v53 = vld [vmem:[#allocation4 + $0x20] sm:$0xff]  ;;  %v3914_v55 = vld [vmem:[#allocation9 + $0xf8] sm:$0xff]  ;;  %v3920_v57 = vld [vmem:[#allocation9 + $0xf0] sm:$0xff] }
  0x67   :  { %532 = vmatprep.subr.mxu0 %v3840_v31  ;;  %603 = vmatprep.subr.mxu1 %v3842_v32  ;;  %v3918_v56 = vld [vmem:[#allocation9 + $0xe0] sm:$0xff]  ;;  %v3924_v58 = vld [vmem:[#allocation9 + $0xc8] sm:$0xff]  ;;  %v3926_v59 = vld [vmem:[#allocation9 + $0xd8] sm:$0xff] }
  0x68   :  { %276 = vmatprep.mubr.f32.mxu0 %v5058_v0  ;;  %389 = vmatprep.mubr.f32.mxu1 %v5058_v0  ;;  %v3932_v60 = vld [vmem:[#allocation9 + $0xc0] sm:$0xff]  ;;  %v3934_v61 = vld [vmem:[#allocation9 + $0xd0] sm:$0xff]  ;;  %v135_v62 = vld [vmem:[#allocation4 + $0x28] sm:$0xff] }
  0x69   :  { %533 = vmatpush1.msra.mxu0 %v3848_v33  ;;  %604 = vmatpush1.msra.mxu1 %v3850_v34  ;;  %v3940_v63 = vld [vmem:[#allocation9 + $0xa8] sm:$0xff]  ;;  %v3942_v1 = vld [vmem:[#allocation9 + $0xb8] sm:$0xff]  ;;  %v3946_v2 = vld [vmem:[#allocation9 + $0xa0] sm:$0xff] }
  0x6a   :  { %2851 = vmatmul.mubr.msk.f32.gmra.mxu0 %vm175_vm0, %v132_v35  ;;  %2859 = vmatmul.mubr.msk.f32.gmra.mxu1 %vm175_vm0, %v132_v35  ;;  %v3948_v3 = vld [vmem:[#allocation9 + $0xb0] sm:$0xff]  ;;  %v3952_v4 = vld [vmem:[#allocation9 + $0x88] sm:$0xff]  ;;  %v3954_v5 = vld [vmem:[#allocation9 + $0x98] sm:$0xff] }
  0x6b   :  { %534 = vmatprep.subr.mxu0 %v3856_v36  ;;  %605 = vmatprep.subr.mxu1 %v3858_v37  ;;  %5153 = vst [vmem:[#allocation24_spill] sm:$0xff] %v3952_v4  ;;  %5154 = vst [vmem:[#allocation25_spill] sm:$0xff] %v3954_v5  ;;  %v3960_v6 = vld [vmem:[#allocation9 + $0x80] sm:$0xff]  ;;  %v3962_v7 = vld [vmem:[#allocation9 + $0x90] sm:$0xff] }
  0x6c   :  { %535 = vmatpush1.msra.mxu0 %v3862_v38  ;;  %606 = vmatpush1.msra.mxu1 %v3864_v39  ;;  %5155 = vst [vmem:[#allocation26_spill] sm:$0xff] %v3960_v6  ;;  %5156 = vst [vmem:[#allocation27_spill] sm:$0xff] %v3962_v7  ;;  %v136_v8 = vld [vmem:[#allocation4 + $0x30] sm:$0xff]  ;;  %v3968_v9 = vld [vmem:[#allocation9 + $0x68] sm:$0xff] }
  0x6d   :  { %536 = vmatprep.subr.mxu0 %v3868_v40  ;;  %607 = vmatprep.subr.mxu1 %v3870_v41  ;;  %5157 = vst [vmem:[#allocation28_spill] sm:$0xff] %v3968_v9  ;;  %v3970_v10 = vld [vmem:[#allocation9 + $0x78] sm:$0xff]  ;;  %v3974_v11 = vld [vmem:[#allocation9 + $0x60] sm:$0xff]  ;;  %v3976_v12 = vld [vmem:[#allocation9 + $0x70] sm:$0xff] }
  0x6e   :  { %282 = vmatprep.mubr.f32.mxu0 %v5058_v0  ;;  %395 = vmatprep.mubr.f32.mxu1 %v5058_v0  ;;  %5158 = vst [vmem:[#allocation29_spill] sm:$0xff] %v3970_v10  ;;  %5159 = vst [vmem:[#allocation30_spill] sm:$0xff] %v3974_v11  ;;  %v3980_v13 = vld [vmem:[#allocation9 + $0x48] sm:$0xff]  ;;  %v3982_v14 = vld [vmem:[#allocation9 + $0x58] sm:$0xff] }
  0x6f   :  { %537 = vmatpush1.msra.mxu0 %v3876_v42  ;;  %608 = vmatpush1.msra.mxu1 %v3878_v43  ;;  %5160 = vst [vmem:[#allocation31_spill] sm:$0xff] %v3976_v12  ;;  %5161 = vst [vmem:[#allocation32_spill] sm:$0xff] %v3980_v13  ;;  %v3988_v15 = vld [vmem:[#allocation9 + $0x40] sm:$0xff]  ;;  %v3990_v16 = vld [vmem:[#allocation9 + $0x50] sm:$0xff] }
  0x70   :  { %2852 = vmatmul.mubr.msk.f32.gmra.mxu0 %vm175_vm0, %v133_v44  ;;  %2860 = vmatmul.mubr.msk.f32.gmra.mxu1 %vm175_vm0, %v133_v44  ;;  %5162 = vst [vmem:[#allocation33_spill] sm:$0xff] %v3982_v14  ;;  %5163 = vst [vmem:[#allocation34_spill] sm:$0xff] %v3988_v15  ;;  %v137_v17 = vld [vmem:[#allocation4 + $0x38] sm:$0xff]  ;;  %v3996_v26 = vld [vmem:[#allocation9 + $0x28] sm:$0xff] }
  0x71   :  { %538 = vmatprep.subr.mxu0 %v3884_v45  ;;  %609 = vmatprep.subr.mxu1 %v3886_v46  ;;  %5164 = vst [vmem:[#allocation35_spill] sm:$0xff] %v3990_v16  ;;  %5165 = vst [vmem:[#allocation36_spill] sm:$0xff] %v3996_v26  ;;  %v3998_v35 = vld [vmem:[#allocation9 + $0x38] sm:$0xff]  ;;  %v4002_v44 = vld [vmem:[#allocation9 + $0x20] sm:$0xff] }
  0x72   :  { %539 = vmatpush1.msra.mxu0 %v3890_v47  ;;  %610 = vmatpush1.msra.mxu1 %v3892_v48  ;;  %5166 = vst [vmem:[#allocation37_spill] sm:$0xff] %v3998_v35  ;;  %5167 = vst [vmem:[#allocation38_spill] sm:$0xff] %v4002_v44 }
  0x73   :  { %540 = vmatprep.subr.mxu0 %v3896_v49  ;;  %611 = vmatprep.subr.mxu1 %v3898_v50 }
  0x74   :  { %288 = vmatprep.mubr.f32.mxu0 %v5058_v0  ;;  %401 = vmatprep.mubr.f32.mxu1 %v5058_v0 }
  0x75   :  { %541 = vmatpush1.msra.mxu0 %v3904_v51  ;;  %612 = vmatpush1.msra.mxu1 %v3906_v52 }
  0x76   :  { %2853 = vmatmul.mubr.msk.f32.gmra.mxu0 %vm175_vm0, %v134_v53  ;;  %2861 = vmatmul.mubr.msk.f32.gmra.mxu1 %vm175_vm0, %v134_v53  ;;  %v4004_v53 = vld [vmem:[#allocation9 + $0x30] sm:$0xff] }
  0x77   :  { %542 = vmatprep.subr.mxu0 %v3912_v54  ;;  %613 = vmatprep.subr.mxu1 %v3914_v55  ;;  %5168 = vst [vmem:[#allocation39_spill] sm:$0xff] %v4004_v53 }
  0x78   :  { %543 = vmatpush1.msra.mxu0 %v3918_v56  ;;  %614 = vmatpush1.msra.mxu1 %v3920_v57 }
  0x79   :  { %544 = vmatprep.subr.mxu0 %v3924_v58  ;;  %615 = vmatprep.subr.mxu1 %v3926_v59 }
  0x7a   :  { %294 = vmatprep.mubr.f32.mxu0 %v5058_v0  ;;  %407 = vmatprep.mubr.f32.mxu1 %v5058_v0 }
  0x7b   :  { %545 = vmatpush1.msra.mxu0 %v3932_v60  ;;  %616 = vmatpush1.msra.mxu1 %v3934_v61 }
  0x7c   :  { %2854 = vmatmul.mubr.msk.f32.gmra.mxu0 %vm175_vm0, %v135_v62  ;;  %2862 = vmatmul.mubr.msk.f32.gmra.mxu1 %vm175_vm0, %v135_v62  ;;  %v4008_v62 = vld [vmem:[#allocation9 + $0x8] sm:$0xff] }
  0x7d   :  { %546 = vmatprep.subr.mxu0 %v3940_v63  ;;  %617 = vmatprep.subr.mxu1 %v3942_v1  ;;  %5169 = vst [vmem:[#allocation40_spill] sm:$0xff] %v4008_v62 }
  0x7e   :  { %547 = vmatpush1.msra.mxu0 %v3946_v2  ;;  %618 = vmatpush1.msra.mxu1 %v3948_v3 }
  0x7f   :  { %548 = vmatprep.subr.mxu0 %v3952_v4  ;;  %619 = vmatprep.subr.mxu1 %v3954_v5 }
  0x80   :  { %300 = vmatprep.mubr.f32.mxu0 %v5058_v0  ;;  %413 = vmatprep.mubr.f32.mxu1 %v5058_v0 }
  0x81   :  { %549 = vmatpush1.msra.mxu0 %v3960_v6  ;;  %620 = vmatpush1.msra.mxu1 %v3962_v7 }
  0x82   :  { %2855 = vmatmul.mubr.msk.f32.gmra.mxu0 %vm175_vm0, %v136_v8  ;;  %2863 = vmatmul.mubr.msk.f32.gmra.mxu1 %vm175_vm0, %v136_v8  ;;  %v4010_v8 = vld [vmem:[#allocation9 + $0x18] sm:$0xff] }
  0x83   :  { %550 = vmatprep.subr.mxu0 %v3968_v9  ;;  %621 = vmatprep.subr.mxu1 %v3970_v10  ;;  %5170 = vst [vmem:[#allocation41_spill] sm:$0xff] %v4010_v8 }
  0x84   :  { %551 = vmatpush1.msra.mxu0 %v3974_v11  ;;  %622 = vmatpush1.msra.mxu1 %v3976_v12 }
  0x85   :  { %552 = vmatprep.subr.mxu0 %v3980_v13  ;;  %623 = vmatprep.subr.mxu1 %v3982_v14 }
  0x86   :  { %306 = vmatprep.mubr.f32.mxu0 %v5058_v0  ;;  %419 = vmatprep.mubr.f32.mxu1 %v5058_v0  ;;  %v4014_v0 = vld [vmem:[#allocation9] sm:$0xff] }
  0x87   :  { %553 = vmatpush1.msra.mxu0 %v3988_v15  ;;  %624 = vmatpush1.msra.mxu1 %v3990_v16  ;;  %5171 = vst [vmem:[#allocation42_spill] sm:$0xff] %v4014_v0  ;;  %v4018_v16 = vld [vmem:[#allocation9 + $0x10] sm:$0xff]  ;;  %v5173_v15 = vmov 0.0  }
  0x88   :  { %2856 = vmatmul.mubr.msk.f32.gmra.mxu0 %vm175_vm0, %v137_v17  ;;  %2864 = vmatmul.mubr.msk.f32.gmra.mxu1 %vm175_vm0, %v137_v17  ;;  %5172 = vst [vmem:[#allocation43_spill] sm:$0xff] %v4018_v16  ;;  %v124_v17 = vld [vmem:[#allocation15 + $0x1] ss:$0 sm:$0xff] }
  0x89   :  { %554 = vmatprep.subr.mxu0 %v3996_v26  ;;  %625 = vmatprep.subr.mxu1 %v3998_v35 }
  0x8a   :  { %555 = vmatpush1.msra.mxu0 %v4002_v44  ;;  %626 = vmatpush1.msra.mxu1 %v4004_v53 }
  0x8b   :  { %556 = vmatprep.subr.mxu0 %v4008_v62  ;;  %627 = vmatprep.subr.mxu1 %v4010_v8 }
  0x8c   :  { %557 = vmatpush1.msra.mxu0 %v4014_v0  ;;  %590 = vmatprep.mubr.f32.mxu0 %v5173_v15 }
  0x8d   :  { %628 = vmatpush1.msra.mxu1 %v4018_v16  ;;  %661 = vmatprep.mubr.f32.mxu1 %v5173_v15 }
  0x8e   :  { %591 = vmatmul.mubr.f32.vlgmr.msra.gmra.mxu0 %v124_v17  ;;  %662 = vmatmul.mubr.f32.vlgmr.msra.gmra.mxu1 %v124_v17  ;;  %v5174_v17 = vld [vmem:[#allocation34_spill] sm:$0xff] }
  0x8f   :  { %702 = vmatprep.subr.mxu0 %v3802_v18  ;;  %773 = vmatprep.subr.mxu1 %v3804_v19 }
  0x90   :  { %703 = vmatpush1.msra.mxu0 %v3806_v20  ;;  %774 = vmatpush1.msra.mxu1 %v3808_v21 }
  0x91   :  { %704 = vmatprep.subr.mxu0 %v3812_v22  ;;  %775 = vmatprep.subr.mxu1 %v3814_v23 }
  0x92   :  { %705 = vmatpush1.msra.mxu0 %v3820_v24  ;;  %776 = vmatpush1.msra.mxu1 %v3822_v25 }
  0x93   :  { %706 = vmatprep.subr.mxu0 %v3828_v27  ;;  %777 = vmatprep.subr.mxu1 %v3830_v28 }
  0x94   :  { %707 = vmatpush1.msra.mxu0 %v3834_v29  ;;  %778 = vmatpush1.msra.mxu1 %v3836_v30 }
  0x95   :  { %708 = vmatprep.subr.mxu0 %v3840_v31  ;;  %779 = vmatprep.subr.mxu1 %v3842_v32 }
  0x96   :  { %709 = vmatpush1.msra.mxu0 %v3848_v33  ;;  %780 = vmatpush1.msra.mxu1 %v3850_v34 }
  0x97   :  { %710 = vmatprep.subr.mxu0 %v3856_v36  ;;  %781 = vmatprep.subr.mxu1 %v3858_v37 }
  0x98   :  { %711 = vmatpush1.msra.mxu0 %v3862_v38  ;;  %782 = vmatpush1.msra.mxu1 %v3864_v39 }
  0x99   :  { %712 = vmatprep.subr.mxu0 %v3868_v40  ;;  %783 = vmatprep.subr.mxu1 %v3870_v41 }
  0x9a   :  { %713 = vmatpush1.msra.mxu0 %v3876_v42  ;;  %784 = vmatpush1.msra.mxu1 %v3878_v43 }
  0x9b   :  { %714 = vmatprep.subr.mxu0 %v3884_v45  ;;  %785 = vmatprep.subr.mxu1 %v3886_v46 }
  0x9c   :  { %715 = vmatpush1.msra.mxu0 %v3890_v47  ;;  %786 = vmatpush1.msra.mxu1 %v3892_v48 }
  0x9d   :  { %716 = vmatprep.subr.mxu0 %v3896_v49  ;;  %787 = vmatprep.subr.mxu1 %v3898_v50 }
  0x9e   :  { %717 = vmatpush1.msra.mxu0 %v3904_v51  ;;  %788 = vmatpush1.msra.mxu1 %v3906_v52 }
  0x9f   :  { %718 = vmatprep.subr.mxu0 %v3912_v54  ;;  %789 = vmatprep.subr.mxu1 %v3914_v55 }
  0xa0   :  { %719 = vmatpush1.msra.mxu0 %v3918_v56  ;;  %790 = vmatpush1.msra.mxu1 %v3920_v57 }
  0xa1   :  { %720 = vmatprep.subr.mxu0 %v3924_v58  ;;  %791 = vmatprep.subr.mxu1 %v3926_v59 }
  0xa2   :  { %721 = vmatpush1.msra.mxu0 %v3932_v60  ;;  %792 = vmatpush1.msra.mxu1 %v3934_v61 }
  0xa3   :  { %722 = vmatprep.subr.mxu0 %v3940_v63  ;;  %793 = vmatprep.subr.mxu1 %v3942_v1 }
  0xa4   :  { %723 = vmatpush1.msra.mxu0 %v3946_v2  ;;  %794 = vmatpush1.msra.mxu1 %v3948_v3 }
  0xa5   :  { %724 = vmatprep.subr.mxu0 %v3952_v4  ;;  %795 = vmatprep.subr.mxu1 %v3954_v5  ;;  %v5175_v4 = vld [vmem:[#allocation35_spill] sm:$0xff] }
  0xa6   :  { %725 = vmatpush1.msra.mxu0 %v3960_v6  ;;  %796 = vmatpush1.msra.mxu1 %v3962_v7 }
  0xa7   :  { %726 = vmatprep.subr.mxu0 %v3968_v9  ;;  %797 = vmatprep.subr.mxu1 %v3970_v10 }
  0xa8   :  { %727 = vmatpush1.msra.mxu0 %v3974_v11  ;;  %798 = vmatpush1.msra.mxu1 %v3976_v12 }
  0xa9   :  { %728 = vmatprep.subr.mxu0 %v3980_v13  ;;  %799 = vmatprep.subr.mxu1 %v3982_v14 }
  0xaa   :  { %729 = vmatpush1.msra.mxu0 %v5174_v17  ;;  %800 = vmatpush1.msra.mxu1 %v5175_v4  ;;  %v123_v4 = vld [vmem:[#allocation15] ss:$8 sm:$0xf] }
  0xab   :  { %730 = vmatprep.subr.mxu0 %v3996_v26  ;;  %801 = vmatprep.subr.mxu1 %v3998_v35  ;;  %v155_v35 = vlaneseq }
  0xac   :  { %731 = vmatpush1.msra.mxu0 %v4002_v44  ;;  %802 = vmatpush1.msra.mxu1 %v4004_v53 }
  0xad   :  { %732 = vmatprep.subr.mxu0 %v4008_v62  ;;  %803 = vmatprep.subr.mxu1 %v4010_v8  ;;  %v156_v44 = vshrl.u32 %v155_v35, 7 }
  0xae   :  { %733 = vmatpush1.msra.mxu0 %v4014_v0  ;;  %766 = vmatprep.mubr.f32.mxu0 %v5173_v15 }
  0xaf   :  { %804 = vmatpush1.msra.mxu1 %v4018_v16  ;;  %837 = vmatprep.mubr.f32.mxu1 %v5173_v15  ;;  %v157_v62 = vsub.s32 0, %v156_v44  ;;  %v165_v8 = vsub.s32 2, %v156_v44  ;;  %v161_v16 = vsub.s32 1, %v156_v44  ;;  %v169_v14 = vsub.s32 3, %v156_v44 }
  0xb0   :  { %879 = vmatprep.subr.mxu0 %v3802_v18  ;;  %950 = vmatprep.subr.mxu1 %v3804_v19 }
  0xb1   :  { %v158_v15 = vrot.slane %v123_v4, %v157_v62  ;;  %v4102_v13 = vrot.slane %v123_v4, %v165_v8  ;;  %v162_v12 = vrot.slane %v123_v4, %v161_v16  ;;  %v4104_v35 = vrot.slane %v123_v4, %v169_v14 }
 0x11e   :  { %v4094_v26 = vpop.f32.mrf.mxu0  ;;  %v4096_v53 = vpop.f32.mrf.mxu1 }
 0x120   :  { %v4098_v0 = vpop.f32.mrf.mxu0  ;;  %v4100_v17 = vpop.f32.mrf.mxu1 }
 0x124   :  { %v272_v18 = vpop.f32.mrf.mxu0  ;;  %v385_v19 = vpop.f32.mrf.mxu1 }
 0x125   :  { %v4106_v11 = vadd.f32 %v272_v18, %v158_v15  ;;  %v4109_v10 = vadd.f32 %v385_v19, %v4102_v13 }
 0x126   :  { %v274_v9 = vpop.f32.mrf.mxu0  ;;  %v387_v7 = vpop.f32.mrf.mxu1 }
 0x127   :  { %5176 = vst [vmem:[#allocation44_spill] sm:$0xff] %v4106_v11  ;;  %5177 = vst [vmem:[#allocation45_spill] sm:$0xff] %v4109_v10  ;;  %v4111_v6 = vadd.f32 %v274_v9, %v162_v12  ;;  %v4114_v5 = vadd.f32 %v387_v7, %v4104_v35 }
 0x129   :  { %5178 = vst [vmem:[#allocation46_spill] sm:$0xff] %v4111_v6  ;;  %5179 = vst [vmem:[#allocation47_spill] sm:$0xff] %v4114_v5 }
 0x12a   :  { %v278_v44 = vpop.f32.mrf.mxu0  ;;  %v391_v62 = vpop.f32.mrf.mxu1 }
 0x12b   :  { %v4116_v8 = vadd.f32 %v278_v44, %v158_v15  ;;  %v4119_v16 = vadd.f32 %v391_v62, %v4102_v13 }
 0x12c   :  { %v280_v4 = vpop.f32.mrf.mxu0  ;;  %v393_v18 = vpop.f32.mrf.mxu1 }
 0x12d   :  { %5180 = vst [vmem:[#allocation48_spill] sm:$0xff] %v4116_v8  ;;  %5181 = vst [vmem:[#allocation49_spill] sm:$0xff] %v4119_v16  ;;  %v4121_v14 = vadd.f32 %v280_v4, %v162_v12  ;;  %v4124_v19 = vadd.f32 %v393_v18, %v4104_v35 }
 0x12f   :  { %5182 = vst [vmem:[#allocation50_spill] sm:$0xff] %v4121_v14  ;;  %5183 = vst [vmem:[#allocation51_spill] sm:$0xff] %v4124_v19 }
 0x130   :  { %v284_v10 = vpop.f32.mrf.mxu0  ;;  %v397_v9 = vpop.f32.mrf.mxu1 }
 0x131   :  { %v4126_v6 = vadd.f32 %v284_v10, %v158_v15  ;;  %v4129_v7 = vadd.f32 %v397_v9, %v4102_v13 }
 0x132   :  { %v286_v5 = vpop.f32.mrf.mxu0  ;;  %v399_v44 = vpop.f32.mrf.mxu1 }
 0x133   :  { %5184 = vst [vmem:[#allocation52_spill] sm:$0xff] %v4126_v6  ;;  %5185 = vst [vmem:[#allocation53_spill] sm:$0xff] %v4129_v7  ;;  %v4131_v8 = vadd.f32 %v286_v5, %v162_v12  ;;  %v4134_v62 = vadd.f32 %v399_v44, %v4104_v35 }
 0x135   :  { %5186 = vst [vmem:[#allocation54_spill] sm:$0xff] %v4131_v8  ;;  %5187 = vst [vmem:[#allocation55_spill] sm:$0xff] %v4134_v62 }
 0x136   :  { %v290_v16 = vpop.f32.mrf.mxu0  ;;  %v403_v4 = vpop.f32.mrf.mxu1 }
 0x137   :  { %v4136_v14 = vadd.f32 %v290_v16, %v158_v15  ;;  %v4139_v18 = vadd.f32 %v403_v4, %v4102_v13 }
 0x138   :  { %v292_v19 = vpop.f32.mrf.mxu0  ;;  %v405_v10 = vpop.f32.mrf.mxu1 }
 0x139   :  { %5188 = vst [vmem:[#allocation56_spill] sm:$0xff] %v4136_v14  ;;  %5189 = vst [vmem:[#allocation57_spill] sm:$0xff] %v4139_v18  ;;  %v4141_v6 = vadd.f32 %v292_v19, %v162_v12  ;;  %v4144_v9 = vadd.f32 %v405_v10, %v4104_v35 }
 0x13b   :  { %5190 = vst [vmem:[#allocation58_spill] sm:$0xff] %v4141_v6  ;;  %5191 = vst [vmem:[#allocation59_spill] sm:$0xff] %v4144_v9 }
 0x13c   :  { %v296_v7 = vpop.f32.mrf.mxu0  ;;  %v409_v5 = vpop.f32.mrf.mxu1 }
 0x13d   :  { %v4146_v8 = vadd.f32 %v296_v7, %v158_v15  ;;  %v4149_v44 = vadd.f32 %v409_v5, %v4102_v13 }
 0x13e   :  { %v298_v62 = vpop.f32.mrf.mxu0  ;;  %v411_v16 = vpop.f32.mrf.mxu1 }
 0x13f   :  { %5192 = vst [vmem:[#allocation60_spill] sm:$0xff] %v4146_v8  ;;  %5193 = vst [vmem:[#allocation61_spill] sm:$0xff] %v4149_v44  ;;  %v4151_v14 = vadd.f32 %v298_v62, %v162_v12  ;;  %v4154_v4 = vadd.f32 %v411_v16, %v4104_v35 }
 0x141   :  { %5194 = vst [vmem:[#allocation62_spill] sm:$0xff] %v4151_v14  ;;  %5195 = vst [vmem:[#allocation63_spill] sm:$0xff] %v4154_v4 }
 0x142   :  { %v302_v18 = vpop.f32.mrf.mxu0  ;;  %v415_v19 = vpop.f32.mrf.mxu1 }
 0x143   :  { %v4156_v6 = vadd.f32 %v302_v18, %v158_v15  ;;  %v4159_v10 = vadd.f32 %v415_v19, %v4102_v13 }
 0x144   :  { %v304_v9 = vpop.f32.mrf.mxu0  ;;  %v417_v7 = vpop.f32.mrf.mxu1 }
 0x145   :  { %5196 = vst [vmem:[#allocation64_spill] sm:$0xff] %v4156_v6  ;;  %5197 = vst [vmem:[#allocation65_spill] sm:$0xff] %v4159_v10  ;;  %v4161_v8 = vadd.f32 %v304_v9, %v162_v12  ;;  %v4164_v5 = vadd.f32 %v417_v7, %v4104_v35  ;;  %v267_v9 = vadd.f32 %v4094_v26, %v158_v15 }
 0x146   :  { %v269_v7 = vadd.f32 %v4098_v0, %v162_v12 }
 0x147   :  { %5198 = vst [vmem:[#allocation66_spill] sm:$0xff] %v4161_v8  ;;  %5199 = vst [vmem:[#allocation67_spill] sm:$0xff] %v4164_v5 }
 0x148   :  { %v308_v44 = vpop.f32.mrf.mxu0  ;;  %v421_v62 = vpop.f32.mrf.mxu1 }
 0x149   :  { %v4166_v14 = vadd.f32 %v308_v44, %v158_v15  ;;  %v4169_v16 = vadd.f32 %v421_v62, %v4102_v13 }
 0x14a   :  { %v310_v4 = vpop.f32.mrf.mxu0  ;;  %v423_v18 = vpop.f32.mrf.mxu1 }
 0x14b   :  { %5200 = vst [vmem:[#allocation68_spill] sm:$0xff] %v4166_v14  ;;  %5201 = vst [vmem:[#allocation69_spill] sm:$0xff] %v4169_v16  ;;  %v4171_v6 = vadd.f32 %v310_v4, %v162_v12  ;;  %v4174_v19 = vadd.f32 %v423_v18, %v4104_v35  ;;  %v382_v4 = vadd.f32 %v4100_v17, %v4104_v35 }
 0x14c   :  { %v380_v18 = vadd.f32 %v4096_v53, %v4102_v13 }
 0x14d   :  { %5202 = vst [vmem:[#allocation70_spill] sm:$0xff] %v4171_v6  ;;  %5203 = vst [vmem:[#allocation71_spill] sm:$0xff] %v4174_v19 }
 0x14e   :  { %v592_v10 = vpop.f32.mrf.mxu0  ;;  %v663_v14 = vpop.f32.mrf.mxu1 }
 0x14f   :  { %v668_v5 = vadd.f32 %v592_v10, %v267_v9  ;;  %v670_v19 = vadd.f32 %v663_v14, %v380_v18  ;;  %v5205_v14 = vld [vmem:[#allocation24_spill] sm:$0xff] }
 0x150   :  { %v594_v8 = vpop.f32.mrf.mxu0  ;;  %v665_v16 = vpop.f32.mrf.mxu1  ;;  %v5209_v18 = vld [vmem:[#allocation28_spill] sm:$0xff] }
 0x151   :  { %v2865_v11 = vmul.f32 -1.442695, %v668_v5  ;;  %v669_v44 = vadd.f32 %v594_v8, %v269_v7  ;;  %v671_v6 = vadd.f32 %v665_v16, %v382_v4  ;;  %v125_v5 = vld [vmem:[#allocation15 + $0x2] ss:$0 sm:$0xff]  ;;  %v5208_v4 = vld [vmem:[#allocation27_spill] sm:$0xff] }
 0x153   :  { %3189 = vpow2.f32 %v2865_v11  ;;  %v2866_v62 = vmul.f32 -1.442695, %v669_v44  ;;  %v2867_v15 = vmul.f32 -1.442695, %v671_v6 }
 0x155   :  { %3191 = vpow2.f32 %v2866_v62  ;;  %v5207_v62 = vld [vmem:[#allocation26_spill] sm:$0xff] }
 0x156   :  { %3193 = vpow2.f32 %v2867_v15  ;;  %v5210_v15 = vld [vmem:[#allocation29_spill] sm:$0xff] }
 0x160   :  { %v3190_v26 = vpop.eup %3189 }
 0x161   :  { %v675_v0 = vadd.f32 1.0, %v3190_v26  ;;  %v5211_v26 = vld [vmem:[#allocation30_spill] sm:$0xff] }
 0x162   :  { %v3192_v12 = vpop.eup %3191 }
 0x163   :  { %3195 = vrcp.f32 %v675_v0  ;;  %v681_v8 = vadd.f32 1.0, %v3192_v12  ;;  %v3194_v11 = vpop.eup %3193  ;;  %v5212_v0 = vld [vmem:[#allocation31_spill] sm:$0xff]  ;;  %v5213_v12 = vld [vmem:[#allocation32_spill] sm:$0xff] }
 0x164   :  { %3197 = vtanh.f32 %v670_v19  ;;  %v688_v17 = vadd.f32 1.0, %v3194_v11  ;;  %v5206_v19 = vld [vmem:[#allocation25_spill] sm:$0xff]  ;;  %v5215_v11 = vld [vmem:[#allocation34_spill] sm:$0xff] }
 0x165   :  { %3199 = vrcp.f32 %v681_v8  ;;  %v5214_v8 = vld [vmem:[#allocation33_spill] sm:$0xff] }
 0x166   :  { %3201 = vrcp.f32 %v688_v17  ;;  %v5220_v17 = vld [vmem:[#allocation39_spill] sm:$0xff] }
 0x170   :  { %v3196_v10 = vpop.eup %3195 }
 0x171   :  { %v3198_v9 = vpop.eup %3197 }
 0x172   :  { %v3200_v7 = vpop.eup %3199  ;;  %v692_v35 = vmul.f32 %v3198_v9, %v3196_v10  ;;  %v5216_v10 = vld [vmem:[#allocation35_spill] sm:$0xff]  ;;  %v5218_v9 = vld [vmem:[#allocation37_spill] sm:$0xff] }
 0x173   :  { %v691_v16 = vmul.f32 %v3200_v7, %v125_v5  ;;  %v3202_v6 = vpop.eup %3201  ;;  %v5217_v5 = vld [vmem:[#allocation36_spill] sm:$0xff]  ;;  %v5219_v7 = vld [vmem:[#allocation38_spill] sm:$0xff] }
 0x175   :  { %v4182_v44 = vadd.f32 %v692_v35, %v691_v16  ;;  %v5221_v35 = vld [vmem:[#allocation40_spill] sm:$0xff]  ;;  %v5222_v16 = vld [vmem:[#allocation41_spill] sm:$0xff] }
 0x177   :  { %3203 = vtanh.f32 %v4182_v44 }
 0x184   :  { %v3204_v13 = vpop.eup %3203 }
 0x185   :  { %v4185_v53 = vmul.f32 %v3204_v13, %v3202_v6  ;;  %v5223_v6 = vld [vmem:[#allocation42_spill] sm:$0xff]  ;;  %v5224_v13 = vmov 0.0  }
 0x187   :  { %5204 = vst [vmem:[#allocation72_spill] sm:$0xff] %v4185_v53  ;;  %767 = vmatmul.mubr.f32.vlgmr.msra.gmra.mxu0 %v4185_v53  ;;  %838 = vmatmul.mubr.f32.vlgmr.msra.gmra.mxu1 %v4185_v53  ;;  %v5225_v53 = vld [vmem:[#allocation43_spill] sm:$0xff] }
 0x188   :  { %880 = vmatpush1.msra.mxu0 %v3806_v20  ;;  %951 = vmatpush1.msra.mxu1 %v3808_v21 }
 0x189   :  { %881 = vmatprep.subr.mxu0 %v3812_v22  ;;  %952 = vmatprep.subr.mxu1 %v3814_v23 }
 0x18a   :  { %882 = vmatpush1.msra.mxu0 %v3820_v24  ;;  %953 = vmatpush1.msra.mxu1 %v3822_v25 }
 0x18b   :  { %883 = vmatprep.subr.mxu0 %v3828_v27  ;;  %954 = vmatprep.subr.mxu1 %v3830_v28 }
 0x18c   :  { %884 = vmatpush1.msra.mxu0 %v3834_v29  ;;  %955 = vmatpush1.msra.mxu1 %v3836_v30 }
 0x18d   :  { %885 = vmatprep.subr.mxu0 %v3840_v31  ;;  %956 = vmatprep.subr.mxu1 %v3842_v32 }
 0x18e   :  { %886 = vmatpush1.msra.mxu0 %v3848_v33  ;;  %957 = vmatpush1.msra.mxu1 %v3850_v34 }
 0x18f   :  { %887 = vmatprep.subr.mxu0 %v3856_v36  ;;  %958 = vmatprep.subr.mxu1 %v3858_v37 }
 0x190   :  { %888 = vmatpush1.msra.mxu0 %v3862_v38  ;;  %959 = vmatpush1.msra.mxu1 %v3864_v39 }
 0x191   :  { %889 = vmatprep.subr.mxu0 %v3868_v40  ;;  %960 = vmatprep.subr.mxu1 %v3870_v41 }
 0x192   :  { %890 = vmatpush1.msra.mxu0 %v3876_v42  ;;  %961 = vmatpush1.msra.mxu1 %v3878_v43 }
 0x193   :  { %891 = vmatprep.subr.mxu0 %v3884_v45  ;;  %962 = vmatprep.subr.mxu1 %v3886_v46 }
 0x194   :  { %892 = vmatpush1.msra.mxu0 %v3890_v47  ;;  %963 = vmatpush1.msra.mxu1 %v3892_v48 }
 0x195   :  { %893 = vmatprep.subr.mxu0 %v3896_v49  ;;  %964 = vmatprep.subr.mxu1 %v3898_v50 }
 0x196   :  { %894 = vmatpush1.msra.mxu0 %v3904_v51  ;;  %965 = vmatpush1.msra.mxu1 %v3906_v52 }
 0x197   :  { %895 = vmatprep.subr.mxu0 %v3912_v54  ;;  %966 = vmatprep.subr.mxu1 %v3914_v55 }
 0x198   :  { %896 = vmatpush1.msra.mxu0 %v3918_v56  ;;  %967 = vmatpush1.msra.mxu1 %v3920_v57 }
 0x199   :  { %897 = vmatprep.subr.mxu0 %v3924_v58  ;;  %968 = vmatprep.subr.mxu1 %v3926_v59 }
 0x19a   :  { %898 = vmatpush1.msra.mxu0 %v3932_v60  ;;  %969 = vmatpush1.msra.mxu1 %v3934_v61 }
 0x19b   :  { %899 = vmatprep.subr.mxu0 %v3940_v63  ;;  %970 = vmatprep.subr.mxu1 %v3942_v1 }
 0x19c   :  { %900 = vmatpush1.msra.mxu0 %v3946_v2  ;;  %971 = vmatpush1.msra.mxu1 %v3948_v3 }
 0x19d   :  { %901 = vmatprep.subr.mxu0 %v5205_v14  ;;  %972 = vmatprep.subr.mxu1 %v5206_v19 }
 0x19e   :  { %902 = vmatpush1.msra.mxu0 %v5207_v62  ;;  %973 = vmatpush1.msra.mxu1 %v5208_v4 }
 0x19f   :  { %903 = vmatprep.subr.mxu0 %v5209_v18  ;;  %974 = vmatprep.subr.mxu1 %v5210_v15  ;;  %v5231_v15 = vld [vmem:[#allocation45_spill] sm:$0xff] }
 0x1a0   :  { %904 = vmatpush1.msra.mxu0 %v5211_v26  ;;  %975 = vmatpush1.msra.mxu1 %v5212_v0  ;;  %v5230_v26 = vld [vmem:[#allocation47_spill] sm:$0xff] }
 0x1a1   :  { %905 = vmatprep.subr.mxu0 %v5213_v12  ;;  %976 = vmatprep.subr.mxu1 %v5214_v8 }
 0x1a2   :  { %906 = vmatpush1.msra.mxu0 %v5215_v11  ;;  %977 = vmatpush1.msra.mxu1 %v5216_v10  ;;  %v5226_v10 = vld [vmem:[#allocation22_spill] sm:$0xff] }
 0x1a3   :  { %907 = vmatprep.subr.mxu0 %v5217_v5  ;;  %978 = vmatprep.subr.mxu1 %v5218_v9  ;;  %v5227_v5 = vld [vmem:[#allocation23_spill] sm:$0xff] }
 0x1a4   :  { %908 = vmatpush1.msra.mxu0 %v5219_v7  ;;  %979 = vmatpush1.msra.mxu1 %v5220_v17  ;;  %v5228_v7 = vld [vmem:[#allocation44_spill] sm:$0xff] }
 0x1a5   :  { %909 = vmatprep.subr.mxu0 %v5221_v35  ;;  %980 = vmatprep.subr.mxu1 %v5222_v16  ;;  %v5229_v35 = vld [vmem:[#allocation46_spill] sm:$0xff] }
 0x1a6   :  { %910 = vmatpush1.msra.mxu0 %v5223_v6  ;;  %943 = vmatprep.mubr.f32.mxu0 %v5224_v13 }
 0x1a7   :  { %981 = vmatpush1.msra.mxu1 %v5225_v53  ;;  %1014 = vmatprep.mubr.f32.mxu1 %v5224_v13 }
 0x1a8   :  { %1056 = vmatprep.subr.mxu0 %v5226_v10  ;;  %1127 = vmatprep.subr.mxu1 %v5227_v5 }
 0x247   :  { %v768_v9 = vpop.f32.mrf.mxu0  ;;  %v839_v16 = vpop.f32.mrf.mxu1 }
 0x248   :  { %v844_v11 = vadd.f32 %v768_v9, %v5228_v7  ;;  %v846_v13 = vadd.f32 %v839_v16, %v5231_v15 }
 0x249   :  { %v770_v17 = vpop.f32.mrf.mxu0  ;;  %v841_v0 = vpop.f32.mrf.mxu1 }
 0x24a   :  { %v2868_v8 = vmul.f32 -1.442695, %v844_v11  ;;  %v845_v12 = vadd.f32 %v770_v17, %v5229_v35  ;;  %v847_v53 = vadd.f32 %v841_v0, %v5230_v26 }
 0x24c   :  { %3205 = vpow2.f32 %v2868_v8  ;;  %v2869_v6 = vmul.f32 -1.442695, %v845_v12  ;;  %v2870_v18 = vmul.f32 -1.442695, %v847_v53 }
 0x24e   :  { %3207 = vpow2.f32 %v2869_v6 }
 0x24f   :  { %3209 = vtanh.f32 %v846_v13  ;;  %v5255_v13 = vld [vmem:[#allocation51_spill] sm:$0xff] }
 0x250   :  { %3211 = vpow2.f32 %v2870_v18 }
 0x259   :  { %v3206_v10 = vpop.eup %3205 }
 0x25a   :  { %v851_v4 = vadd.f32 1.0, %v3206_v10 }
 0x25b   :  { %v3208_v5 = vpop.eup %3207 }
 0x25c   :  { %3213 = vrcp.f32 %v851_v4  ;;  %v857_v9 = vadd.f32 1.0, %v3208_v5  ;;  %v3210_v11 = vpop.eup %3209  ;;  %v5256_v5 = vld [vmem:[#allocation49_spill] sm:$0xff] }
 0x25d   :  { %v3212_v7 = vpop.eup %3211 }
 0x25e   :  { %3215 = vrcp.f32 %v857_v9  ;;  %v864_v35 = vadd.f32 1.0, %v3212_v7 }
 0x260   :  { %3217 = vrcp.f32 %v864_v35 }
 0x269   :  { %v3214_v8 = vpop.eup %3213 }
 0x26a   :  { %v868_v17 = vmul.f32 %v3214_v8, %v3210_v11 }
 0x26b   :  { %v3216_v12 = vpop.eup %3215 }
 0x26c   :  { %v867_v6 = vmul.f32 %v3216_v12, %v4182_v44 }
 0x26d   :  { %v3218_v53 = vpop.eup %3217 }
 0x26e   :  { %v4260_v26 = vadd.f32 %v868_v17, %v867_v6 }
 0x270   :  { %3219 = vtanh.f32 %v4260_v26 }
 0x27d   :  { %v3220_v15 = vpop.eup %3219 }
 0x27e   :  { %v4263_v0 = vmul.f32 %v3220_v15, %v3218_v53 }
 0x280   :  { %5232 = vst [vmem:[#allocation24_spill] sm:$0xff] %v4263_v0  ;;  %944 = vmatmul.mubr.f32.vlgmr.msra.gmra.mxu0 %v4263_v0  ;;  %1015 = vmatmul.mubr.f32.vlgmr.msra.gmra.mxu1 %v4263_v0  ;;  %v4418_v0 = vld [vmem:[#allocation9 + $0x138] sm:$0xff] }
 0x281   :  { %1057 = vmatpush1.msra.mxu0 %v3806_v20  ;;  %1128 = vmatpush1.msra.mxu1 %v3808_v21  ;;  %v5233_v20 = vld [vmem:[#allocation27_spill] sm:$0xff]  ;;  %v5234_v21 = vld [vmem:[#allocation28_spill] sm:$0xff] }
 0x282   :  { %1058 = vmatprep.subr.mxu0 %v3812_v22  ;;  %1129 = vmatprep.subr.mxu1 %v3814_v23  ;;  %v5235_v22 = vld [vmem:[#allocation29_spill] sm:$0xff]  ;;  %v5236_v23 = vld [vmem:[#allocation30_spill] sm:$0xff] }
 0x283   :  { %1059 = vmatpush1.msra.mxu0 %v3820_v24  ;;  %1130 = vmatpush1.msra.mxu1 %v3822_v25  ;;  %v5237_v24 = vld [vmem:[#allocation31_spill] sm:$0xff]  ;;  %v5238_v25 = vld [vmem:[#allocation32_spill] sm:$0xff] }
 0x284   :  { %1060 = vmatprep.subr.mxu0 %v3828_v27  ;;  %1131 = vmatprep.subr.mxu1 %v3830_v28  ;;  %v5239_v27 = vld [vmem:[#allocation33_spill] sm:$0xff]  ;;  %v5240_v28 = vld [vmem:[#allocation34_spill] sm:$0xff] }
 0x285   :  { %1061 = vmatpush1.msra.mxu0 %v3834_v29  ;;  %1132 = vmatpush1.msra.mxu1 %v3836_v30  ;;  %v5241_v29 = vld [vmem:[#allocation35_spill] sm:$0xff]  ;;  %v5242_v30 = vld [vmem:[#allocation36_spill] sm:$0xff] }
 0x286   :  { %1062 = vmatprep.subr.mxu0 %v3840_v31  ;;  %1133 = vmatprep.subr.mxu1 %v3842_v32  ;;  %v5243_v31 = vld [vmem:[#allocation37_spill] sm:$0xff]  ;;  %v5244_v32 = vld [vmem:[#allocation38_spill] sm:$0xff] }
 0x287   :  { %1063 = vmatpush1.msra.mxu0 %v3848_v33  ;;  %1134 = vmatpush1.msra.mxu1 %v3850_v34  ;;  %v5245_v33 = vld [vmem:[#allocation39_spill] sm:$0xff]  ;;  %v5246_v34 = vld [vmem:[#allocation40_spill] sm:$0xff] }
 0x288   :  { %1064 = vmatprep.subr.mxu0 %v3856_v36  ;;  %1135 = vmatprep.subr.mxu1 %v3858_v37  ;;  %v5247_v36 = vld [vmem:[#allocation41_spill] sm:$0xff]  ;;  %v5248_v37 = vld [vmem:[#allocation42_spill] sm:$0xff] }
 0x289   :  { %1065 = vmatpush1.msra.mxu0 %v3862_v38  ;;  %1136 = vmatpush1.msra.mxu1 %v3864_v39  ;;  %v5249_v38 = vmov 0.0   ;;  %v5250_v39 = vld [vmem:[#allocation43_spill] sm:$0xff] }
 0x28a   :  { %1066 = vmatprep.subr.mxu0 %v3868_v40  ;;  %1137 = vmatprep.subr.mxu1 %v3870_v41  ;;  %v4331_v40 = vld [vmem:[#allocation9 + $0x1e8] sm:$0xff]  ;;  %v4334_v41 = vld [vmem:[#allocation9 + $0x1f8] sm:$0xff] }
 0x28b   :  { %1067 = vmatpush1.msra.mxu0 %v3876_v42  ;;  %1138 = vmatpush1.msra.mxu1 %v3878_v43  ;;  %5251 = vst [vmem:[#allocation25_spill] sm:$0xff] %v4331_v40  ;;  %5252 = vst [vmem:[#allocation26_spill] sm:$0xff] %v4334_v41  ;;  %v5253_v43 = vld [vmem:[#allocation48_spill] sm:$0xff] }
 0x28c   :  { %1068 = vmatprep.subr.mxu0 %v3884_v45  ;;  %1139 = vmatprep.subr.mxu1 %v3886_v46 }
 0x28d   :  { %1069 = vmatpush1.msra.mxu0 %v3890_v47  ;;  %1140 = vmatpush1.msra.mxu1 %v3892_v48  ;;  %v5254_v48 = vld [vmem:[#allocation50_spill] sm:$0xff] }
 0x28e   :  { %1070 = vmatprep.subr.mxu0 %v3896_v49  ;;  %1141 = vmatprep.subr.mxu1 %v3898_v50 }
 0x28f   :  { %1071 = vmatpush1.msra.mxu0 %v3904_v51  ;;  %1142 = vmatpush1.msra.mxu1 %v3906_v52 }
 0x290   :  { %1072 = vmatprep.subr.mxu0 %v3912_v54  ;;  %1143 = vmatprep.subr.mxu1 %v3914_v55 }
 0x291   :  { %1073 = vmatpush1.msra.mxu0 %v3918_v56  ;;  %1144 = vmatpush1.msra.mxu1 %v3920_v57 }
 0x292   :  { %1074 = vmatprep.subr.mxu0 %v3924_v58  ;;  %1145 = vmatprep.subr.mxu1 %v3926_v59 }
 0x293   :  { %1075 = vmatpush1.msra.mxu0 %v3932_v60  ;;  %1146 = vmatpush1.msra.mxu1 %v3934_v61 }
 0x294   :  { %1076 = vmatprep.subr.mxu0 %v3940_v63  ;;  %1147 = vmatprep.subr.mxu1 %v3942_v1 }
 0x295   :  { %1077 = vmatpush1.msra.mxu0 %v3946_v2  ;;  %1148 = vmatpush1.msra.mxu1 %v3948_v3 }
 0x296   :  { %1078 = vmatprep.subr.mxu0 %v5205_v14  ;;  %1149 = vmatprep.subr.mxu1 %v5206_v19 }
 0x297   :  { %1079 = vmatpush1.msra.mxu0 %v5207_v62  ;;  %1150 = vmatpush1.msra.mxu1 %v5233_v20 }
 0x298   :  { %1080 = vmatprep.subr.mxu0 %v5234_v21  ;;  %1151 = vmatprep.subr.mxu1 %v5235_v22 }
 0x299   :  { %1081 = vmatpush1.msra.mxu0 %v5236_v23  ;;  %1152 = vmatpush1.msra.mxu1 %v5237_v24 }
 0x29a   :  { %1082 = vmatprep.subr.mxu0 %v5238_v25  ;;  %1153 = vmatprep.subr.mxu1 %v5239_v27 }
 0x29b   :  { %1083 = vmatpush1.msra.mxu0 %v5240_v28  ;;  %1154 = vmatpush1.msra.mxu1 %v5241_v29 }
 0x29c   :  { %1084 = vmatprep.subr.mxu0 %v5242_v30  ;;  %1155 = vmatprep.subr.mxu1 %v5243_v31 }
 0x29d   :  { %1085 = vmatpush1.msra.mxu0 %v5244_v32  ;;  %1156 = vmatpush1.msra.mxu1 %v5245_v33 }
 0x29e   :  { %1086 = vmatprep.subr.mxu0 %v5246_v34  ;;  %1157 = vmatprep.subr.mxu1 %v5247_v36 }
 0x29f   :  { %1087 = vmatpush1.msra.mxu0 %v5248_v37  ;;  %1120 = vmatprep.mubr.f32.mxu0 %v5249_v38 }
 0x2a0   :  { %1158 = vmatpush1.msra.mxu1 %v5250_v39  ;;  %1191 = vmatprep.mubr.f32.mxu1 %v5249_v38 }
 0x2a1   :  { %1233 = vmatprep.subr.mxu0 %v4331_v40  ;;  %1304 = vmatprep.subr.mxu1 %v4334_v41 }
 0x340   :  { %v945_v42 = vpop.f32.mrf.mxu0  ;;  %v1016_v4 = vpop.f32.mrf.mxu1 }
 0x341   :  { %v1021_v45 = vadd.f32 %v945_v42, %v5253_v43  ;;  %v1023_v9 = vadd.f32 %v1016_v4, %v5256_v5  ;;  %v4349_v4 = vld [vmem:[#allocation9 + $0x1e0] sm:$0xff]  ;;  %v4367_v5 = vld [vmem:[#allocation9 + $0x1a8] sm:$0xff] }
 0x342   :  { %v947_v46 = vpop.f32.mrf.mxu0  ;;  %v1018_v16 = vpop.f32.mrf.mxu1 }
 0x343   :  { %v2871_v47 = vmul.f32 -1.442695, %v1021_v45  ;;  %v1022_v44 = vadd.f32 %v947_v46, %v5254_v48  ;;  %v1024_v10 = vadd.f32 %v1018_v16, %v5255_v13  ;;  %v4358_v16 = vld [vmem:[#allocation9 + $0x1d8] sm:$0xff]  ;;  %v4361_v13 = vld [vmem:[#allocation9 + $0x1c0] sm:$0xff] }
 0x345   :  { %3221 = vpow2.f32 %v2871_v47  ;;  %v2872_v18 = vmul.f32 -1.442695, %v1022_v44  ;;  %v2873_v11 = vmul.f32 -1.442695, %v1024_v10  ;;  %v4364_v10 = vld [vmem:[#allocation9 + $0x1d0] sm:$0xff] }
 0x347   :  { %3223 = vpow2.f32 %v2872_v18  ;;  %v4352_v18 = vld [vmem:[#allocation9 + $0x1f0] sm:$0xff] }
 0x348   :  { %3225 = vtanh.f32 %v1023_v9  ;;  %v4370_v9 = vld [vmem:[#allocation9 + $0x1b8] sm:$0xff] }
 0x349   :  { %3227 = vpow2.f32 %v2873_v11  ;;  %v4373_v11 = vld [vmem:[#allocation9 + $0x1a0] sm:$0xff] }
 0x352   :  { %v3222_v7 = vpop.eup %3221 }
 0x353   :  { %v1028_v8 = vadd.f32 1.0, %v3222_v7  ;;  %v4376_v7 = vld [vmem:[#allocation9 + $0x1b0] sm:$0xff] }
 0x354   :  { %v3224_v17 = vpop.eup %3223 }
 0x355   :  { %3229 = vrcp.f32 %v1028_v8  ;;  %v1034_v12 = vadd.f32 1.0, %v3224_v17  ;;  %v3226_v35 = vpop.eup %3225  ;;  %v4379_v8 = vld [vmem:[#allocation9 + $0x188] sm:$0xff]  ;;  %v4382_v17 = vld [vmem:[#allocation9 + $0x198] sm:$0xff] }
 0x356   :  { %v3228_v6 = vpop.eup %3227 }
 0x357   :  { %3231 = vrcp.f32 %v1034_v12  ;;  %v1041_v43 = vadd.f32 1.0, %v3228_v6  ;;  %v4385_v12 = vld [vmem:[#allocation9 + $0x180] sm:$0xff]  ;;  %v4391_v6 = vld [vmem:[#allocation9 + $0x168] sm:$0xff] }
 0x359   :  { %3233 = vrcp.f32 %v1041_v43  ;;  %v4403_v43 = vld [vmem:[#allocation9 + $0x148] sm:$0xff] }
 0x35a   :  { %5258 = vst [vmem:[#allocation23_spill] sm:$0xff] %v4403_v43 }
 0x362   :  { %v3230_v53 = vpop.eup %3229 }
 0x363   :  { %v1045_v15 = vmul.f32 %v3230_v53, %v3226_v35  ;;  %v4388_v35 = vld [vmem:[#allocation9 + $0x190] sm:$0xff]  ;;  %v4394_v53 = vld [vmem:[#allocation9 + $0x178] sm:$0xff] }
 0x364   :  { %v3232_v42 = vpop.eup %3231 }
 0x365   :  { %v1044_v45 = vmul.f32 %v3232_v42, %v4260_v26  ;;  %v4355_v26 = vld [vmem:[#allocation9 + $0x1c8] sm:$0xff]  ;;  %v4400_v42 = vld [vmem:[#allocation9 + $0x170] sm:$0xff] }
 0x366   :  { %v3234_v47 = vpop.eup %3233 }
 0x367   :  { %v4342_v46 = vadd.f32 %v1045_v15, %v1044_v45  ;;  %v4397_v15 = vld [vmem:[#allocation9 + $0x160] sm:$0xff]  ;;  %v4406_v45 = vld [vmem:[#allocation9 + $0x158] sm:$0xff] }
 0x368   :  { %5259 = vst [vmem:[#allocation44_spill] sm:$0xff] %v4406_v45 }
 0x369   :  { %3235 = vtanh.f32 %v4342_v46 }
 0x376   :  { %v3236_v48 = vpop.eup %3235 }
 0x377   :  { %v4345_v44 = vmul.f32 %v3236_v48, %v3234_v47  ;;  %v4409_v47 = vld [vmem:[#allocation9 + $0x140] sm:$0xff]  ;;  %v4412_v48 = vld [vmem:[#allocation9 + $0x150] sm:$0xff] }
 0x379   :  { %5257 = vst [vmem:[#allocation22_spill] sm:$0xff] %v4345_v44  ;;  %1121 = vmatmul.mubr.f32.vlgmr.msra.gmra.mxu0 %v4345_v44  ;;  %1192 = vmatmul.mubr.f32.vlgmr.msra.gmra.mxu1 %v4345_v44  ;;  %v4415_v44 = vld [vmem:[#allocation9 + $0x128] sm:$0xff] }
 0x37a   :  { %1234 = vmatpush1.msra.mxu0 %v4349_v4  ;;  %1305 = vmatpush1.msra.mxu1 %v4352_v18 }
 0x37b   :  { %1235 = vmatprep.subr.mxu0 %v4355_v26  ;;  %1306 = vmatprep.subr.mxu1 %v4358_v16 }
 0x37c   :  { %1236 = vmatpush1.msra.mxu0 %v4361_v13  ;;  %1307 = vmatpush1.msra.mxu1 %v4364_v10 }
 0x37d   :  { %1237 = vmatprep.subr.mxu0 %v4367_v5  ;;  %1308 = vmatprep.subr.mxu1 %v4370_v9 }
 0x37e   :  { %1238 = vmatpush1.msra.mxu0 %v4373_v11  ;;  %1309 = vmatpush1.msra.mxu1 %v4376_v7 }
 0x37f   :  { %1239 = vmatprep.subr.mxu0 %v4379_v8  ;;  %1310 = vmatprep.subr.mxu1 %v4382_v17 }
 0x380   :  { %1240 = vmatpush1.msra.mxu0 %v4385_v12  ;;  %1311 = vmatpush1.msra.mxu1 %v4388_v35 }
 0x381   :  { %1241 = vmatprep.subr.mxu0 %v4391_v6  ;;  %1312 = vmatprep.subr.mxu1 %v4394_v53 }
 0x382   :  { %1242 = vmatpush1.msra.mxu0 %v4397_v15  ;;  %1313 = vmatpush1.msra.mxu1 %v4400_v42 }
 0x383   :  { %1243 = vmatprep.subr.mxu0 %v4403_v43  ;;  %1314 = vmatprep.subr.mxu1 %v4406_v45  ;;  %v4421_v43 = vld [vmem:[#allocation9 + $0x120] sm:$0xff]  ;;  %v4424_v45 = vld [vmem:[#allocation9 + $0x130] sm:$0xff] }
 0x384   :  { %1244 = vmatpush1.msra.mxu0 %v4409_v47  ;;  %1315 = vmatpush1.msra.mxu1 %v4412_v48 }
 0x385   :  { %1245 = vmatprep.subr.mxu0 %v4415_v44  ;;  %1316 = vmatprep.subr.mxu1 %v4418_v0 }
 0x386   :  { %1246 = vmatpush1.msra.mxu0 %v4421_v43  ;;  %1317 = vmatpush1.msra.mxu1 %v4424_v45 }
 0x387   :  { %1247 = vmatprep.subr.mxu0 %v3896_v49  ;;  %1318 = vmatprep.subr.mxu1 %v3898_v50  ;;  %v5260_v50 = vld [vmem:[#allocation52_spill] sm:$0xff] }
 0x388   :  { %1248 = vmatpush1.msra.mxu0 %v3904_v51  ;;  %1319 = vmatpush1.msra.mxu1 %v3906_v52 }
 0x389   :  { %1249 = vmatprep.subr.mxu0 %v3912_v54  ;;  %1320 = vmatprep.subr.mxu1 %v3914_v55  ;;  %v5261_v55 = vld [vmem:[#allocation54_spill] sm:$0xff] }
 0x38a   :  { %1250 = vmatpush1.msra.mxu0 %v3918_v56  ;;  %1321 = vmatpush1.msra.mxu1 %v3920_v57 }
 0x38b   :  { %1251 = vmatprep.subr.mxu0 %v3924_v58  ;;  %1322 = vmatprep.subr.mxu1 %v3926_v59 }
 0x38c   :  { %1252 = vmatpush1.msra.mxu0 %v3932_v60  ;;  %1323 = vmatpush1.msra.mxu1 %v3934_v61  ;;  %v5262_v60 = vld [vmem:[#allocation55_spill] sm:$0xff] }
 0x38d   :  { %1253 = vmatprep.subr.mxu0 %v3940_v63  ;;  %1324 = vmatprep.subr.mxu1 %v3942_v1  ;;  %v5263_v63 = vld [vmem:[#allocation53_spill] sm:$0xff] }
 0x38e   :  { %1254 = vmatpush1.msra.mxu0 %v3946_v2  ;;  %1325 = vmatpush1.msra.mxu1 %v3948_v3 }
 0x38f   :  { %1255 = vmatprep.subr.mxu0 %v5205_v14  ;;  %1326 = vmatprep.subr.mxu1 %v5206_v19 }
 0x390   :  { %1256 = vmatpush1.msra.mxu0 %v5207_v62  ;;  %1327 = vmatpush1.msra.mxu1 %v5233_v20 }
 0x391   :  { %1257 = vmatprep.subr.mxu0 %v5234_v21  ;;  %1328 = vmatprep.subr.mxu1 %v5235_v22 }
 0x392   :  { %1258 = vmatpush1.msra.mxu0 %v5236_v23  ;;  %1329 = vmatpush1.msra.mxu1 %v5237_v24 }
 0x393   :  { %1259 = vmatprep.subr.mxu0 %v5238_v25  ;;  %1330 = vmatprep.subr.mxu1 %v5239_v27 }
 0x394   :  { %1260 = vmatpush1.msra.mxu0 %v5240_v28  ;;  %1331 = vmatpush1.msra.mxu1 %v5241_v29 }
 0x395   :  { %1261 = vmatprep.subr.mxu0 %v5242_v30  ;;  %1332 = vmatprep.subr.mxu1 %v5243_v31 }
 0x396   :  { %1262 = vmatpush1.msra.mxu0 %v5244_v32  ;;  %1333 = vmatpush1.msra.mxu1 %v5245_v33  ;;  %v5265_v32 = vld [vmem:[#allocation23_spill] sm:$0xff]  ;;  %v5266_v33 = vld [vmem:[#allocation44_spill] sm:$0xff] }
 0x397   :  { %1263 = vmatprep.subr.mxu0 %v5246_v34  ;;  %1334 = vmatprep.subr.mxu1 %v5247_v36  ;;  %v4505_v34 = vld [vmem:[#allocation9 + $0x108] sm:$0xff]  ;;  %v4508_v36 = vld [vmem:[#allocation9 + $0x118] sm:$0xff] }
 0x398   :  { %1264 = vmatpush1.msra.mxu0 %v5248_v37  ;;  %1297 = vmatprep.mubr.f32.mxu0 %v5249_v38  ;;  %v4511_v37 = vld [vmem:[#allocation9 + $0x100] sm:$0xff] }
 0x399   :  { %1335 = vmatpush1.msra.mxu1 %v5250_v39  ;;  %1368 = vmatprep.mubr.f32.mxu1 %v5249_v38  ;;  %v4514_v39 = vld [vmem:[#allocation9 + $0x110] sm:$0xff] }
 0x39a   :  { %1410 = vmatprep.subr.mxu0 %v4331_v40  ;;  %1481 = vmatprep.subr.mxu1 %v4334_v41 }
 0x439   :  { %v1122_v49 = vpop.f32.mrf.mxu0  ;;  %v1193_v57 = vpop.f32.mrf.mxu1 }
 0x43a   :  { %v1198_v51 = vadd.f32 %v1122_v49, %v5260_v50  ;;  %v1200_v1 = vadd.f32 %v1193_v57, %v5263_v63  ;;  %v4520_v49 = vld [vmem:[#allocation9 + $0xf8] sm:$0xff]  ;;  %v4523_v50 = vld [vmem:[#allocation9 + $0xe0] sm:$0xff]  ;;  %v4541_v57 = vld [vmem:[#allocation9 + $0xa8] sm:$0xff] }
 0x43b   :  { %v1124_v52 = vpop.f32.mrf.mxu0  ;;  %v1195_v59 = vpop.f32.mrf.mxu1  ;;  %v4556_v63 = vld [vmem:[#allocation9 + $0x98] sm:$0xff] }
 0x43c   :  { %v2874_v54 = vmul.f32 -1.442695, %v1198_v51  ;;  %v1199_v56 = vadd.f32 %v1124_v52, %v5261_v55  ;;  %v1201_v61 = vadd.f32 %v1195_v59, %v5262_v60  ;;  %v4526_v51 = vld [vmem:[#allocation9 + $0xf0] sm:$0xff]  ;;  %v4529_v52 = vld [vmem:[#allocation9 + $0xc8] sm:$0xff]  ;;  %v4535_v55 = vld [vmem:[#allocation9 + $0xc0] sm:$0xff] }
 0x43d   :  { %v4547_v59 = vld [vmem:[#allocation9 + $0xa0] sm:$0xff]  ;;  %v4550_v60 = vld [vmem:[#allocation9 + $0xb0] sm:$0xff] }
 0x43e   :  { %3237 = vpow2.f32 %v2874_v54  ;;  %v2875_v58 = vmul.f32 -1.442695, %v1199_v56  ;;  %v2876_v2 = vmul.f32 -1.442695, %v1201_v61  ;;  %v4532_v54 = vld [vmem:[#allocation9 + $0xd8] sm:$0xff]  ;;  %v4538_v56 = vld [vmem:[#allocation9 + $0xd0] sm:$0xff] }
 0x43f   :  { %v4553_v61 = vld [vmem:[#allocation9 + $0x88] sm:$0xff] }
 0x440   :  { %3239 = vpow2.f32 %v2875_v58  ;;  %v4544_v58 = vld [vmem:[#allocation9 + $0xb8] sm:$0xff] }
 0x441   :  { %3241 = vtanh.f32 %v1200_v1  ;;  %v4559_v1 = vld [vmem:[#allocation9 + $0x80] sm:$0xff] }
 0x442   :  { %3243 = vpow2.f32 %v2876_v2  ;;  %v4562_v2 = vld [vmem:[#allocation9 + $0x90] sm:$0xff] }
 0x443   :  { %5267 = vst [vmem:[#allocation47_spill] sm:$0xff] %v4562_v2 }
 0x44b   :  { %v3238_v3 = vpop.eup %3237 }
 0x44c   :  { %v1205_v14 = vadd.f32 1.0, %v3238_v3  ;;  %v4565_v3 = vld [vmem:[#allocation9 + $0x68] sm:$0xff] }
 0x44d   :  { %v3240_v19 = vpop.eup %3239  ;;  %5268 = vst [vmem:[#allocation45_spill] sm:$0xff] %v4565_v3 }
 0x44e   :  { %3245 = vrcp.f32 %v1205_v14  ;;  %v1211_v62 = vadd.f32 1.0, %v3240_v19  ;;  %v3242_v20 = vpop.eup %3241  ;;  %v4568_v14 = vld [vmem:[#allocation9 + $0x78] sm:$0xff]  ;;  %v4571_v19 = vld [vmem:[#allocation9 + $0x60] sm:$0xff] }
 0x44f   :  { %v3244_v21 = vpop.eup %3243  ;;  %5269 = vst [vmem:[#allocation27_spill] sm:$0xff] %v4568_v14  ;;  %5270 = vst [vmem:[#allocation28_spill] sm:$0xff] %v4571_v19 }
 0x450   :  { %3247 = vrcp.f32 %v1211_v62  ;;  %v1218_v25 = vadd.f32 1.0, %v3244_v21  ;;  %v4574_v62 = vld [vmem:[#allocation9 + $0x70] sm:$0xff]  ;;  %v4580_v21 = vld [vmem:[#allocation9 + $0x58] sm:$0xff] }
 0x451   :  { %5271 = vst [vmem:[#allocation29_spill] sm:$0xff] %v4574_v62  ;;  %5273 = vst [vmem:[#allocation31_spill] sm:$0xff] %v4580_v21 }
 0x452   :  { %3249 = vrcp.f32 %v1218_v25  ;;  %v4592_v25 = vld [vmem:[#allocation9 + $0x38] sm:$0xff] }
 0x453   :  { %5277 = vst [vmem:[#allocation35_spill] sm:$0xff] %v4592_v25 }
 0x45b   :  { %v3246_v22 = vpop.eup %3245 }
 0x45c   :  { %v1222_v23 = vmul.f32 %v3246_v22, %v3242_v20  ;;  %v4577_v20 = vld [vmem:[#allocation9 + $0x48] sm:$0xff]  ;;  %v4583_v22 = vld [vmem:[#allocation9 + $0x40] sm:$0xff] }
 0x45d   :  { %v3248_v24 = vpop.eup %3247  ;;  %5272 = vst [vmem:[#allocation30_spill] sm:$0xff] %v4577_v20  ;;  %5274 = vst [vmem:[#allocation32_spill] sm:$0xff] %v4583_v22 }
 0x45e   :  { %v1221_v27 = vmul.f32 %v3248_v24, %v4342_v46  ;;  %v4517_v46 = vld [vmem:[#allocation9 + $0xe8] sm:$0xff] }
 0x45f   :  { %v3250_v29 = vpop.eup %3249  ;;  %v4589_v24 = vld [vmem:[#allocation9 + $0x28] sm:$0xff] }
 0x460   :  { %v4472_v28 = vadd.f32 %v1222_v23, %v1221_v27  ;;  %v4586_v23 = vld [vmem:[#allocation9 + $0x50] sm:$0xff]  ;;  %5276 = vst [vmem:[#allocation34_spill] sm:$0xff] %v4589_v24  ;;  %v4595_v27 = vld [vmem:[#allocation9 + $0x20] sm:$0xff] }
 0x461   :  { %5275 = vst [vmem:[#allocation33_spill] sm:$0xff] %v4586_v23  ;;  %5278 = vst [vmem:[#allocation36_spill] sm:$0xff] %v4595_v27 }
 0x462   :  { %3251 = vtanh.f32 %v4472_v28 }
 0x46f   :  { %v3252_v30 = vpop.eup %3251 }
 0x470   :  { %v4475_v31 = vmul.f32 %v3252_v30, %v3250_v29  ;;  %v4598_v29 = vld [vmem:[#allocation9 + $0x30] sm:$0xff]  ;;  %v4601_v30 = vld [vmem:[#allocation9 + $0x8] sm:$0xff] }
 0x471   :  { %5279 = vst [vmem:[#allocation37_spill] sm:$0xff] %v4598_v29  ;;  %5280 = vst [vmem:[#allocation38_spill] sm:$0xff] %v4601_v30 }
 0x472   :  { %5264 = vst [vmem:[#allocation46_spill] sm:$0xff] %v4475_v31  ;;  %1298 = vmatmul.mubr.f32.vlgmr.msra.gmra.mxu0 %v4475_v31  ;;  %1369 = vmatmul.mubr.f32.vlgmr.msra.gmra.mxu1 %v4475_v31  ;;  %v4604_v31 = vld [vmem:[#allocation9 + $0x18] sm:$0xff] }
 0x473   :  { %1411 = vmatpush1.msra.mxu0 %v4349_v4  ;;  %1482 = vmatpush1.msra.mxu1 %v4352_v18  ;;  %5281 = vst [vmem:[#allocation39_spill] sm:$0xff] %v4604_v31 }
 0x474   :  { %1412 = vmatprep.subr.mxu0 %v4355_v26  ;;  %1483 = vmatprep.subr.mxu1 %v4358_v16 }
 0x475   :  { %1413 = vmatpush1.msra.mxu0 %v4361_v13  ;;  %1484 = vmatpush1.msra.mxu1 %v4364_v10 }
 0x476   :  { %1414 = vmatprep.subr.mxu0 %v4367_v5  ;;  %1485 = vmatprep.subr.mxu1 %v4370_v9 }
 0x477   :  { %1415 = vmatpush1.msra.mxu0 %v4373_v11  ;;  %1486 = vmatpush1.msra.mxu1 %v4376_v7 }
 0x478   :  { %1416 = vmatprep.subr.mxu0 %v4379_v8  ;;  %1487 = vmatprep.subr.mxu1 %v4382_v17 }
 0x479   :  { %1417 = vmatpush1.msra.mxu0 %v4385_v12  ;;  %1488 = vmatpush1.msra.mxu1 %v4388_v35 }
 0x47a   :  { %1418 = vmatprep.subr.mxu0 %v4391_v6  ;;  %1489 = vmatprep.subr.mxu1 %v4394_v53 }
 0x47b   :  { %1419 = vmatpush1.msra.mxu0 %v4397_v15  ;;  %1490 = vmatpush1.msra.mxu1 %v4400_v42 }
 0x47c   :  { %1420 = vmatprep.subr.mxu0 %v5265_v32  ;;  %1491 = vmatprep.subr.mxu1 %v5266_v33 }
 0x47d   :  { %1421 = vmatpush1.msra.mxu0 %v4409_v47  ;;  %1492 = vmatpush1.msra.mxu1 %v4412_v48 }
 0x47e   :  { %1422 = vmatprep.subr.mxu0 %v4415_v44  ;;  %1493 = vmatprep.subr.mxu1 %v4418_v0 }
 0x47f   :  { %1423 = vmatpush1.msra.mxu0 %v4421_v43  ;;  %1494 = vmatpush1.msra.mxu1 %v4424_v45 }
 0x480   :  { %1424 = vmatprep.subr.mxu0 %v4505_v34  ;;  %1495 = vmatprep.subr.mxu1 %v4508_v36 }
 0x481   :  { %1425 = vmatpush1.msra.mxu0 %v4511_v37  ;;  %1496 = vmatpush1.msra.mxu1 %v4514_v39 }
 0x482   :  { %1426 = vmatprep.subr.mxu0 %v4517_v46  ;;  %1497 = vmatprep.subr.mxu1 %v4520_v49 }
 0x483   :  { %1427 = vmatpush1.msra.mxu0 %v4523_v50  ;;  %1498 = vmatpush1.msra.mxu1 %v4526_v51 }
 0x484   :  { %1428 = vmatprep.subr.mxu0 %v4529_v52  ;;  %1499 = vmatprep.subr.mxu1 %v4532_v54 }
 0x485   :  { %1429 = vmatpush1.msra.mxu0 %v4535_v55  ;;  %1500 = vmatpush1.msra.mxu1 %v4538_v56 }
 0x486   :  { %1430 = vmatprep.subr.mxu0 %v4541_v57  ;;  %1501 = vmatprep.subr.mxu1 %v4544_v58 }
 0x487   :  { %1431 = vmatpush1.msra.mxu0 %v4547_v59  ;;  %1502 = vmatpush1.msra.mxu1 %v4550_v60 }
 0x488   :  { %1432 = vmatprep.subr.mxu0 %v4553_v61  ;;  %1503 = vmatprep.subr.mxu1 %v4556_v63 }
 0x489   :  { %1433 = vmatpush1.msra.mxu0 %v4559_v1  ;;  %1504 = vmatpush1.msra.mxu1 %v4562_v2 }
 0x48a   :  { %1434 = vmatprep.subr.mxu0 %v4565_v3  ;;  %1505 = vmatprep.subr.mxu1 %v4568_v14  ;;  %v5287_v14 = vld [vmem:[#allocation57_spill] sm:$0xff] }
 0x48b   :  { %1435 = vmatpush1.msra.mxu0 %v4571_v19  ;;  %1506 = vmatpush1.msra.mxu1 %v4574_v62  ;;  %v5286_v19 = vld [vmem:[#allocation59_spill] sm:$0xff] }
 0x48c   :  { %1436 = vmatprep.subr.mxu0 %v4577_v20  ;;  %1507 = vmatprep.subr.mxu1 %v4580_v21 }
 0x48d   :  { %1437 = vmatpush1.msra.mxu0 %v4583_v22  ;;  %1508 = vmatpush1.msra.mxu1 %v4586_v23  ;;  %v5285_v22 = vld [vmem:[#allocation58_spill] sm:$0xff] }
 0x48e   :  { %1438 = vmatprep.subr.mxu0 %v4589_v24  ;;  %1509 = vmatprep.subr.mxu1 %v4592_v25  ;;  %v4607_v24 = vld [vmem:[#allocation9] sm:$0xff]  ;;  %v4611_v25 = vld [vmem:[#allocation9 + $0x10] sm:$0xff] }
 0x48f   :  { %1439 = vmatpush1.msra.mxu0 %v4595_v27  ;;  %1510 = vmatpush1.msra.mxu1 %v4598_v29  ;;  %5282 = vst [vmem:[#allocation40_spill] sm:$0xff] %v4607_v24  ;;  %5283 = vst [vmem:[#allocation41_spill] sm:$0xff] %v4611_v25  ;;  %v5284_v29 = vld [vmem:[#allocation56_spill] sm:$0xff] }
 0x490   :  { %1440 = vmatprep.subr.mxu0 %v4601_v30  ;;  %1511 = vmatprep.subr.mxu1 %v4604_v31 }
 0x491   :  { %1441 = vmatpush1.msra.mxu0 %v4607_v24  ;;  %1474 = vmatprep.mubr.f32.mxu0 %v5249_v38 }
 0x492   :  { %1512 = vmatpush1.msra.mxu1 %v4611_v25  ;;  %1545 = vmatprep.mubr.f32.mxu1 %v5249_v38 }
 0x493   :  { %1587 = vmatprep.subr.mxu0 %v4331_v40  ;;  %1658 = vmatprep.subr.mxu1 %v4334_v41 }
 0x532   :  { %v1299_v30 = vpop.f32.mrf.mxu0  ;;  %v1370_v24 = vpop.f32.mrf.mxu1 }
 0x533   :  { %v1375_v27 = vadd.f32 %v1299_v30, %v5284_v29  ;;  %v1377_v38 = vadd.f32 %v1370_v24, %v5287_v14  ;;  %v5294_v24 = vld [vmem:[#allocation30_spill] sm:$0xff] }
 0x534   :  { %v1301_v31 = vpop.f32.mrf.mxu0  ;;  %v1372_v62 = vpop.f32.mrf.mxu1 }
 0x535   :  { %v2877_v23 = vmul.f32 -1.442695, %v1375_v27  ;;  %v1376_v21 = vadd.f32 %v1301_v31, %v5285_v22  ;;  %v1378_v25 = vadd.f32 %v1372_v62, %v5286_v19  ;;  %v5293_v62 = vld [vmem:[#allocation29_spill] sm:$0xff] }
 0x537   :  { %3253 = vpow2.f32 %v2877_v23  ;;  %v2878_v20 = vmul.f32 -1.442695, %v1376_v21  ;;  %v2879_v3 = vmul.f32 -1.442695, %v1378_v25  ;;  %v5295_v25 = vld [vmem:[#allocation31_spill] sm:$0xff] }
 0x539   :  { %3255 = vpow2.f32 %v2878_v20 }
 0x53a   :  { %3257 = vtanh.f32 %v1377_v38 }
 0x53b   :  { %3259 = vpow2.f32 %v2879_v3  ;;  %v5292_v3 = vld [vmem:[#allocation28_spill] sm:$0xff] }
 0x544   :  { %v3254_v40 = vpop.eup %3253 }
 0x545   :  { %v1382_v2 = vadd.f32 1.0, %v3254_v40 }
 0x546   :  { %v3256_v41 = vpop.eup %3255 }
 0x547   :  { %3261 = vrcp.f32 %v1382_v2  ;;  %v1388_v29 = vadd.f32 1.0, %v3256_v41  ;;  %v3258_v27 = vpop.eup %3257  ;;  %v5289_v41 = vld [vmem:[#allocation47_spill] sm:$0xff] }
 0x548   :  { %v3260_v31 = vpop.eup %3259  ;;  %v5291_v2 = vld [vmem:[#allocation27_spill] sm:$0xff] }
 0x549   :  { %3263 = vrcp.f32 %v1388_v29  ;;  %v1395_v20 = vadd.f32 1.0, %v3260_v31  ;;  %v5296_v29 = vld [vmem:[#allocation32_spill] sm:$0xff]  ;;  %v5298_v31 = vld [vmem:[#allocation34_spill] sm:$0xff] }
 0x54b   :  { %3265 = vrcp.f32 %v1395_v20  ;;  %v5302_v20 = vld [vmem:[#allocation38_spill] sm:$0xff] }
 0x554   :  { %v3262_v22 = vpop.eup %3261 }
 0x555   :  { %v1399_v23 = vmul.f32 %v3262_v22, %v3258_v27  ;;  %v5297_v27 = vld [vmem:[#allocation33_spill] sm:$0xff]  ;;  %v5299_v22 = vld [vmem:[#allocation35_spill] sm:$0xff] }
 0x556   :  { %v3264_v21 = vpop.eup %3263 }
 0x557   :  { %v1398_v30 = vmul.f32 %v3264_v21, %v4472_v28  ;;  %v5290_v28 = vld [vmem:[#allocation45_spill] sm:$0xff] }
 0x558   :  { %v3266_v40 = vpop.eup %3265  ;;  %v5301_v21 = vld [vmem:[#allocation37_spill] sm:$0xff] }
 0x559   :  { %v4622_v19 = vadd.f32 %v1399_v23, %v1398_v30  ;;  %v5300_v23 = vld [vmem:[#allocation36_spill] sm:$0xff]  ;;  %v5303_v30 = vld [vmem:[#allocation39_spill] sm:$0xff] }
 0x55b   :  { %3267 = vtanh.f32 %v4622_v19 }
 0x568   :  { %v3268_v38 = vpop.eup %3267 }
 0x569   :  { %v4625_v14 = vmul.f32 %v3268_v38, %v3266_v40  ;;  %v5304_v40 = vld [vmem:[#allocation40_spill] sm:$0xff]  ;;  %v5305_v38 = vmov 0.0  }
 0x56b   :  { %5288 = vst [vmem:[#allocation42_spill] sm:$0xff] %v4625_v14  ;;  %1475 = vmatmul.mubr.f32.vlgmr.msra.gmra.mxu0 %v4625_v14  ;;  %1546 = vmatmul.mubr.f32.vlgmr.msra.gmra.mxu1 %v4625_v14  ;;  %v5306_v14 = vld [vmem:[#allocation41_spill] sm:$0xff] }
 0x56c   :  { %1588 = vmatpush1.msra.mxu0 %v4349_v4  ;;  %1659 = vmatpush1.msra.mxu1 %v4352_v18 }
 0x56d   :  { %1589 = vmatprep.subr.mxu0 %v4355_v26  ;;  %1660 = vmatprep.subr.mxu1 %v4358_v16 }
 0x56e   :  { %1590 = vmatpush1.msra.mxu0 %v4361_v13  ;;  %1661 = vmatpush1.msra.mxu1 %v4364_v10 }
 0x56f   :  { %1591 = vmatprep.subr.mxu0 %v4367_v5  ;;  %1662 = vmatprep.subr.mxu1 %v4370_v9 }
 0x570   :  { %1592 = vmatpush1.msra.mxu0 %v4373_v11  ;;  %1663 = vmatpush1.msra.mxu1 %v4376_v7 }
 0x571   :  { %1593 = vmatprep.subr.mxu0 %v4379_v8  ;;  %1664 = vmatprep.subr.mxu1 %v4382_v17 }
 0x572   :  { %1594 = vmatpush1.msra.mxu0 %v4385_v12  ;;  %1665 = vmatpush1.msra.mxu1 %v4388_v35 }
 0x573   :  { %1595 = vmatprep.subr.mxu0 %v4391_v6  ;;  %1666 = vmatprep.subr.mxu1 %v4394_v53 }
 0x574   :  { %1596 = vmatpush1.msra.mxu0 %v4397_v15  ;;  %1667 = vmatpush1.msra.mxu1 %v4400_v42 }
 0x575   :  { %1597 = vmatprep.subr.mxu0 %v5265_v32  ;;  %1668 = vmatprep.subr.mxu1 %v5266_v33 }
 0x576   :  { %1598 = vmatpush1.msra.mxu0 %v4409_v47  ;;  %1669 = vmatpush1.msra.mxu1 %v4412_v48 }
 0x577   :  { %1599 = vmatprep.subr.mxu0 %v4415_v44  ;;  %1670 = vmatprep.subr.mxu1 %v4418_v0 }
 0x578   :  { %1600 = vmatpush1.msra.mxu0 %v4421_v43  ;;  %1671 = vmatpush1.msra.mxu1 %v4424_v45 }
 0x579   :  { %1601 = vmatprep.subr.mxu0 %v4505_v34  ;;  %1672 = vmatprep.subr.mxu1 %v4508_v36 }
 0x57a   :  { %1602 = vmatpush1.msra.mxu0 %v4511_v37  ;;  %1673 = vmatpush1.msra.mxu1 %v4514_v39 }
 0x57b   :  { %1603 = vmatprep.subr.mxu0 %v4517_v46  ;;  %1674 = vmatprep.subr.mxu1 %v4520_v49 }
 0x57c   :  { %1604 = vmatpush1.msra.mxu0 %v4523_v50  ;;  %1675 = vmatpush1.msra.mxu1 %v4526_v51 }
 0x57d   :  { %1605 = vmatprep.subr.mxu0 %v4529_v52  ;;  %1676 = vmatprep.subr.mxu1 %v4532_v54 }
 0x57e   :  { %1606 = vmatpush1.msra.mxu0 %v4535_v55  ;;  %1677 = vmatpush1.msra.mxu1 %v4538_v56 }
 0x57f   :  { %1607 = vmatprep.subr.mxu0 %v4541_v57  ;;  %1678 = vmatprep.subr.mxu1 %v4544_v58 }
 0x580   :  { %1608 = vmatpush1.msra.mxu0 %v4547_v59  ;;  %1679 = vmatpush1.msra.mxu1 %v4550_v60 }
 0x581   :  { %1609 = vmatprep.subr.mxu0 %v4553_v61  ;;  %1680 = vmatprep.subr.mxu1 %v4556_v63 }
 0x582   :  { %1610 = vmatpush1.msra.mxu0 %v4559_v1  ;;  %1681 = vmatpush1.msra.mxu1 %v5289_v41 }
 0x583   :  { %1611 = vmatprep.subr.mxu0 %v5290_v28  ;;  %1682 = vmatprep.subr.mxu1 %v5291_v2  ;;  %v5312_v2 = vld [vmem:[#allocation61_spill] sm:$0xff] }
 0x584   :  { %1612 = vmatpush1.msra.mxu0 %v5292_v3  ;;  %1683 = vmatpush1.msra.mxu1 %v5293_v62  ;;  %v5311_v3 = vld [vmem:[#allocation63_spill] sm:$0xff] }
 0x585   :  { %1613 = vmatprep.subr.mxu0 %v5294_v24  ;;  %1684 = vmatprep.subr.mxu1 %v5295_v25 }
 0x586   :  { %1614 = vmatpush1.msra.mxu0 %v5296_v29  ;;  %1685 = vmatpush1.msra.mxu1 %v5297_v27  ;;  %v5307_v27 = vld [vmem:[#allocation25_spill] sm:$0xff] }
 0x587   :  { %1615 = vmatprep.subr.mxu0 %v5298_v31  ;;  %1686 = vmatprep.subr.mxu1 %v5299_v22  ;;  %v5308_v31 = vld [vmem:[#allocation26_spill] sm:$0xff] }
 0x588   :  { %1616 = vmatpush1.msra.mxu0 %v5300_v23  ;;  %1687 = vmatpush1.msra.mxu1 %v5301_v21  ;;  %v5309_v23 = vld [vmem:[#allocation60_spill] sm:$0xff] }
 0x589   :  { %1617 = vmatprep.subr.mxu0 %v5302_v20  ;;  %1688 = vmatprep.subr.mxu1 %v5303_v30  ;;  %v5310_v20 = vld [vmem:[#allocation62_spill] sm:$0xff] }
 0x58a   :  { %1618 = vmatpush1.msra.mxu0 %v5304_v40  ;;  %1651 = vmatprep.mubr.f32.mxu0 %v5305_v38 }
 0x58b   :  { %1689 = vmatpush1.msra.mxu1 %v5306_v14  ;;  %1722 = vmatprep.mubr.f32.mxu1 %v5305_v38 }
 0x58c   :  { %1764 = vmatprep.subr.mxu0 %v5307_v27  ;;  %1835 = vmatprep.subr.mxu1 %v5308_v31 }
 0x62b   :  { %v1476_v22 = vpop.f32.mrf.mxu0  ;;  %v1547_v30 = vpop.f32.mrf.mxu1 }
 0x62c   :  { %v1552_v29 = vadd.f32 %v1476_v22, %v5309_v23  ;;  %v1554_v38 = vadd.f32 %v1547_v30, %v5312_v2 }
 0x62d   :  { %v1478_v21 = vpop.f32.mrf.mxu0  ;;  %v1549_v62 = vpop.f32.mrf.mxu1 }
 0x62e   :  { %v2880_v25 = vmul.f32 -1.442695, %v1552_v29  ;;  %v1553_v24 = vadd.f32 %v1478_v21, %v5310_v20  ;;  %v1555_v14 = vadd.f32 %v1549_v62, %v5311_v3 }
 0x630   :  { %3269 = vpow2.f32 %v2880_v25  ;;  %v2881_v40 = vmul.f32 -1.442695, %v1553_v24  ;;  %v2882_v28 = vmul.f32 -1.442695, %v1555_v14 }
 0x632   :  { %3271 = vpow2.f32 %v2881_v40 }
 0x633   :  { %3273 = vtanh.f32 %v1554_v38  ;;  %v1958_v38 = vld [vmem:[#allocation12 + $0x70] sm:$0xff] }
 0x634   :  { %3275 = vpow2.f32 %v2882_v28 }
 0x63d   :  { %v3270_v27 = vpop.eup %3269 }
 0x63e   :  { %v1559_v41 = vadd.f32 1.0, %v3270_v27  ;;  %v5335_v27 = vld [vmem:[#allocation72_spill] sm:$0xff] }
 0x63f   :  { %v3272_v31 = vpop.eup %3271 }
 0x640   :  { %3277 = vrcp.f32 %v1559_v41  ;;  %v1565_v22 = vadd.f32 1.0, %v3272_v31  ;;  %v3274_v29 = vpop.eup %3273  ;;  %v1957_v31 = vld [vmem:[#allocation12 + $0x68] sm:$0xff] }
 0x641   :  { %v3276_v23 = vpop.eup %3275 }
 0x642   :  { %3279 = vrcp.f32 %v1565_v22  ;;  %v1572_v20 = vadd.f32 1.0, %v3276_v23  ;;  %v1956_v22 = vld [vmem:[#allocation12 + $0x60] sm:$0xff]  ;;  %v1954_v23 = vld [vmem:[#allocation12 + $0x50] sm:$0xff] }
 0x644   :  { %3281 = vrcp.f32 %v1572_v20  ;;  %v1950_v20 = vld [vmem:[#allocation12 + $0x30] sm:$0xff] }
 0x64d   :  { %v3278_v25 = vpop.eup %3277 }
 0x64e   :  { %v1576_v21 = vmul.f32 %v3278_v25, %v3274_v29  ;;  %v1955_v29 = vld [vmem:[#allocation12 + $0x58] sm:$0xff]  ;;  %v1953_v25 = vld [vmem:[#allocation12 + $0x48] sm:$0xff] }
 0x64f   :  { %v3280_v24 = vpop.eup %3279 }
 0x650   :  { %v1575_v40 = vmul.f32 %v3280_v24, %v4622_v19  ;;  %v1951_v24 = vld [vmem:[#allocation12 + $0x38] sm:$0xff] }
 0x651   :  { %v3282_v14 = vpop.eup %3281 }
 0x652   :  { %v4700_v3 = vadd.f32 %v1576_v21, %v1575_v40  ;;  %v1952_v21 = vld [vmem:[#allocation12 + $0x40] sm:$0xff]  ;;  %v1949_v40 = vld [vmem:[#allocation12 + $0x28] sm:$0xff] }
 0x654   :  { %3283 = vtanh.f32 %v4700_v3 }
 0x661   :  { %v3284_v2 = vpop.eup %3283 }
 0x662   :  { %v4703_v62 = vmul.f32 %v3284_v2, %v3282_v14  ;;  %v1947_v14 = vld [vmem:[#allocation12 + $0x18] sm:$0xff]  ;;  %v1946_v2 = vld [vmem:[#allocation12 + $0x10] sm:$0xff] }
 0x664   :  { %1652 = vmatmul.mubr.f32.vlgmr.msra.gmra.mxu0 %v4703_v62  ;;  %1723 = vmatmul.mubr.f32.vlgmr.msra.gmra.mxu1 %v4703_v62 }
 0x665   :  { %1765 = vmatpush1.msra.mxu0 %v4349_v4  ;;  %1836 = vmatpush1.msra.mxu1 %v4352_v18  ;;  %v5315_v4 = vld [vmem:[#allocation27_spill] sm:$0xff]  ;;  %v5316_v18 = vld [vmem:[#allocation28_spill] sm:$0xff] }
 0x666   :  { %1766 = vmatprep.subr.mxu0 %v4355_v26  ;;  %1837 = vmatprep.subr.mxu1 %v4358_v16  ;;  %v5317_v26 = vld [vmem:[#allocation29_spill] sm:$0xff]  ;;  %v5318_v16 = vld [vmem:[#allocation30_spill] sm:$0xff] }
 0x667   :  { %1767 = vmatpush1.msra.mxu0 %v4361_v13  ;;  %1838 = vmatpush1.msra.mxu1 %v4364_v10  ;;  %v5319_v13 = vld [vmem:[#allocation31_spill] sm:$0xff]  ;;  %v5320_v10 = vld [vmem:[#allocation32_spill] sm:$0xff] }
 0x668   :  { %1768 = vmatprep.subr.mxu0 %v4367_v5  ;;  %1839 = vmatprep.subr.mxu1 %v4370_v9  ;;  %v5321_v5 = vld [vmem:[#allocation33_spill] sm:$0xff]  ;;  %v5322_v9 = vld [vmem:[#allocation34_spill] sm:$0xff] }
 0x669   :  { %1769 = vmatpush1.msra.mxu0 %v4373_v11  ;;  %1840 = vmatpush1.msra.mxu1 %v4376_v7  ;;  %v5323_v11 = vld [vmem:[#allocation35_spill] sm:$0xff]  ;;  %v5324_v7 = vld [vmem:[#allocation36_spill] sm:$0xff] }
 0x66a   :  { %1770 = vmatprep.subr.mxu0 %v4379_v8  ;;  %1841 = vmatprep.subr.mxu1 %v4382_v17  ;;  %v5325_v8 = vld [vmem:[#allocation37_spill] sm:$0xff]  ;;  %v5326_v17 = vld [vmem:[#allocation38_spill] sm:$0xff] }
 0x66b   :  { %1771 = vmatpush1.msra.mxu0 %v4385_v12  ;;  %1842 = vmatpush1.msra.mxu1 %v4388_v35  ;;  %v5327_v12 = vld [vmem:[#allocation39_spill] sm:$0xff]  ;;  %v5328_v35 = vld [vmem:[#allocation40_spill] sm:$0xff] }
 0x66c   :  { %1772 = vmatprep.subr.mxu0 %v4391_v6  ;;  %1843 = vmatprep.subr.mxu1 %v4394_v53  ;;  %v5329_v6 = vmov 0.0   ;;  %v5330_v53 = vld [vmem:[#allocation41_spill] sm:$0xff] }
 0x66d   :  { %1773 = vmatpush1.msra.mxu0 %v4397_v15  ;;  %1844 = vmatpush1.msra.mxu1 %v4400_v42  ;;  %v1959_v15 = vld [vmem:[#allocation12 + $0x78] sm:$0xff] }
 0x66e   :  { %1774 = vmatprep.subr.mxu0 %v5265_v32  ;;  %1845 = vmatprep.subr.mxu1 %v5266_v33  ;;  %v5332_v32 = vld [vmem:[#allocation66_spill] sm:$0xff] }
 0x66f   :  { %1775 = vmatpush1.msra.mxu0 %v4409_v47  ;;  %1846 = vmatpush1.msra.mxu1 %v4412_v48 }
 0x670   :  { %1776 = vmatprep.subr.mxu0 %v4415_v44  ;;  %1847 = vmatprep.subr.mxu1 %v4418_v0  ;;  %v5313_v0 = vld [vmem:[#allocation47_spill] sm:$0xff]  ;;  %v5314_v44 = vld [vmem:[#allocation45_spill] sm:$0xff] }
 0x671   :  { %1777 = vmatpush1.msra.mxu0 %v4421_v43  ;;  %1848 = vmatpush1.msra.mxu1 %v4424_v45  ;;  %v5331_v43 = vld [vmem:[#allocation64_spill] sm:$0xff] }
 0x672   :  { %1778 = vmatprep.subr.mxu0 %v4505_v34  ;;  %1849 = vmatprep.subr.mxu1 %v4508_v36 }
 0x673   :  { %1779 = vmatpush1.msra.mxu0 %v4511_v37  ;;  %1850 = vmatpush1.msra.mxu1 %v4514_v39  ;;  %v5333_v39 = vld [vmem:[#allocation67_spill] sm:$0xff] }
 0x674   :  { %1780 = vmatprep.subr.mxu0 %v4517_v46  ;;  %1851 = vmatprep.subr.mxu1 %v4520_v49  ;;  %v5334_v49 = vld [vmem:[#allocation65_spill] sm:$0xff] }
 0x675   :  { %1781 = vmatpush1.msra.mxu0 %v4523_v50  ;;  %1852 = vmatpush1.msra.mxu1 %v4526_v51 }
 0x676   :  { %1782 = vmatprep.subr.mxu0 %v4529_v52  ;;  %1853 = vmatprep.subr.mxu1 %v4532_v54 }
 0x677   :  { %1783 = vmatpush1.msra.mxu0 %v4535_v55  ;;  %1854 = vmatpush1.msra.mxu1 %v4538_v56 }
 0x678   :  { %1784 = vmatprep.subr.mxu0 %v4541_v57  ;;  %1855 = vmatprep.subr.mxu1 %v4544_v58 }
 0x679   :  { %1785 = vmatpush1.msra.mxu0 %v4547_v59  ;;  %1856 = vmatpush1.msra.mxu1 %v4550_v60 }
 0x67a   :  { %1786 = vmatprep.subr.mxu0 %v4553_v61  ;;  %1857 = vmatprep.subr.mxu1 %v4556_v63 }
 0x67b   :  { %1787 = vmatpush1.msra.mxu0 %v4559_v1  ;;  %1858 = vmatpush1.msra.mxu1 %v5313_v0  ;;  %v1945_v0 = vld [vmem:[#allocation12 + $0x8] sm:$0xff] }
 0x67c   :  { %1788 = vmatprep.subr.mxu0 %v5314_v44  ;;  %1859 = vmatprep.subr.mxu1 %v5315_v4  ;;  %v1944_v44 = vld [vmem:[#allocation12] sm:$0xff]  ;;  %v5336_v4 = vld [vmem:[#allocation24_spill] sm:$0xff] }
 0x67d   :  { %1789 = vmatpush1.msra.mxu0 %v5316_v18  ;;  %1860 = vmatpush1.msra.mxu1 %v5317_v26  ;;  %v5337_v18 = vld [vmem:[#allocation22_spill] sm:$0xff] }
 0x67e   :  { %1790 = vmatprep.subr.mxu0 %v5318_v16  ;;  %1861 = vmatprep.subr.mxu1 %v5319_v13  ;;  %v5338_v26 = vld [vmem:[#allocation46_spill] sm:$0xff]  ;;  %v4787_v13 = vld [vmem:[#allocation10 + $0x78] sm:$0xff] }
 0x67f   :  { %1791 = vmatpush1.msra.mxu0 %v5320_v10  ;;  %1862 = vmatpush1.msra.mxu1 %v5321_v5  ;;  %v5339_v16 = vld [vmem:[#allocation42_spill] sm:$0xff]  ;;  %v4792_v10 = vld [vmem:[#allocation10 + $0x70] sm:$0xff] }
 0x680   :  { %1792 = vmatprep.subr.mxu0 %v5322_v9  ;;  %1863 = vmatprep.subr.mxu1 %v5323_v11  ;;  %v4804_v5 = vld [vmem:[#allocation10 + $0x60] sm:$0xff]  ;;  %v4810_v9 = vld [vmem:[#allocation10 + $0x58] sm:$0xff]  ;;  %v4816_v11 = vld [vmem:[#allocation10 + $0x50] sm:$0xff] }
 0x681   :  { %1793 = vmatpush1.msra.mxu0 %v5324_v7  ;;  %1864 = vmatpush1.msra.mxu1 %v5325_v8  ;;  %v4822_v7 = vld [vmem:[#allocation10 + $0x48] sm:$0xff]  ;;  %v4828_v8 = vld [vmem:[#allocation10 + $0x40] sm:$0xff] }
 0x682   :  { %1794 = vmatprep.subr.mxu0 %v5326_v17  ;;  %1865 = vmatprep.subr.mxu1 %v5327_v12  ;;  %v4834_v17 = vld [vmem:[#allocation10 + $0x38] sm:$0xff]  ;;  %v4838_v12 = vld [vmem:[#allocation10 + $0x30] sm:$0xff] }
 0x683   :  { %1795 = vmatpush1.msra.mxu0 %v5328_v35  ;;  %1828 = vmatprep.mubr.f32.mxu0 %v5329_v6  ;;  %v4842_v35 = vld [vmem:[#allocation10 + $0x28] sm:$0xff] }
 0x684   :  { %1866 = vmatpush1.msra.mxu1 %v5330_v53  ;;  %1899 = vmatprep.mubr.f32.mxu1 %v5329_v6  ;;  %v4849_v53 = vld [vmem:[#allocation10 + $0x20] sm:$0xff] }
 0x685   :  { %3028 = vmatprep.subr.mxu1 %v5329_v6  ;;  %2984 = vmatprep.subr.mxu0 %v1959_v15 }
 0x724   :  { %v1653_v42 = vpop.f32.mrf.mxu0  ;;  %v1724_v34 = vpop.f32.mrf.mxu1 }
 0x725   :  { %v1729_v45 = vadd.f32 %v1653_v42, %v5331_v43  ;;  %v1731_v50 = vadd.f32 %v1724_v34, %v5334_v49  ;;  %v4861_v42 = vld [vmem:[#allocation10 + $0x10] sm:$0xff]  ;;  %v4867_v43 = vld [vmem:[#allocation10 + $0x8] sm:$0xff] }
 0x726   :  { %v1655_v47 = vpop.f32.mrf.mxu0  ;;  %v1726_v37 = vpop.f32.mrf.mxu1 }
 0x727   :  { %v2883_v48 = vmul.f32 -1.442695, %v1729_v45  ;;  %v1730_v33 = vadd.f32 %v1655_v47, %v5332_v32  ;;  %v1732_v46 = vadd.f32 %v1726_v37, %v5333_v39  ;;  %v4873_v45 = vld [vmem:[#allocation10] sm:$0xff] }
 0x729   :  { %3285 = vpow2.f32 %v2883_v48  ;;  %v2884_v36 = vmul.f32 -1.442695, %v1730_v33  ;;  %v2885_v51 = vmul.f32 -1.442695, %v1732_v46  ;;  %v5340_v48 = vld [vmem:[#allocation68_spill] sm:$0xff] }
 0x72b   :  { %3287 = vpow2.f32 %v2884_v36  ;;  %v5341_v36 = vld [vmem:[#allocation70_spill] sm:$0xff] }
 0x72c   :  { %3289 = vtanh.f32 %v1731_v50  ;;  %v5342_v50 = vld [vmem:[#allocation71_spill] sm:$0xff] }
 0x72d   :  { %3291 = vpow2.f32 %v2885_v51 }
 0x736   :  { %v3286_v52 = vpop.eup %3285 }
 0x737   :  { %v1736_v54 = vadd.f32 1.0, %v3286_v52  ;;  %v5343_v52 = vld [vmem:[#allocation69_spill] sm:$0xff] }
 0x738   :  { %v3288_v55 = vpop.eup %3287 }
 0x739   :  { %3293 = vrcp.f32 %v1736_v54  ;;  %v1742_v56 = vadd.f32 1.0, %v3288_v55  ;;  %v3290_v57 = vpop.eup %3289 }
 0x73a   :  { %v3292_v58 = vpop.eup %3291 }
 0x73b   :  { %3295 = vrcp.f32 %v1742_v56  ;;  %v1749_v63 = vadd.f32 1.0, %v3292_v58 }
 0x73d   :  { %3297 = vrcp.f32 %v1749_v63 }
 0x746   :  { %v3294_v59 = vpop.eup %3293 }
 0x747   :  { %v1753_v60 = vmul.f32 %v3294_v59, %v3290_v57 }
 0x748   :  { %v3296_v61 = vpop.eup %3295 }
 0x749   :  { %v1752_v1 = vmul.f32 %v3296_v61, %v4700_v3  ;;  %v1948_v3 = vld [vmem:[#allocation12 + $0x20] sm:$0xff] }
 0x74a   :  { %v3298_v41 = vpop.eup %3297 }
 0x74b   :  { %v4777_v19 = vadd.f32 %v1753_v60, %v1752_v1 }
 0x74d   :  { %3299 = vtanh.f32 %v4777_v19 }
 0x75a   :  { %v3300_v28 = vpop.eup %3299 }
 0x75b   :  { %v1756_v30 = vmul.f32 %v3300_v28, %v3298_v41 }
 0x75d   :  { %1829 = vmatmul.mubr.f32.vlgmr.msra.gmra.mxu0 %v1756_v30  ;;  %1900 = vmatmul.mubr.f32.vlgmr.msra.gmra.mxu1 %v1756_v30 }
 0x75e   :  { %2985 = vmatpush3.msra.mxu0 %v1959_v15  ;;  %3016 = vmatprep.mubr.f32.mxu0 %v5335_v27  ;;  %v4855_v15 = vld [vmem:[#allocation10 + $0x18] sm:$0xff] }
 0x75f   :  { %2986 = vmatprep.subr.mxu0 %v1958_v38  ;;  %3029 = vmatpush3.msra.mxu1 %v4787_v13 }
 0x760   :  { %2987 = vmatpush3.msra.mxu0 %v1958_v38  ;;  %3030 = vmatprep.subr.mxu1 %v5329_v6 }
 0x761   :  { %2988 = vmatprep.subr.mxu0 %v1957_v31  ;;  %3031 = vmatpush3.msra.mxu1 %v4792_v10 }
 0x762   :  { %2989 = vmatpush3.msra.mxu0 %v1957_v31  ;;  %3032 = vmatprep.subr.mxu1 %v5329_v6 }
 0x763   :  { %2990 = vmatprep.subr.mxu0 %v1956_v22  ;;  %3060 = vmatprep.mubr.msk.f32.mxu1 %vm3713_vm1, %v5329_v6 }
 0x764   :  { %2991 = vmatpush3.msra.mxu0 %v1956_v22 }
 0x765   :  { %2992 = vmatprep.subr.mxu0 %v1955_v29 }
 0x766   :  { %2993 = vmatpush3.msra.mxu0 %v1955_v29 }
 0x767   :  { %2994 = vmatprep.subr.mxu0 %v1954_v23 }
 0x768   :  { %2995 = vmatpush3.msra.mxu0 %v1954_v23 }
 0x769   :  { %2996 = vmatprep.subr.mxu0 %v1953_v25 }
 0x76a   :  { %2997 = vmatpush3.msra.mxu0 %v1953_v25 }
 0x76b   :  { %2998 = vmatprep.subr.mxu0 %v1952_v21 }
 0x76c   :  { %2999 = vmatpush3.msra.mxu0 %v1952_v21 }
 0x76d   :  { %3000 = vmatprep.subr.mxu0 %v1951_v24 }
 0x76e   :  { %3001 = vmatpush3.msra.mxu0 %v1951_v24  ;;  %v4926_v24 = vld [vmem:[#allocation15 + $0x3] ss:$0 sm:$0xff] }
 0x76f   :  { %3002 = vmatprep.subr.mxu0 %v1950_v20 }
 0x770   :  { %3003 = vmatpush3.msra.mxu0 %v1950_v20  ;;  %v127_v20 = vld [vmem:[#allocation15 + $0x4] ss:$0 sm:$0xff] }
 0x771   :  { %3004 = vmatprep.subr.mxu0 %v1949_v40 }
 0x772   :  { %3005 = vmatpush3.msra.mxu0 %v1949_v40 }
 0x773   :  { %3006 = vmatprep.subr.mxu0 %v1948_v3 }
 0x774   :  { %3007 = vmatpush3.msra.mxu0 %v1948_v3 }
 0x775   :  { %3008 = vmatprep.subr.mxu0 %v1947_v14 }
 0x776   :  { %3009 = vmatpush3.msra.mxu0 %v1947_v14 }
 0x777   :  { %3010 = vmatprep.subr.mxu0 %v1946_v2 }
 0x778   :  { %3011 = vmatpush3.msra.mxu0 %v1946_v2 }
 0x779   :  { %3012 = vmatprep.subr.mxu0 %v1945_v0 }
 0x77a   :  { %3013 = vmatpush3.msra.mxu0 %v1945_v0 }
 0x77b   :  { %3014 = vmatprep.subr.mxu0 %v1944_v44 }
 0x77c   :  { %3015 = vmatpush3.msra.mxu0 %v1944_v44 }
 0x77d   :  { %3017 = vmatmul.mubr.f32.vlgmr.msra.gmra.mxu0 %v5336_v4  ;;  %3063 = vmatprep.subr.mxu0 %v5329_v6 }
 0x77e   :  { %3019 = vmatprep.mubr.f32.mxu0 %v5337_v18  ;;  %3064 = vmatpush3.msra.mxu0 %v4787_v13 }
 0x77f   :  { %3065 = vmatprep.subr.mxu0 %v5329_v6 }
 0x780   :  { %3066 = vmatpush3.msra.mxu0 %v4792_v10 }
 0x781   :  { %3020 = vmatmul.mubr.f32.gmra.mxu0 %v5338_v26  ;;  %3067 = vmatprep.subr.mxu0 %v5329_v6 }
 0x782   :  { %3022 = vmatprep.mubr.f32.mxu0 %v5339_v16 }
 0x785   :  { %3023 = vmatmul.mubr.f32.gmra.mxu0 %v4703_v62  ;;  %v4798_v62 = vld [vmem:[#allocation10 + $0x68] sm:$0xff] }
 0x786   :  { %3025 = vmatprep.mubr.f32.mxu0 %v1756_v30  ;;  %3033 = vmatpush3.msra.mxu1 %v4798_v62 }
 0x787   :  { %3068 = vmatpush3.msra.mxu0 %v4798_v62  ;;  %3034 = vmatprep.subr.mxu1 %v5329_v6 }
 0x788   :  { %3069 = vmatprep.subr.mxu0 %v5329_v6  ;;  %3035 = vmatpush3.msra.mxu1 %v4804_v5 }
 0x789   :  { %3070 = vmatpush3.msra.mxu0 %v4804_v5  ;;  %3036 = vmatprep.subr.mxu1 %v5329_v6 }
 0x78a   :  { %3071 = vmatprep.subr.mxu0 %v5329_v6  ;;  %3037 = vmatpush3.msra.mxu1 %v4810_v9 }
 0x78b   :  { %3072 = vmatpush3.msra.mxu0 %v4810_v9  ;;  %3038 = vmatprep.subr.mxu1 %v5329_v6 }
 0x78c   :  { %3073 = vmatprep.subr.mxu0 %v5329_v6  ;;  %3039 = vmatpush3.msra.mxu1 %v4816_v11 }
 0x78d   :  { %3074 = vmatpush3.msra.mxu0 %v4816_v11  ;;  %3040 = vmatprep.subr.mxu1 %v5329_v6 }
 0x78e   :  { %3075 = vmatprep.subr.mxu0 %v5329_v6  ;;  %3041 = vmatpush3.msra.mxu1 %v4822_v7 }
 0x78f   :  { %3076 = vmatpush3.msra.mxu0 %v4822_v7  ;;  %3042 = vmatprep.subr.mxu1 %v5329_v6 }
 0x790   :  { %3077 = vmatprep.subr.mxu0 %v5329_v6  ;;  %3043 = vmatpush3.msra.mxu1 %v4828_v8 }
 0x791   :  { %3078 = vmatpush3.msra.mxu0 %v4828_v8  ;;  %3044 = vmatprep.subr.mxu1 %v5329_v6 }
 0x792   :  { %3079 = vmatprep.subr.mxu0 %v5329_v6  ;;  %3045 = vmatpush3.msra.mxu1 %v4834_v17 }
 0x793   :  { %3080 = vmatpush3.msra.mxu0 %v4834_v17  ;;  %3046 = vmatprep.subr.mxu1 %v5329_v6 }
 0x794   :  { %3047 = vmatpush3.msra.mxu1 %v4838_v12  ;;  %3081 = vmatprep.subr.mxu0 %v5329_v6 }
 0x795   :  { %3048 = vmatprep.subr.mxu1 %v5329_v6  ;;  %3082 = vmatpush3.msra.mxu0 %v4838_v12 }
 0x796   :  { %3049 = vmatpush3.msra.mxu1 %v4842_v35  ;;  %3083 = vmatprep.subr.mxu0 %v5329_v6 }
 0x797   :  { %3050 = vmatprep.subr.mxu1 %v5329_v6  ;;  %3084 = vmatpush3.msra.mxu0 %v4842_v35 }
 0x798   :  { %3051 = vmatpush3.msra.mxu1 %v4849_v53  ;;  %3085 = vmatprep.subr.mxu0 %v5329_v6 }
 0x799   :  { %3052 = vmatprep.subr.mxu1 %v5329_v6  ;;  %3086 = vmatpush3.msra.mxu0 %v4849_v53 }
 0x79a   :  { %3053 = vmatpush3.msra.mxu1 %v4855_v15  ;;  %3087 = vmatprep.subr.mxu0 %v5329_v6 }
 0x79b   :  { %3054 = vmatprep.subr.mxu1 %v5329_v6  ;;  %3088 = vmatpush3.msra.mxu0 %v4855_v15 }
 0x79c   :  { %3055 = vmatpush3.msra.mxu1 %v4861_v42  ;;  %3089 = vmatprep.subr.mxu0 %v5329_v6 }
 0x79d   :  { %3056 = vmatprep.subr.mxu1 %v5329_v6  ;;  %3090 = vmatpush3.msra.mxu0 %v4861_v42 }
 0x79e   :  { %3057 = vmatpush3.msra.mxu1 %v4867_v43  ;;  %3091 = vmatprep.subr.mxu0 %v5329_v6 }
 0x79f   :  { %3058 = vmatprep.subr.mxu1 %v5329_v6  ;;  %3092 = vmatpush3.msra.mxu0 %v4867_v43 }
 0x7a0   :  { %3059 = vmatpush3.msra.mxu1 %v4873_v45  ;;  %3093 = vmatprep.subr.mxu0 %v5329_v6 }
 0x7a1   :  { %3094 = vmatpush3.msra.mxu0 %v4873_v45  ;;  %3098 = vmatprep.subr.mxu1 %v5329_v6 }
 0x7a2   :  { %3133 = vmatprep.subr.mxu0 %v5329_v6 }
 0x81d   :  { %v1830_v47 = vpop.f32.mrf.mxu0  ;;  %v1901_v39 = vpop.f32.mrf.mxu1 }
 0x81e   :  { %v1906_v32 = vadd.f32 %v1830_v47, %v5340_v48  ;;  %v1908_v54 = vadd.f32 %v1901_v39, %v5343_v52 }
 0x81f   :  { %v1832_v33 = vpop.f32.mrf.mxu0  ;;  %v1903_v49 = vpop.f32.mrf.mxu1 }
 0x820   :  { %v2886_v34 = vmul.f32 -1.442695, %v1906_v32  ;;  %v1907_v37 = vadd.f32 %v1832_v33, %v5341_v36  ;;  %v1909_v51 = vadd.f32 %v1903_v49, %v5342_v50 }
 0x822   :  { %3301 = vpow2.f32 %v2886_v34  ;;  %v2887_v46 = vmul.f32 -1.442695, %v1907_v37  ;;  %v2888_v55 = vmul.f32 -1.442695, %v1909_v51 }
 0x824   :  { %3303 = vpow2.f32 %v2887_v46 }
 0x825   :  { %3305 = vtanh.f32 %v1908_v54 }
 0x826   :  { %3307 = vpow2.f32 %v2888_v55 }
 0x82f   :  { %v3302_v56 = vpop.eup %3301 }
 0x830   :  { %v1913_v57 = vadd.f32 1.0, %v3302_v56 }
 0x831   :  { %v3304_v58 = vpop.eup %3303 }
 0x832   :  { %3309 = vrcp.f32 %v1913_v57  ;;  %v1919_v59 = vadd.f32 1.0, %v3304_v58  ;;  %v3306_v60 = vpop.eup %3305 }
 0x833   :  { %v3308_v61 = vpop.eup %3307 }
 0x834   :  { %3311 = vrcp.f32 %v1919_v59  ;;  %v1926_v28 = vadd.f32 1.0, %v3308_v61 }
 0x836   :  { %3313 = vrcp.f32 %v1926_v28 }
 0x83f   :  { %v3310_v63 = vpop.eup %3309 }
 0x840   :  { %v1930_v1 = vmul.f32 %v3310_v63, %v3306_v60 }
 0x841   :  { %v3312_v41 = vpop.eup %3311 }
 0x842   :  { %v1929_v30 = vmul.f32 %v3312_v41, %v4777_v19  ;;  %v3018_v19 = vpop.f32.mrf.mxu0 }
 0x843   :  { %v3314_v27 = vpop.eup %3313  ;;  %v4935_v18 = vadd.f32 %v3018_v19, %v127_v20 }
 0x844   :  { %v1931_v38 = vadd.f32 %v1930_v1, %v1929_v30  ;;  %v2026_v29 = vpop.f32.mrf.mxu0 }
 0x845   :  { %v4928_v14 = vadd.f32 %v2026_v29, %v127_v20 }
 0x846   :  { %3315 = vtanh.f32 %v1931_v38  ;;  %v3021_v23 = vpop.f32.mrf.mxu0 }
 0x847   :  { %v4930_v2 = vadd.f32 %v3021_v23, %v127_v20 }
 0x848   :  { %v2036_v25 = vpop.f32.mrf.mxu0 }
 0x849   :  { %v4932_v0 = vadd.f32 %v2036_v25, %v127_v20 }
 0x84a   :  { %v3024_v21 = vpop.f32.mrf.mxu0 }
 0x84c   :  { %v2046_v40 = vpop.f32.mrf.mxu0 }
 0x853   :  { %v3316_v31 = vpop.eup %3315 }
 0x854   :  { %v1933_v22 = vmul.f32 %v3316_v31, %v3314_v27 }
 0x856   :  { %3026 = vmatmul.mubr.f32.gmra.mxu0 %v1933_v22  ;;  %3061 = vmatmul.mubr.f32.vlgmr.msra.gmra.mxu1 %v1933_v22 }
 0x857   :  { %3095 = vmatprep.mubr.msk.f32.mxu0 %vm3713_vm1, %v5329_v6  ;;  %3099 = vmatpush3.msra.mxu1 %v4787_v13 }
 0x858   :  { %3100 = vmatprep.subr.mxu1 %v5329_v6  ;;  %3130 = vmatprep.mubr.msk.f32.mxu1 %vm3713_vm1, %v5329_v6 }
 0x859   :  { %3101 = vmatpush3.msra.mxu1 %v4792_v10 }
 0x85a   :  { %3102 = vmatprep.subr.mxu1 %v5329_v6 }
 0x85b   :  { %3103 = vmatpush3.msra.mxu1 %v4798_v62 }
 0x85c   :  { %3104 = vmatprep.subr.mxu1 %v5329_v6 }
 0x85d   :  { %3105 = vmatpush3.msra.mxu1 %v4804_v5  ;;  %v4941_v5 = vadd.f32 %v3024_v21, %v127_v20 }
 0x85e   :  { %3106 = vmatprep.subr.mxu1 %v5329_v6 }
 0x85f   :  { %3107 = vmatpush3.msra.mxu1 %v4810_v9 }
 0x860   :  { %3108 = vmatprep.subr.mxu1 %v5329_v6 }
 0x861   :  { %3109 = vmatpush3.msra.mxu1 %v4816_v11  ;;  %v4943_v11 = vadd.f32 %v2046_v40, %v127_v20 }
 0x862   :  { %3110 = vmatprep.subr.mxu1 %v5329_v6 }
 0x863   :  { %3111 = vmatpush3.msra.mxu1 %v4822_v7 }
 0x864   :  { %3112 = vmatprep.subr.mxu1 %v5329_v6 }
 0x865   :  { %3113 = vmatpush3.msra.mxu1 %v4828_v8 }
 0x866   :  { %3114 = vmatprep.subr.mxu1 %v5329_v6 }
 0x867   :  { %3115 = vmatpush3.msra.mxu1 %v4834_v17 }
 0x868   :  { %3116 = vmatprep.subr.mxu1 %v5329_v6 }
 0x869   :  { %3117 = vmatpush3.msra.mxu1 %v4838_v12 }
 0x86a   :  { %3118 = vmatprep.subr.mxu1 %v5329_v6 }
 0x86b   :  { %3119 = vmatpush3.msra.mxu1 %v4842_v35 }
 0x86c   :  { %3120 = vmatprep.subr.mxu1 %v5329_v6 }
 0x86d   :  { %3121 = vmatpush3.msra.mxu1 %v4849_v53 }
 0x86e   :  { %3122 = vmatprep.subr.mxu1 %v5329_v6 }
 0x86f   :  { %3123 = vmatpush3.msra.mxu1 %v4855_v15  ;;  %v4956_v15 = vld [vmem:[%s5055_s6] ss:$0 sm:$0xff] }
 0x870   :  { %3124 = vmatprep.subr.mxu1 %v5329_v6 }
 0x871   :  { %3125 = vmatpush3.msra.mxu1 %v4861_v42 }
 0x872   :  { %3126 = vmatprep.subr.mxu1 %v5329_v6 }
 0x873   :  { %3127 = vmatpush3.msra.mxu1 %v4867_v43 }
 0x874   :  { %3128 = vmatprep.subr.mxu1 %v5329_v6 }
 0x875   :  { %3129 = vmatpush3.msra.mxu1 %v4873_v45 }
 0x876   :  { %3168 = vmatprep.subr.mxu1 %v5329_v6 }
 0x916   :  { %v2156_v3 = vpop.f32.mrf.mxu1  ;;  %v3027_v44 = vpop.f32.mrf.mxu0 }
 0x917   :  { %v2157_v4 = vadd.f32 %v2156_v3, %v4926_v24  ;;  %v4945_v7 = vadd.f32 %v3027_v44, %v127_v20 }
 0x918   :  { %v3062_v26 = vpop.f32.mrf.mxu1  ;;  %v2056_v9 = vpop.f32.mrf.mxu0 }
 0x919   :  { %v2170_v16 = vadd.f32 %v2157_v4, %v4932_v0  ;;  %v2168_v13 = vadd.f32 %v2157_v4, %v4928_v14  ;;  %v2171_v10 = vadd.f32 %v2157_v4, %v4930_v2  ;;  %v2169_v62 = vadd.f32 %v2157_v4, %v4935_v18 }
 0x91a   :  { %v2173_v8 = vadd.f32 %v2157_v4, %v4941_v5  ;;  %v4948_v17 = vadd.f32 %v2056_v9, %v127_v20  ;;  %v2172_v12 = vadd.f32 %v2157_v4, %v4943_v11  ;;  %v2175_v35 = vadd.f32 %v2157_v4, %v4945_v7 }
 0x91b   :  { %3317 = vtanh.f32 %v2170_v16 }
 0x91c   :  { %3319 = vtanh.f32 %v2168_v13  ;;  %v2174_v53 = vadd.f32 %v2157_v4, %v4948_v17 }
 0x91d   :  { %3321 = vtanh.f32 %v2171_v10 }
 0x91e   :  { %3323 = vtanh.f32 %v2169_v62 }
 0x91f   :  { %3325 = vtanh.f32 %v2173_v8 }
 0x920   :  { %3327 = vtanh.f32 %v2172_v12 }
 0x921   :  { %3329 = vtanh.f32 %v2175_v35 }
 0x922   :  { %3331 = vtanh.f32 %v2174_v53 }
 0x928   :  { %v3318_v42 = vpop.eup %3317 }
 0x929   :  { %v3320_v43 = vpop.eup %3319  ;;  %v2190_v45 = vmul.f32 %v3318_v42, %v4956_v15 }
 0x92a   :  { %v3322_v47 = vpop.eup %3321  ;;  %v2188_v48 = vmul.f32 %v3320_v43, %v4956_v15 }
 0x92b   :  { %v3324_v32 = vpop.eup %3323  ;;  %2200 = vadd.xlane.f32.xlu1 %v2190_v45  ;;  %v2191_v33 = vmul.f32 %v3322_v47, %v4956_v15 }
 0x92c   :  { %2196 = vadd.xlane.f32.xlu0 %v2188_v48  ;;  %v3326_v34 = vpop.eup %3325  ;;  %v2189_v36 = vmul.f32 %v3324_v32, %v4956_v15 }
 0x92d   :  { %v3328_v37 = vpop.eup %3327  ;;  %v2193_v39 = vmul.f32 %v3326_v34, %v4956_v15 }
 0x92e   :  { %v3330_v46 = vpop.eup %3329  ;;  %v2192_v49 = vmul.f32 %v3328_v37, %v4956_v15 }
 0x92f   :  { %2202 = vadd.xlane.f32.xlu1 %v2191_v33  ;;  %v3332_v50 = vpop.eup %3331  ;;  %v2195_v51 = vmul.f32 %v3330_v46, %v4956_v15 }
 0x930   :  { %2198 = vadd.xlane.f32.xlu0 %v2189_v36  ;;  %v2194_v52 = vmul.f32 %v3332_v50, %v4956_v15 }
 0x933   :  { %2206 = vadd.xlane.f32.xlu1 %v2193_v39 }
 0x934   :  { %2204 = vadd.xlane.f32.xlu0 %v2192_v49 }
 0x937   :  { %2210 = vadd.xlane.f32.xlu1 %v2195_v51 }
 0x938   :  { %2208 = vadd.xlane.f32.xlu0 %v2194_v52 }
 0x9b4   :  { %v2201_v54 = vpop.xlane.xlu1 %2200 }
 0x9b5   :  { %v2197_v55 = vpop.xlane.xlu0 %2196 }
 0x9b6   :  { %3333 = vtanh.f32 %v2197_v55 }
 0x9b8   :  { %v2203_v56 = vpop.xlane.xlu1 %2202 }
 0x9b9   :  { %v2199_v57 = vpop.xlane.xlu0 %2198 }
 0x9ba   :  { %3335 = vtanh.f32 %v2199_v57 }
 0x9bc   :  { %v2207_v58 = vpop.xlane.xlu1 %2206 }
 0x9bd   :  { %3337 = vtanh.f32 %v2207_v58  ;;  %v2205_v59 = vpop.xlane.xlu0 %2204 }
 0x9be   :  { %3339 = vtanh.f32 %v2205_v59 }
 0x9bf   :  { %3341 = vtanh.f32 %v2203_v56 }
 0x9c0   :  { %3343 = vtanh.f32 %v2201_v54  ;;  %v2211_v60 = vpop.xlane.xlu1 %2210 }
 0x9c1   :  { %3345 = vtanh.f32 %v2211_v60  ;;  %v2209_v61 = vpop.xlane.xlu0 %2208 }
 0x9c2   :  { %3347 = vtanh.f32 %v2209_v61 }
 0x9c3   :  { %v3334_v63 = vpop.eup %3333 }
 0x9c4   :  { %v2220_v19 = vmul.f32 10.0, %v3334_v63 }
 0x9c7   :  { %v3336_v1 = vpop.eup %3335 }
 0x9c8   :  { %v2221_v29 = vmul.f32 10.0, %v3336_v1 }
 0x9ca   :  { %v3338_v41 = vpop.eup %3337 }
 0x9cb   :  { %v3340_v28 = vpop.eup %3339  ;;  %v2225_v38 = vmul.f32 10.0, %v3338_v41 }
 0x9cc   :  { %v3342_v30 = vpop.eup %3341  ;;  %v2224_v27 = vmul.f32 10.0, %v3340_v28 }
 0x9cd   :  { %v3344_v31 = vpop.eup %3343  ;;  %v2223_v25 = vmul.f32 10.0, %v3342_v30  ;;  %v2229_v40 = vmax.f32 %v2221_v29, %v2225_v38 }
 0x9ce   :  { %v3346_v22 = vpop.eup %3345  ;;  %v2222_v20 = vmul.f32 10.0, %v3344_v31  ;;  %v2228_v3 = vmax.f32 %v2220_v19, %v2224_v27 }
 0x9cf   :  { %v3348_v23 = vpop.eup %3347  ;;  %v2227_v21 = vmul.f32 10.0, %v3346_v22 }
 0x9d0   :  { %v2226_v44 = vmul.f32 10.0, %v3348_v23  ;;  %v2232_v16 = vmax.f32 %v2228_v3, %v2229_v40 }
 0x9d1   :  { %v2231_v4 = vmax.f32 %v2223_v25, %v2227_v21 }
 0x9d2   :  { %v2230_v26 = vmax.f32 %v2222_v20, %v2226_v44 }
 0x9d4   :  { %v2233_v13 = vmax.f32 %v2230_v26, %v2231_v4 }
 0x9d6   :  { %v2234_v10 = vmax.f32 %v2232_v16, %v2233_v13 }
 0x9d8   :  { %v2235_v62 = vsub.f32 %v2220_v19, %v2234_v10  ;;  %v2236_v9 = vsub.f32 %v2221_v29, %v2234_v10  ;;  %v2237_v8 = vsub.f32 %v2222_v20, %v2234_v10  ;;  %v2238_v12 = vsub.f32 %v2223_v25, %v2234_v10 }
 0x9d9   :  { %v2239_v42 = vsub.f32 %v2224_v27, %v2234_v10  ;;  %v2240_v45 = vsub.f32 %v2225_v38, %v2234_v10  ;;  %v2241_v48 = vsub.f32 %v2226_v44, %v2234_v10  ;;  %v2242_v33 = vsub.f32 %v2227_v21, %v2234_v10 }
 0x9da   :  { %v2243_v35 = vmul.f32 1.442695, %v2235_v62  ;;  %v2245_v53 = vmul.f32 1.442695, %v2236_v9  ;;  %v2247_v43 = vmul.f32 1.442695, %v2237_v8 }
 0x9db   :  { %v2249_v47 = vmul.f32 1.442695, %v2238_v12  ;;  %v2251_v32 = vmul.f32 1.442695, %v2239_v42  ;;  %v2253_v34 = vmul.f32 1.442695, %v2240_v45 }
 0x9dc   :  { %3349 = vpow2.f32 %v2243_v35  ;;  %v2255_v36 = vmul.f32 1.442695, %v2241_v48  ;;  %v2257_v37 = vmul.f32 1.442695, %v2242_v33 }
 0x9dd   :  { %3351 = vpow2.f32 %v2245_v53 }
 0x9de   :  { %3353 = vpow2.f32 %v2247_v43 }
 0x9df   :  { %3355 = vpow2.f32 %v2249_v47 }
 0x9e0   :  { %3357 = vpow2.f32 %v2251_v32 }
 0x9e1   :  { %3359 = vpow2.f32 %v2253_v34 }
 0x9e2   :  { %3361 = vpow2.f32 %v2255_v36 }
 0x9e3   :  { %3363 = vpow2.f32 %v2257_v37 }
 0x9e9   :  { %v3350_v39 = vpop.eup %3349 }
 0x9ea   :  { %v3352_v46 = vpop.eup %3351 }
 0x9eb   :  { %v2259_v49 = vadd.f32 %v3352_v46, %v3350_v39  ;;  %v3354_v50 = vpop.eup %3353 }
 0x9ec   :  { %v3356_v52 = vpop.eup %3355 }
 0x9ed   :  { %v2260_v51 = vadd.f32 %v3354_v50, %v2259_v49  ;;  %v3358_v55 = vpop.eup %3357 }
 0x9ee   :  { %v3360_v57 = vpop.eup %3359 }
 0x9ef   :  { %v2261_v54 = vadd.f32 %v3356_v52, %v2260_v51  ;;  %v3362_v59 = vpop.eup %3361 }
 0x9f0   :  { %v3364_v61 = vpop.eup %3363 }
 0x9f1   :  { %v2262_v56 = vadd.f32 %v3358_v55, %v2261_v54 }
 0x9f3   :  { %v2263_v58 = vadd.f32 %v3360_v57, %v2262_v56 }
 0x9f5   :  { %v2264_v60 = vadd.f32 %v3362_v59, %v2263_v58 }
 0x9f7   :  { %v2265_v63 = vadd.f32 %v3364_v61, %v2264_v60 }
 0x9f9   :  { %3365 = vrcp.f32 %v2265_v63 }
 0xa06   :  { %v3366_v1 = vpop.eup %3365 }
 0xa07   :  { %v2267_v41 = vmul.f32 %v3366_v1, %v3350_v39  ;;  %v2268_v28 = vmul.f32 %v3366_v1, %v3352_v46  ;;  %v2269_v30 = vmul.f32 %v3366_v1, %v3354_v50  ;;  %v2270_v38 = vmul.f32 %v3366_v1, %v3356_v52 }
 0xa08   :  { %v2271_v22 = vmul.f32 %v3366_v1, %v3358_v55  ;;  %v2272_v23 = vmul.f32 %v3366_v1, %v3360_v57  ;;  %v2273_v20 = vmul.f32 %v3366_v1, %v3362_v59  ;;  %v2274_v44 = vmul.f32 %v3366_v1, %v3364_v61 }
 0xa09   :  { %v2275_v27 = vmul.f32 %v2267_v41, %v4928_v14  ;;  %v2276_v31 = vmul.f32 %v2268_v28, %v4935_v18  ;;  %v2277_v19 = vmul.f32 %v2269_v30, %v4932_v0  ;;  %v2278_v25 = vmul.f32 %v2270_v38, %v4930_v2 }
 0xa0a   :  { %v2279_v40 = vmul.f32 %v2271_v22, %v4943_v11  ;;  %v2280_v4 = vmul.f32 %v2272_v23, %v4941_v5  ;;  %v2281_v16 = vmul.f32 %v2273_v20, %v4948_v17  ;;  %v2282_v10 = vmul.f32 %v2274_v44, %v4945_v7 }
 0xa0b   :  { %v2283_v29 = vadd.f32 %v2276_v31, %v2275_v27 }
 0xa0d   :  { %v2284_v21 = vadd.f32 %v2283_v29, %v2277_v19 }
 0xa0f   :  { %v2285_v3 = vadd.f32 %v2284_v21, %v2278_v25 }
 0xa11   :  { %v2286_v26 = vadd.f32 %v2285_v3, %v2279_v40 }
 0xa13   :  { %v2287_v13 = vadd.f32 %v2286_v26, %v2280_v4 }
 0xa15   :  { %v2288_v62 = vadd.f32 %v2287_v13, %v2281_v16 }
 0xa17   :  { %v2289_v9 = vadd.f32 %v2288_v62, %v2282_v10 }
 0xa19   :  { %3096 = vmatmul.mubr.f32.vlgmr.msra.gmra.mxu0 %v2289_v9 }
 0xa1a   :  { %3165 = vmatprep.mubr.msk.f32.mxu0 %vm3713_vm1, %v5329_v6 }
 0xad9   :  { %v2356_v8 = vpop.f32.mrf.mxu0 }
 0xada   :  { %v2357_v12 = vadd.f32 %v2356_v8, %v4926_v24 }
 0xadb   :  { %v3097_v35 = vpop.f32.mrf.mxu0 }
 0xadc   :  { %v2361_v53 = vadd.f32 %v2357_v12, %v4935_v18  ;;  %v2360_v42 = vadd.f32 %v2357_v12, %v4928_v14  ;;  %v2363_v43 = vadd.f32 %v2357_v12, %v4930_v2  ;;  %v2362_v45 = vadd.f32 %v2357_v12, %v4932_v0 }
 0xadd   :  { %v2365_v47 = vadd.f32 %v2357_v12, %v4941_v5  ;;  %v2364_v48 = vadd.f32 %v2357_v12, %v4943_v11  ;;  %v2367_v32 = vadd.f32 %v2357_v12, %v4945_v7  ;;  %v2366_v33 = vadd.f32 %v2357_v12, %v4948_v17 }
 0xade   :  { %3367 = vtanh.f32 %v2361_v53 }
 0xadf   :  { %3369 = vtanh.f32 %v2360_v42 }
 0xae0   :  { %3371 = vtanh.f32 %v2363_v43 }
 0xae1   :  { %3373 = vtanh.f32 %v2362_v45 }
 0xae2   :  { %3375 = vtanh.f32 %v2365_v47 }
 0xae3   :  { %3377 = vtanh.f32 %v2364_v48 }
 0xae4   :  { %3379 = vtanh.f32 %v2367_v32 }
 0xae5   :  { %3381 = vtanh.f32 %v2366_v33 }
 0xaeb   :  { %v3368_v34 = vpop.eup %3367 }
 0xaec   :  { %v3370_v36 = vpop.eup %3369  ;;  %v2377_v37 = vmul.f32 %v3368_v34, %v4956_v15 }
 0xaed   :  { %v3372_v39 = vpop.eup %3371  ;;  %v2376_v46 = vmul.f32 %v3370_v36, %v4956_v15 }
 0xaee   :  { %v3374_v49 = vpop.eup %3373  ;;  %2386 = vadd.xlane.f32.xlu1 %v2377_v37  ;;  %v2379_v50 = vmul.f32 %v3372_v39, %v4956_v15 }
 0xaef   :  { %2384 = vadd.xlane.f32.xlu0 %v2376_v46  ;;  %v3376_v51 = vpop.eup %3375  ;;  %v2378_v52 = vmul.f32 %v3374_v49, %v4956_v15 }
 0xaf0   :  { %v3378_v54 = vpop.eup %3377  ;;  %v2381_v55 = vmul.f32 %v3376_v51, %v4956_v15 }
 0xaf1   :  { %v3380_v56 = vpop.eup %3379  ;;  %v2380_v57 = vmul.f32 %v3378_v54, %v4956_v15 }
 0xaf2   :  { %2390 = vadd.xlane.f32.xlu1 %v2379_v50  ;;  %v3382_v58 = vpop.eup %3381  ;;  %v2383_v59 = vmul.f32 %v3380_v56, %v4956_v15 }
 0xaf3   :  { %2388 = vadd.xlane.f32.xlu0 %v2378_v52  ;;  %v2382_v60 = vmul.f32 %v3382_v58, %v4956_v15 }
 0xaf6   :  { %2394 = vadd.xlane.f32.xlu1 %v2381_v55 }
 0xaf7   :  { %2392 = vadd.xlane.f32.xlu0 %v2380_v57 }
 0xafa   :  { %2398 = vadd.xlane.f32.xlu1 %v2383_v59 }
 0xafb   :  { %2396 = vadd.xlane.f32.xlu0 %v2382_v60 }
 0xb77   :  { %v2387_v61 = vpop.xlane.xlu1 %2386 }
 0xb78   :  { %v2385_v63 = vpop.xlane.xlu0 %2384  ;;  %3383 = vtanh.f32 %v2387_v61 }
 0xb79   :  { %3385 = vtanh.f32 %v2385_v63 }
 0xb7b   :  { %v2391_v1 = vpop.xlane.xlu1 %2390 }
 0xb7c   :  { %v2389_v41 = vpop.xlane.xlu0 %2388 }
 0xb7f   :  { %v2395_v28 = vpop.xlane.xlu1 %2394 }
 0xb80   :  { %3387 = vtanh.f32 %v2395_v28  ;;  %v2393_v30 = vpop.xlane.xlu0 %2392 }
 0xb81   :  { %3389 = vtanh.f32 %v2393_v30 }
 0xb82   :  { %3391 = vtanh.f32 %v2391_v1 }
 0xb83   :  { %3393 = vtanh.f32 %v2389_v41  ;;  %v2399_v38 = vpop.xlane.xlu1 %2398 }
 0xb84   :  { %3395 = vtanh.f32 %v2399_v38  ;;  %v2397_v27 = vpop.xlane.xlu0 %2396 }
 0xb85   :  { %3397 = vtanh.f32 %v2397_v27  ;;  %v3384_v31 = vpop.eup %3383 }
 0xb86   :  { %v3386_v22 = vpop.eup %3385  ;;  %v2409_v3 = vmul.f32 10.0, %v3384_v31 }
 0xb87   :  { %v2408_v44 = vmul.f32 10.0, %v3386_v22 }
 0xb8d   :  { %v3388_v19 = vpop.eup %3387 }
 0xb8e   :  { %v3390_v29 = vpop.eup %3389  ;;  %v2413_v25 = vmul.f32 10.0, %v3388_v19 }
 0xb8f   :  { %v3392_v23 = vpop.eup %3391  ;;  %v2412_v21 = vmul.f32 10.0, %v3390_v29 }
 0xb90   :  { %v3394_v20 = vpop.eup %3393  ;;  %v2411_v26 = vmul.f32 10.0, %v3392_v23  ;;  %v2417_v10 = vmax.f32 %v2409_v3, %v2413_v25 }
 0xb91   :  { %v3396_v40 = vpop.eup %3395  ;;  %v2410_v13 = vmul.f32 10.0, %v3394_v20  ;;  %v2416_v62 = vmax.f32 %v2408_v44, %v2412_v21 }
 0xb92   :  { %v3398_v4 = vpop.eup %3397  ;;  %v2415_v16 = vmul.f32 10.0, %v3396_v40 }
 0xb93   :  { %v2414_v9 = vmul.f32 10.0, %v3398_v4  ;;  %v2420_v35 = vmax.f32 %v2416_v62, %v2417_v10 }
 0xb94   :  { %v2419_v8 = vmax.f32 %v2411_v26, %v2415_v16 }
 0xb95   :  { %v2418_v12 = vmax.f32 %v2410_v13, %v2414_v9 }
 0xb97   :  { %v2421_v53 = vmax.f32 %v2418_v12, %v2419_v8 }
 0xb99   :  { %v2422_v42 = vmax.f32 %v2420_v35, %v2421_v53 }
 0xb9b   :  { %v2423_v43 = vsub.f32 %v2408_v44, %v2422_v42  ;;  %v2424_v45 = vsub.f32 %v2409_v3, %v2422_v42  ;;  %v2425_v47 = vsub.f32 %v2410_v13, %v2422_v42  ;;  %v2426_v48 = vsub.f32 %v2411_v26, %v2422_v42 }
 0xb9c   :  { %v2427_v34 = vsub.f32 %v2412_v21, %v2422_v42  ;;  %v2428_v37 = vsub.f32 %v2413_v25, %v2422_v42  ;;  %v2429_v46 = vsub.f32 %v2414_v9, %v2422_v42  ;;  %v2430_v50 = vsub.f32 %v2415_v16, %v2422_v42 }
 0xb9d   :  { %v2431_v32 = vmul.f32 1.442695, %v2423_v43  ;;  %v2433_v33 = vmul.f32 1.442695, %v2424_v45  ;;  %v2435_v36 = vmul.f32 1.442695, %v2425_v47 }
 0xb9e   :  { %v2437_v39 = vmul.f32 1.442695, %v2426_v48  ;;  %v2439_v49 = vmul.f32 1.442695, %v2427_v34  ;;  %v2441_v51 = vmul.f32 1.442695, %v2428_v37 }
 0xb9f   :  { %3399 = vpow2.f32 %v2431_v32  ;;  %v2443_v52 = vmul.f32 1.442695, %v2429_v46  ;;  %v2445_v54 = vmul.f32 1.442695, %v2430_v50 }
 0xba0   :  { %3401 = vpow2.f32 %v2433_v33 }
 0xba1   :  { %3403 = vpow2.f32 %v2435_v36 }
 0xba2   :  { %3405 = vpow2.f32 %v2437_v39 }
 0xba3   :  { %3407 = vpow2.f32 %v2439_v49 }
 0xba4   :  { %3409 = vpow2.f32 %v2441_v51 }
 0xba5   :  { %3411 = vpow2.f32 %v2443_v52 }
 0xba6   :  { %3413 = vpow2.f32 %v2445_v54 }
 0xbac   :  { %v3400_v55 = vpop.eup %3399 }
 0xbad   :  { %v3402_v56 = vpop.eup %3401 }
 0xbae   :  { %v2447_v57 = vadd.f32 %v3402_v56, %v3400_v55  ;;  %v3404_v58 = vpop.eup %3403 }
 0xbaf   :  { %v3406_v60 = vpop.eup %3405 }
 0xbb0   :  { %v2448_v59 = vadd.f32 %v3404_v58, %v2447_v57  ;;  %v3408_v63 = vpop.eup %3407 }
 0xbb1   :  { %v3410_v41 = vpop.eup %3409 }
 0xbb2   :  { %v2449_v61 = vadd.f32 %v3406_v60, %v2448_v59  ;;  %v3412_v30 = vpop.eup %3411 }
 0xbb3   :  { %v3414_v27 = vpop.eup %3413 }
 0xbb4   :  { %v2450_v1 = vadd.f32 %v3408_v63, %v2449_v61 }
 0xbb6   :  { %v2451_v28 = vadd.f32 %v3410_v41, %v2450_v1 }
 0xbb8   :  { %v2452_v38 = vadd.f32 %v3412_v30, %v2451_v28 }
 0xbba   :  { %v2453_v31 = vadd.f32 %v3414_v27, %v2452_v38  ;;  %v2681_v38 = vld [vmem:[#allocation13 + $0x78] sm:$0xff] }
 0xbbb   :  { %3134 = vmatpush3.msra.mxu0 %v2681_v38 }
 0xbbc   :  { %3415 = vrcp.f32 %v2453_v31  ;;  %3135 = vmatprep.subr.mxu0 %v5329_v6  ;;  %v2679_v31 = vld [vmem:[#allocation13 + $0x68] sm:$0xff] }
 0xbc9   :  { %v3416_v22 = vpop.eup %3415 }
 0xbca   :  { %v2455_v19 = vmul.f32 %v3416_v22, %v3400_v55  ;;  %v2456_v29 = vmul.f32 %v3416_v22, %v3402_v56  ;;  %v2457_v23 = vmul.f32 %v3416_v22, %v3404_v58  ;;  %v2458_v25 = vmul.f32 %v3416_v22, %v3406_v60 }
 0xbcb   :  { %v2459_v40 = vmul.f32 %v3416_v22, %v3408_v63  ;;  %v2460_v4 = vmul.f32 %v3416_v22, %v3410_v41  ;;  %v2461_v13 = vmul.f32 %v3416_v22, %v3412_v30  ;;  %v2462_v9 = vmul.f32 %v3416_v22, %v3414_v27  ;;  %v2680_v27 = vld [vmem:[#allocation13 + $0x70] sm:$0xff]  ;;  %v2678_v22 = vld [vmem:[#allocation13 + $0x60] sm:$0xff] }
 0xbcc   :  { %v2463_v21 = vmul.f32 %v2455_v19, %v4928_v14  ;;  %v2464_v20 = vmul.f32 %v2456_v29, %v4935_v18  ;;  %v2465_v3 = vmul.f32 %v2457_v23, %v4932_v0  ;;  %v2466_v26 = vmul.f32 %v2458_v25, %v4930_v2  ;;  %3136 = vmatpush3.msra.mxu0 %v2680_v27  ;;  %v2677_v19 = vld [vmem:[#allocation13 + $0x58] sm:$0xff]  ;;  %v2675_v29 = vld [vmem:[#allocation13 + $0x48] sm:$0xff]  ;;  %v2674_v23 = vld [vmem:[#allocation13 + $0x40] sm:$0xff] }
 0xbcd   :  { %v2467_v10 = vmul.f32 %v2459_v40, %v4943_v11  ;;  %v2468_v8 = vmul.f32 %v2460_v4, %v4941_v5  ;;  %v2469_v35 = vmul.f32 %v2461_v13, %v4948_v17  ;;  %v2470_v42 = vmul.f32 %v2462_v9, %v4945_v7  ;;  %3137 = vmatprep.subr.mxu0 %v5329_v6  ;;  %v2673_v25 = vld [vmem:[#allocation13 + $0x38] sm:$0xff]  ;;  %v2670_v40 = vld [vmem:[#allocation13 + $0x20] sm:$0xff]  ;;  %v2667_v4 = vld [vmem:[#allocation13 + $0x8] sm:$0xff] }
 0xbce   :  { %v2471_v44 = vadd.f32 %v2464_v20, %v2463_v21  ;;  %3138 = vmatpush3.msra.mxu0 %v2679_v31  ;;  %v2672_v21 = vld [vmem:[#allocation13 + $0x30] sm:$0xff]  ;;  %v2671_v20 = vld [vmem:[#allocation13 + $0x28] sm:$0xff] }
 0xbcf   :  { %3139 = vmatprep.subr.mxu0 %v5329_v6 }
 0xbd0   :  { %v2472_v16 = vadd.f32 %v2471_v44, %v2465_v3  ;;  %3140 = vmatpush3.msra.mxu0 %v2678_v22  ;;  %v2669_v3 = vld [vmem:[#allocation13 + $0x18] sm:$0xff]  ;;  %v2668_v44 = vld [vmem:[#allocation13 + $0x10] sm:$0xff] }
 0xbd1   :  { %3141 = vmatprep.subr.mxu0 %v5329_v6 }
 0xbd2   :  { %v2473_v62 = vadd.f32 %v2472_v16, %v2466_v26  ;;  %3142 = vmatpush3.msra.mxu0 %v2677_v19  ;;  %v2666_v26 = vld [vmem:[#allocation13] sm:$0xff] }
 0xbd3   :  { %3143 = vmatprep.subr.mxu0 %v5329_v6 }
 0xbd4   :  { %v2474_v12 = vadd.f32 %v2473_v62, %v2467_v10 }
 0xbd6   :  { %v2475_v53 = vadd.f32 %v2474_v12, %v2468_v8 }
 0xbd8   :  { %v2476_v43 = vadd.f32 %v2475_v53, %v2469_v35 }
 0xbda   :  { %v2477_v45 = vadd.f32 %v2476_v43, %v2470_v42 }
 0xbdc   :  { %3131 = vmatmul.mubr.f32.vlgmr.msra.gmra.mxu1 %v2477_v45 }
 0xbdd   :  { %3170 = vmatprep.mubr.msk.f32.mxu1 %vm3713_vm1, %v5329_v6 }
 0xc9c   :  { %v2544_v47 = vpop.f32.mrf.mxu1 }
 0xc9d   :  { %v2545_v48 = vadd.f32 %v2544_v47, %v4926_v24 }
 0xc9e   :  { %v3132_v32 = vpop.f32.mrf.mxu1 }
 0xc9f   :  { %v2549_v33 = vadd.f32 %v2545_v48, %v4935_v18  ;;  %v2548_v34 = vadd.f32 %v2545_v48, %v4928_v14  ;;  %v2551_v36 = vadd.f32 %v2545_v48, %v4930_v2  ;;  %v2550_v37 = vadd.f32 %v2545_v48, %v4932_v0 }
 0xca0   :  { %v2553_v39 = vadd.f32 %v2545_v48, %v4941_v5  ;;  %v2552_v46 = vadd.f32 %v2545_v48, %v4943_v11  ;;  %v2555_v24 = vadd.f32 %v2545_v48, %v4945_v7  ;;  %v2554_v49 = vadd.f32 %v2545_v48, %v4948_v17 }
 0xca1   :  { %3417 = vtanh.f32 %v2549_v33 }
 0xca2   :  { %3419 = vtanh.f32 %v2548_v34 }
 0xca3   :  { %3421 = vtanh.f32 %v2551_v36 }
 0xca4   :  { %3423 = vtanh.f32 %v2550_v37 }
 0xca5   :  { %3425 = vtanh.f32 %v2553_v39 }
 0xca6   :  { %3427 = vtanh.f32 %v2552_v46 }
 0xca7   :  { %3429 = vtanh.f32 %v2555_v24 }
 0xca8   :  { %3431 = vtanh.f32 %v2554_v49 }
 0xcae   :  { %v3418_v50 = vpop.eup %3417 }
 0xcaf   :  { %v3420_v51 = vpop.eup %3419  ;;  %v2565_v52 = vmul.f32 %v3418_v50, %v4956_v15 }
 0xcb0   :  { %v3422_v54 = vpop.eup %3421  ;;  %v2564_v55 = vmul.f32 %v3420_v51, %v4956_v15 }
 0xcb1   :  { %v3424_v56 = vpop.eup %3423  ;;  %2574 = vadd.xlane.f32.xlu1 %v2565_v52  ;;  %v2567_v57 = vmul.f32 %v3422_v54, %v4956_v15 }
 0xcb2   :  { %2572 = vadd.xlane.f32.xlu0 %v2564_v55  ;;  %v3426_v58 = vpop.eup %3425  ;;  %v2566_v59 = vmul.f32 %v3424_v56, %v4956_v15 }
 0xcb3   :  { %v3428_v60 = vpop.eup %3427  ;;  %v2569_v61 = vmul.f32 %v3426_v58, %v4956_v15 }
 0xcb4   :  { %v3430_v63 = vpop.eup %3429  ;;  %v2568_v1 = vmul.f32 %v3428_v60, %v4956_v15 }
 0xcb5   :  { %2578 = vadd.xlane.f32.xlu1 %v2567_v57  ;;  %v3432_v41 = vpop.eup %3431  ;;  %v2571_v28 = vmul.f32 %v3430_v63, %v4956_v15 }
 0xcb6   :  { %2576 = vadd.xlane.f32.xlu0 %v2566_v59  ;;  %v2570_v30 = vmul.f32 %v3432_v41, %v4956_v15  ;;  %v2676_v15 = vld [vmem:[#allocation13 + $0x50] sm:$0xff] }
 0xcb7   :  { %3144 = vmatpush3.msra.mxu0 %v2676_v15 }
 0xcb8   :  { %3145 = vmatprep.subr.mxu0 %v5329_v6 }
 0xcb9   :  { %2582 = vadd.xlane.f32.xlu1 %v2569_v61  ;;  %3146 = vmatpush3.msra.mxu0 %v2675_v29 }
 0xcba   :  { %2580 = vadd.xlane.f32.xlu0 %v2568_v1  ;;  %3147 = vmatprep.subr.mxu0 %v5329_v6 }
 0xcbb   :  { %3148 = vmatpush3.msra.mxu0 %v2674_v23 }
 0xcbc   :  { %3149 = vmatprep.subr.mxu0 %v5329_v6 }
 0xcbd   :  { %2586 = vadd.xlane.f32.xlu1 %v2571_v28  ;;  %3150 = vmatpush3.msra.mxu0 %v2673_v25 }
 0xcbe   :  { %2584 = vadd.xlane.f32.xlu0 %v2570_v30  ;;  %3151 = vmatprep.subr.mxu0 %v5329_v6 }
 0xcbf   :  { %3152 = vmatpush3.msra.mxu0 %v2672_v21 }
 0xcc0   :  { %3153 = vmatprep.subr.mxu0 %v5329_v6 }
 0xcc1   :  { %3154 = vmatpush3.msra.mxu0 %v2671_v20 }
 0xcc2   :  { %3155 = vmatprep.subr.mxu0 %v5329_v6 }
 0xcc3   :  { %3156 = vmatpush3.msra.mxu0 %v2670_v40 }
 0xcc4   :  { %3157 = vmatprep.subr.mxu0 %v5329_v6 }
 0xcc5   :  { %3158 = vmatpush3.msra.mxu0 %v2669_v3 }
 0xcc6   :  { %3159 = vmatprep.subr.mxu0 %v5329_v6 }
 0xcc7   :  { %3160 = vmatpush3.msra.mxu0 %v2668_v44 }
 0xcc8   :  { %3161 = vmatprep.subr.mxu0 %v5329_v6 }
 0xcc9   :  { %3162 = vmatpush3.msra.mxu0 %v2667_v4 }
 0xcca   :  { %3163 = vmatprep.subr.mxu0 %v5329_v6 }
 0xccb   :  { %3164 = vmatpush3.msra.mxu0 %v2666_v26 }
 0xd3a   :  { %v2575_v16 = vpop.xlane.xlu1 %2574 }
 0xd3b   :  { %v2573_v13 = vpop.xlane.xlu0 %2572  ;;  %3433 = vtanh.f32 %v2575_v16 }
 0xd3c   :  { %3435 = vtanh.f32 %v2573_v13 }
 0xd3e   :  { %v2579_v10 = vpop.xlane.xlu1 %2578 }
 0xd3f   :  { %v2577_v62 = vpop.xlane.xlu0 %2576 }
 0xd42   :  { %v2583_v9 = vpop.xlane.xlu1 %2582 }
 0xd43   :  { %3437 = vtanh.f32 %v2583_v9  ;;  %v2581_v8 = vpop.xlane.xlu0 %2580 }
 0xd44   :  { %3439 = vtanh.f32 %v2581_v8 }
 0xd45   :  { %3441 = vtanh.f32 %v2579_v10 }
 0xd46   :  { %3443 = vtanh.f32 %v2577_v62  ;;  %v2587_v12 = vpop.xlane.xlu1 %2586 }
 0xd47   :  { %3445 = vtanh.f32 %v2587_v12  ;;  %v2585_v35 = vpop.xlane.xlu0 %2584 }
 0xd48   :  { %3447 = vtanh.f32 %v2585_v35  ;;  %v3434_v53 = vpop.eup %3433 }
 0xd49   :  { %v3436_v42 = vpop.eup %3435  ;;  %v2597_v34 = vmul.f32 10.0, %v3434_v53 }
 0xd4a   :  { %v2596_v36 = vmul.f32 10.0, %v3436_v42 }
 0xd50   :  { %v3438_v6 = vpop.eup %3437 }
 0xd51   :  { %v3440_v43 = vpop.eup %3439  ;;  %v2601_v47 = vmul.f32 10.0, %v3438_v6 }
 0xd52   :  { %v3442_v45 = vpop.eup %3441  ;;  %v2600_v48 = vmul.f32 10.0, %v3440_v43 }
 0xd53   :  { %v3444_v32 = vpop.eup %3443  ;;  %v2599_v39 = vmul.f32 10.0, %v3442_v45  ;;  %v2605_v49 = vmax.f32 %v2597_v34, %v2601_v47 }
 0xd54   :  { %v3446_v33 = vpop.eup %3445  ;;  %v2598_v24 = vmul.f32 10.0, %v3444_v32  ;;  %v2604_v50 = vmax.f32 %v2596_v36, %v2600_v48 }
 0xd55   :  { %v3448_v37 = vpop.eup %3447  ;;  %v2603_v46 = vmul.f32 10.0, %v3446_v33 }
 0xd56   :  { %v2602_v51 = vmul.f32 10.0, %v3448_v37  ;;  %v2608_v55 = vmax.f32 %v2604_v50, %v2605_v49 }
 0xd57   :  { %v2607_v52 = vmax.f32 %v2599_v39, %v2603_v46 }
 0xd58   :  { %v2606_v54 = vmax.f32 %v2598_v24, %v2602_v51 }
 0xd5a   :  { %v2609_v56 = vmax.f32 %v2606_v54, %v2607_v52  ;;  %v129_v54 = vld [vmem:[#allocation15 + $0x6] ss:$0 sm:$0xff] }
 0xd5c   :  { %v2610_v57 = vmax.f32 %v2608_v55, %v2609_v56  ;;  %v3714_v55 = vmov 0  }
 0xd5d   :  { %3188 = vset.pattern.permute.xlu0 %v3714_v55 }
 0xd5e   :  { %v2611_v58 = vsub.f32 %v2596_v36, %v2610_v57  ;;  %v2612_v59 = vsub.f32 %v2597_v34, %v2610_v57  ;;  %v2613_v60 = vsub.f32 %v2598_v24, %v2610_v57  ;;  %v2614_v61 = vsub.f32 %v2599_v39, %v2610_v57  ;;  %2756 = vperm.xlu0 %3188, %v129_v54  }
 0xd5f   :  { %v2615_v41 = vsub.f32 %v2600_v48, %v2610_v57  ;;  %v2616_v30 = vsub.f32 %v2601_v47, %v2610_v57  ;;  %v2617_v27 = vsub.f32 %v2602_v51, %v2610_v57  ;;  %v2618_v22 = vsub.f32 %v2603_v46, %v2610_v57 }
 0xd60   :  { %v2619_v63 = vmul.f32 1.442695, %v2611_v58  ;;  %v2621_v1 = vmul.f32 1.442695, %v2612_v59  ;;  %v2623_v28 = vmul.f32 1.442695, %v2613_v60 }
 0xd61   :  { %v2625_v38 = vmul.f32 1.442695, %v2614_v61  ;;  %v2627_v31 = vmul.f32 1.442695, %v2615_v41  ;;  %v2629_v19 = vmul.f32 1.442695, %v2616_v30 }
 0xd62   :  { %3449 = vpow2.f32 %v2619_v63  ;;  %v2631_v15 = vmul.f32 1.442695, %v2617_v27  ;;  %v2633_v29 = vmul.f32 1.442695, %v2618_v22 }
 0xd63   :  { %3451 = vpow2.f32 %v2621_v1 }
 0xd64   :  { %3453 = vpow2.f32 %v2623_v28 }
 0xd65   :  { %3455 = vpow2.f32 %v2625_v38 }
 0xd66   :  { %3457 = vpow2.f32 %v2627_v31 }
 0xd67   :  { %3459 = vpow2.f32 %v2629_v19 }
 0xd68   :  { %3461 = vpow2.f32 %v2631_v15 }
 0xd69   :  { %3463 = vpow2.f32 %v2633_v29 }
 0xd6f   :  { %v3450_v23 = vpop.eup %3449 }
 0xd70   :  { %v3452_v25 = vpop.eup %3451 }
 0xd71   :  { %v2635_v21 = vadd.f32 %v3452_v25, %v3450_v23  ;;  %v3454_v20 = vpop.eup %3453 }
 0xd72   :  { %v3456_v3 = vpop.eup %3455 }
 0xd73   :  { %v2636_v40 = vadd.f32 %v3454_v20, %v2635_v21  ;;  %v3458_v4 = vpop.eup %3457 }
 0xd74   :  { %v3460_v16 = vpop.eup %3459 }
 0xd75   :  { %v2637_v44 = vadd.f32 %v3456_v3, %v2636_v40  ;;  %v3462_v10 = vpop.eup %3461 }
 0xd76   :  { %v3464_v9 = vpop.eup %3463 }
 0xd77   :  { %v2638_v26 = vadd.f32 %v3458_v4, %v2637_v44 }
 0xd79   :  { %v2639_v13 = vadd.f32 %v3460_v16, %v2638_v26 }
 0xd7b   :  { %v2640_v62 = vadd.f32 %v3462_v10, %v2639_v13 }
 0xd7d   :  { %v2641_v8 = vadd.f32 %v3464_v9, %v2640_v62 }
 0xd7f   :  { %3465 = vrcp.f32 %v2641_v8 }
 0xd8c   :  { %v3466_v12 = vpop.eup %3465 }
 0xd8d   :  { %v2643_v35 = vmul.f32 %v3466_v12, %v3450_v23  ;;  %v2644_v53 = vmul.f32 %v3466_v12, %v3452_v25  ;;  %v2645_v42 = vmul.f32 %v3466_v12, %v3454_v20  ;;  %v2646_v6 = vmul.f32 %v3466_v12, %v3456_v3 }
 0xd8e   :  { %v2647_v47 = vmul.f32 %v3466_v12, %v3458_v4  ;;  %v2648_v33 = vmul.f32 %v3466_v12, %v3460_v16  ;;  %v2649_v37 = vmul.f32 %v3466_v12, %v3462_v10  ;;  %v2650_v24 = vmul.f32 %v3466_v12, %v3464_v9 }
 0xd8f   :  { %v2651_v43 = vmul.f32 %v2643_v35, %v4928_v14  ;;  %v2652_v45 = vmul.f32 %v2644_v53, %v4935_v18  ;;  %v2653_v48 = vmul.f32 %v2645_v42, %v4932_v0  ;;  %v2654_v34 = vmul.f32 %v2646_v6, %v4930_v2  ;;  %v128_v2 = vld [vmem:[#allocation15 + $0x5] ss:$0 sm:$0xff] }
 0xd90   :  { %v2655_v39 = vmul.f32 %v2647_v47, %v4943_v11  ;;  %v2656_v49 = vmul.f32 %v2648_v33, %v4941_v5  ;;  %v2657_v14 = vmul.f32 %v2649_v37, %v4948_v17  ;;  %v2658_v18 = vmul.f32 %v2650_v24, %v4945_v7  ;;  %v2753_v5 = vld [vmem:[%s5055_s6 + $0x1] sm:$0x1] }
 0xd91   :  { %v2659_v32 = vadd.f32 %v2652_v45, %v2651_v43 }
 0xd93   :  { %v2660_v36 = vadd.f32 %v2659_v32, %v2653_v48 }
 0xd95   :  { %v2661_v46 = vadd.f32 %v2660_v36, %v2654_v34 }
 0xd97   :  { %v2662_v50 = vadd.f32 %v2661_v46, %v2655_v39 }
 0xd99   :  { %v2663_v51 = vadd.f32 %v2662_v50, %v2656_v49 }
 0xd9b   :  { %v2664_v52 = vadd.f32 %v2663_v51, %v2657_v14 }
 0xd9d   :  { %v2665_v0 = vadd.f32 %v2664_v52, %v2658_v18 }
 0xd9f   :  { %3166 = vmatmul.mubr.f32.vlgmr.msra.gmra.mxu0 %v2665_v0 }
 0xdd9   :  { %v2757_v17 = vpop.permute.xlu0 %2756 }
 0xe5f   :  { %v2748_v56 = vpop.f32.mrf.mxu0 }
 0xe60   :  { %v2749_v11 = vadd.f32 %v2748_v56, %v128_v2 }
 0xe61   :  { %v3167_v57 = vpop.f32.mrf.mxu0 }
 0xe62   :  { %v2752_v58 = vmax.f32 %v2749_v11, 0.0 }
 0xe64   :  { %3169 = vmatpush3.xpose.msra.mxu1 %v2752_v58 }
 0xe67   :  { %3171 = vmatmul.mubr.f32.vlgmr.msra.gmra.mxu1 %v2753_v5 }
 0xf27   :  { %v2825_v7 = vpop.f32.mrf.mxu1 }
 0xf28   :  { %v2826_v59 = vadd.f32 %v2825_v7, %v2757_v17 }
 0xf29   :  { %v3172_v60 = vpop.f32.mrf.mxu1 }
 0xf2a   :  { %2830 = vst.msk [vmem:[#allocation16] sm:$0x1] %vm2829_vm2, %v2826_v59 }
 0xf2b   :  { %3682 = shalt.err (!%p3679_p11)
}
 0xf2c   :  { %2840 = dma.vmem_to_hbm [thread:$0]  %s2838_s20, 16, %s5057_s8, [#allocation6]  }
 0xf2d   :  { %3699 = dma.done.wait [#allocation6], 16  }
 0xf2e   :  { %3700 = vsyncadd [#allocation6], 4294967280 }
 0xf2f   :  { %2844 = vsyncpa [#allocation5], 1 }
 0xf30   :  { %2845 = vsyncpa [#allocation8], 1 }
 0xf31   :  { %2846 = vsyncpa [#allocation11], 1 }
 0xf32   :  { %2847 = vsyncpa [#allocation14], 1 }
 0xf33   :  { %2848 = vsyncpa [#allocation6], 1 }

</bundles_post_ra>
